<compile_context>
chip_gen: v6e
topology: v6e:2x2x1
jax: 0.10.0
libtpu: 0.0.40
codegen_flags: <defaults>
</compile_context>

<pallas_src>
import jax
import jax.numpy as jnp
from jax import lax
from jax.experimental import pallas as pl
from jax.experimental.pallas import tpu as pltpu


# ---------------------------------------------------------------------------
# Fused kernel: 3 x (conv3x3x3 + folded BN) + residual, one grid step per batch chunk
# ---------------------------------------------------------------------------
def _make_fused_kernel(NB, D, H, W, Cin, Cout):
    L1 = H * W * Cin          # stage-1 input lane width
    L2 = H * W * Cout         # stage-2/3 input lane width == output lane width

    def im2col(buf_ref, src, L):
        """Scatter src ((NB*D, L), target dtype) into the depth im2col buffer:
        column block kd holds the depth-shifted copy x[d + kd - 1]; the
        batch-boundary halo rows stay zero (buffer zeroed at kernel start).
        All stores are contiguous and lane-aligned (L is a multiple of 128)."""
        buf_ref[:, L:2 * L] = src                                      # kd = 1 (center)
        for n in range(NB):
            r = n * D
            buf_ref[r + 1:r + D, 0:L] = src[r:r + D - 1, :]            # kd = 0
            buf_ref[r:r + D - 1, 2 * L:3 * L] = src[r + 1:r + D, :]    # kd = 2

    def conv_bn(buf_ref, wt_ref, scale, bias, relu):
        """3x3x3 conv (pad=1) + folded BN (+ReLU) as ONE block-Toeplitz matmul."""
        y = jnp.dot(buf_ref[...], wt_ref[...], preferred_element_type=jnp.float32)
        y = y * scale + bias
        return jnp.maximum(y, 0.0) if relu else y

    def kernel(x_ref, wt1_ref, wt2_ref, wt3_ref, sb_ref, out_ref, b1_ref, b2_ref):
        # Zero the (tiny) im2col buffers: only the batch-boundary depth-halo rows
        # really need it and the interiors are fully rewritten every stage, but an
        # unconditional zero keeps the "parallel" batch grid safe if chunked later.
        b1_ref[...] = jnp.zeros(b1_ref.shape, b1_ref.dtype)
        b2_ref[...] = jnp.zeros(b2_ref.shape, b2_ref.dtype)
        sb = sb_ref[...]                                               # (3, 2, L2) f32

        # stage 1: x1 = relu(bn1(conv1(x)))      one (M, 3*L1) x (3*L1, L2) dot
        im2col(b1_ref, x_ref[...], L1)
        x1 = conv_bn(b1_ref, wt1_ref, sb[0, 0], sb[0, 1], relu=True)

        # stage 2: x2 = relu(bn2(conv2(x1)))     one (M, 3*L2) x (3*L2, L2) dot
        im2col(b2_ref, x1.astype(b2_ref.dtype), L2)
        x2 = conv_bn(b2_ref, wt2_ref, sb[1, 0], sb[1, 1], relu=True)

        # stage 3 + residual (PyTorch spec adds x1, not the block input):
        #   out = relu(x1 + bn3(conv3(x2)))
        im2col(b2_ref, x2.astype(b2_ref.dtype), L2)
        x3 = conv_bn(b2_ref, wt3_ref, sb[2, 0], sb[2, 1], relu=False)
        out_ref[...] = jnp.maximum(x1 + x3, 0.0)

    return kernel


# ---------------------------------------------------------------------------
# Weight transform: (3,3,3,Cin,Cout) conv kernel -> block-Toeplitz matmul weight
# with H/W pad=1 folded in (zero rows where the tap reads outside the extent).
# Row layout: kd*(H*W*Cin) + (h_src*W + w_src)*Cin + ci  (matches the im2col buffer)
# Col layout: (h_out*W + w_out)*Cout + co                (lane-dense output)
# ---------------------------------------------------------------------------
def _toeplitz_weight(w, H, W):
    _, _, _, cin, cout = w.shape
    # ih[h_src, h_out, kh] = 1 iff h_src == h_out + kh - 1  (out-of-range taps -> 0)
    ih = (jnp.arange(H)[:, None, None] ==
          (jnp.arange(H)[None, :, None] + jnp.arange(3)[None, None, :] - 1)).astype(jnp.float32)
    iw = (jnp.arange(W)[:, None, None] ==
          (jnp.arange(W)[None, :, None] + jnp.arange(3)[None, None, :] - 1)).astype(jnp.float32)
    # wt[kd, h_src, w_src, ci, h_out, w_out, co]
    wt = jnp.einsum("ahx,bwy,dxyio->dabihwo", ih, iw, w.astype(jnp.float32))
    return wt.reshape(3 * H * W * cin, H * W * cout).astype(jnp.bfloat16)


def prepare_kernel_params(params, H, W):
    """One-time transform of conv/BN params into the lane-dense block-Toeplitz
    matmul weights + tiled folded-BN scale/bias.  Hoisted out of the per-call
    forward (the einsum builds ~3.8 MiB of weights and must not run per call)."""
    sb = jnp.stack([
        jnp.stack([jnp.tile(params["s1"], H * W), jnp.tile(params["b1"], H * W)]),
        jnp.stack([jnp.tile(params["s2"], H * W), jnp.tile(params["b2"], H * W)]),
        jnp.stack([jnp.tile(params["s3"], H * W), jnp.tile(params["b3"], H * W)]),
    ]).astype(jnp.float32)                                   # (3, 2, H*W*Cout)
    return {
        "wt1": _toeplitz_weight(params["w1"], H, W),         # (3*H*W*Cin,  H*W*Cout) bf16
        "wt2": _toeplitz_weight(params["w2"], H, W),         # (3*H*W*Cout, H*W*Cout) bf16
        "wt3": _toeplitz_weight(params["w3"], H, W),
        "sb": sb,
    }


# ---------------------------------------------------------------------------
# Wrapper around pallas_call
# ---------------------------------------------------------------------------
@jax.jit
def residual_block_forward(x_ncdhw, kparams):
    """PyTorch semantics:
       x1 = relu(bn1(conv1(x))); x2 = relu(bn2(conv2(x1)));
       x3 = bn3(conv3(x2));      out = relu(x1 + x3)
    Input/output in PyTorch NCDHW layout."""
    N, Cin, D, H, W = x_ncdhw.shape
    L1 = H * W * Cin
    L2 = kparams["sb"].shape[-1]
    Cout = L2 // (H * W)

    NB = N        # whole batch folded into the matmul M dimension -> grid=(1,)
    # TODO(synk): for large N chunk the batch (NB < N, grid=(N//NB,), "parallel")
    #             so v7x's two TensorCores each take a chunk, and single-buffer the
    #             constant weight specs (pipeline_mode=pl.Buffered(1)) at that point.
    assert N % NB == 0

    # NCDHW -> lane-dense (N*D, H*W*Cin) bf16 rows (batch folded into M rows).
    # TODO(synk): the NCDHW<->lane-dense transposes are wrapper overhead; keep the
    #             surrounding model in NDHWC / lane-dense layout if possible.
    x = jnp.transpose(x_ncdhw, (0, 2, 3, 4, 1)).reshape(N * D, L1).astype(jnp.bfloat16)

    kernel = _make_fused_kernel(NB, D, H, W, Cin, Cout)

    out = pl.pallas_call(
        kernel,
        out_shape=jax.ShapeDtypeStruct((N * D, L2), jnp.float32),
        grid=(N // NB,),
        in_specs=[
            pl.BlockSpec((NB * D, L1), lambda i: (i, 0)),
            pl.BlockSpec(kparams["wt1"].shape, lambda i: (0, 0)),
            pl.BlockSpec(kparams["wt2"].shape, lambda i: (0, 0)),
            pl.BlockSpec(kparams["wt3"].shape, lambda i: (0, 0)),
            pl.BlockSpec(kparams["sb"].shape, lambda i: (0, 0, 0)),
        ],
        out_specs=pl.BlockSpec((NB * D, L2), lambda i: (i, 0)),
        scratch_shapes=[
            pltpu.VMEM((NB * D, 3 * L1), jnp.bfloat16),   # stage-1 im2col (Cin lane layout)
            pltpu.VMEM((NB * D, 3 * L2), jnp.bfloat16),   # stage-2/3 im2col (Cout lane layout)
        ],
        compiler_params=pltpu.CompilerParams(
            dimension_semantics=("parallel",),
            vmem_limit_bytes=32 * 1024 * 1024,
        ),
    )(x, kparams["wt1"], kparams["wt2"], kparams["wt3"], kparams["sb"])

    out = out.reshape(N, D, H, W, Cout)                   # lane-dense -> NDHWC
    return jnp.transpose(out, (0, 4, 1, 2, 3))            # -> NCDHW


# ---------------------------------------------------------------------------
# Deterministic parameter init (conv weights + folded eval-mode BN)
# ---------------------------------------------------------------------------
def _bn_fold(key, c, eps=1e-5):
    kg, kb, km, kv = jax.random.split(key, 4)
    gamma = 1.0 + 0.1 * jax.random.normal(kg, (c,), jnp.float32)
    beta = 0.1 * jax.random.normal(kb, (c,), jnp.float32)
    mean = 0.1 * jax.random.normal(km, (c,), jnp.float32)
    var = jnp.abs(jax.random.normal(kv, (c,), jnp.float32)) + 0.5
    scale = gamma / jnp.sqrt(var + eps)
    bias = beta - mean * scale
    return scale, bias


def init_params(key, cin, cout):
    k1, k2, k3, kb1, kb2, kb3 = jax.random.split(key, 6)
    params = {}
    params["w1"] = 0.1 * jax.random.normal(k1, (3, 3, 3, cin, cout), jnp.float32)
    params["w2"] = 0.1 * jax.random.normal(k2, (3, 3, 3, cout, cout), jnp.float32)
    params["w3"] = 0.1 * jax.random.normal(k3, (3, 3, 3, cout, cout), jnp.float32)
    params["s1"], params["b1"] = _bn_fold(kb1, cout)
    params["s2"], params["b2"] = _bn_fold(kb2, cout)
    params["s3"], params["b3"] = _bn_fold(kb3, cout)
    return params


# ---------------------------------------------------------------------------
# Pure-JAX reference (quantization-matched: bf16 conv inputs, f32 accumulation)
# ---------------------------------------------------------------------------
def _q(t):
    return t.astype(jnp.bfloat16).astype(jnp.float32)


def _ref_conv_bn(x, w, s, b):
    y = lax.conv_general_dilated(
        _q(x), _q(w), window_strides=(1, 1, 1), padding="SAME",
        dimension_numbers=("NDHWC", "DHWIO", "NDHWC"),
        precision=lax.Precision.HIGHEST)
    return y * s + b


def residual_block_ref(x_ncdhw, p):
    x = jnp.transpose(x_ncdhw, (0, 2, 3, 4, 1))
    x1 = jax.nn.relu(_ref_conv_bn(x, p["w1"], p["s1"], p["b1"]))
    x2 = jax.nn.relu(_ref_conv_bn(x1, p["w2"], p["s2"], p["b2"]))
    x3 = _ref_conv_bn(x2, p["w3"], p["s3"], p["b3"])
    out = jax.nn.relu(x1 + x3)
    return jnp.transpose(out, (0, 4, 1, 2, 3))


# ---------------------------------------------------------------------------
if __name__ == "__main__":
    N, Cin, Cout, D, H, W = 2, 4, 8, 8, 8, 8

    key = jax.random.PRNGKey(0)
    kx, kp = jax.random.split(key)
    x = jax.random.normal(kx, (N, Cin, D, H, W), jnp.float32)   # PyTorch NCDHW
    params = init_params(kp, Cin, Cout)

    # One-time weight transform (hoisted out of the hot forward path).
    kparams = prepare_kernel_params(params, H, W)

    out = jax.block_until_ready(residual_block_forward(x, kparams))
    ref = jax.block_until_ready(residual_block_ref(x, params))

    assert out.shape == (N, Cout, D, H, W)
    assert jnp.allclose(out, ref, rtol=1e-3, atol=1e-3), "mismatch vs JAX reference"

    print("KERNEL_OK")
</pallas_src>

<mosaic_0001>
module attributes {stable_mosaic.version = 11 : i64} {
  func.func @kernel(%arg0: i32, %arg1: memref<16x256xbf16, #tpu.memory_space<vmem>>, %arg2: memref<768x512xbf16, #tpu.memory_space<vmem>>, %arg3: memref<1536x512xbf16, #tpu.memory_space<vmem>>, %arg4: memref<1536x512xbf16, #tpu.memory_space<vmem>>, %arg5: memref<3x2x512xf32, #tpu.memory_space<vmem>>, %arg6: memref<16x512xf32, #tpu.memory_space<vmem>>, %arg7: memref<16x768xbf16, #tpu.memory_space<vmem>>, %arg8: memref<16x1536xbf16, #tpu.memory_space<vmem>>) attributes {dimension_semantics = [#tpu.dimension_semantics<parallel>], iteration_bounds = array<i64: 1>, scalar_prefetch = 0 : i64, scratch_operands = 2 : i64, tpu.core_type = #tpu.core_type<tc>, window_params = [{transform_indices = @transform_0, window_bounds = array<i64: 16, 256>}, {pipeline_mode = #tpu.pipeline_mode<synchronous>, transform_indices = @transform_1, window_bounds = array<i64: 768, 512>}, {pipeline_mode = #tpu.pipeline_mode<synchronous>, transform_indices = @transform_2, window_bounds = array<i64: 1536, 512>}, {pipeline_mode = #tpu.pipeline_mode<synchronous>, transform_indices = @transform_3, window_bounds = array<i64: 1536, 512>}, {pipeline_mode = #tpu.pipeline_mode<synchronous>, transform_indices = @transform_4, window_bounds = array<i64: 3, 2, 512>}, {transform_indices = @transform_5, window_bounds = array<i64: 16, 512>}]} {
    %cst = arith.constant 0.000000e+00 : bf16
    %0 = vector.broadcast %cst : bf16 to vector<16x768xbf16>
    %c0 = arith.constant 0 : index
    %c0_0 = arith.constant 0 : index
    %1 = vector.load %arg7[%c0, %c0_0] : memref<16x768xbf16, #tpu.memory_space<vmem>>, vector<16x768xbf16>
    tpu.vector_store %arg7[%c0, %c0_0], %0 {strides = array<i32>} : memref<16x768xbf16, #tpu.memory_space<vmem>>, vector<16x768xbf16>,
    %cst_1 = arith.constant 0.000000e+00 : bf16
    %2 = vector.broadcast %cst_1 : bf16 to vector<16x1536xbf16>
    %c0_2 = arith.constant 0 : index
    %c0_3 = arith.constant 0 : index
    %3 = vector.load %arg8[%c0_2, %c0_3] : memref<16x1536xbf16, #tpu.memory_space<vmem>>, vector<16x1536xbf16>
    tpu.vector_store %arg8[%c0_2, %c0_3], %2 {strides = array<i32>} : memref<16x1536xbf16, #tpu.memory_space<vmem>>, vector<16x1536xbf16>,
    %c0_4 = arith.constant 0 : index
    %c0_5 = arith.constant 0 : index
    %c0_6 = arith.constant 0 : index
    %4 = vector.load %arg5[%c0_4, %c0_5, %c0_6] : memref<3x2x512xf32, #tpu.memory_space<vmem>>, vector<3x2x512xf32>
    %c0_7 = arith.constant 0 : index
    %c0_8 = arith.constant 0 : index
    %5 = vector.load %arg1[%c0_7, %c0_8] : memref<16x256xbf16, #tpu.memory_space<vmem>>, vector<16x256xbf16>
    %c0_9 = arith.constant 0 : index
    %c256 = arith.constant 256 : index
    %6 = vector.load %arg7[%c0_9, %c256] : memref<16x768xbf16, #tpu.memory_space<vmem>>, vector<16x256xbf16>
    tpu.vector_store %arg7[%c0_9, %c256], %5 {strides = array<i32>} : memref<16x768xbf16, #tpu.memory_space<vmem>>, vector<16x256xbf16>,
    %7 = vector.extract_strided_slice %5 {offsets = [0, 0], sizes = [7, 256], strides = [1, 1]} : vector<16x256xbf16> to vector<7x256xbf16>
    %c1 = arith.constant 1 : index
    %c0_10 = arith.constant 0 : index
    %8 = vector.load %arg7[%c1, %c0_10] : memref<16x768xbf16, #tpu.memory_space<vmem>>, vector<7x256xbf16>
    tpu.vector_store %arg7[%c1, %c0_10], %7 {strides = array<i32>} : memref<16x768xbf16, #tpu.memory_space<vmem>>, vector<7x256xbf16>,
    %9 = vector.extract_strided_slice %5 {offsets = [1, 0], sizes = [7, 256], strides = [1, 1]} : vector<16x256xbf16> to vector<7x256xbf16>
    %c0_11 = arith.constant 0 : index
    %c512 = arith.constant 512 : index
    %10 = vector.load %arg7[%c0_11, %c512] : memref<16x768xbf16, #tpu.memory_space<vmem>>, vector<7x256xbf16>
    tpu.vector_store %arg7[%c0_11, %c512], %9 {strides = array<i32>} : memref<16x768xbf16, #tpu.memory_space<vmem>>, vector<7x256xbf16>,
    %11 = vector.extract_strided_slice %5 {offsets = [8, 0], sizes = [7, 256], strides = [1, 1]} : vector<16x256xbf16> to vector<7x256xbf16>
    %c9 = arith.constant 9 : index
    %c0_12 = arith.constant 0 : index
    %12 = vector.load %arg7[%c9, %c0_12] : memref<16x768xbf16, #tpu.memory_space<vmem>>, vector<7x256xbf16>
    tpu.vector_store %arg7[%c9, %c0_12], %11 {strides = array<i32>} : memref<16x768xbf16, #tpu.memory_space<vmem>>, vector<7x256xbf16>,
    %13 = vector.extract_strided_slice %5 {offsets = [9, 0], sizes = [7, 256], strides = [1, 1]} : vector<16x256xbf16> to vector<7x256xbf16>
    %c8 = arith.constant 8 : index
    %c512_13 = arith.constant 512 : index
    %14 = vector.load %arg7[%c8, %c512_13] : memref<16x768xbf16, #tpu.memory_space<vmem>>, vector<7x256xbf16>
    tpu.vector_store %arg7[%c8, %c512_13], %13 {strides = array<i32>} : memref<16x768xbf16, #tpu.memory_space<vmem>>, vector<7x256xbf16>,
    %15 = vector.extract_strided_slice %4 {offsets = [0, 0, 0], sizes = [1, 1, 512], strides = [1, 1, 1]} : vector<3x2x512xf32> to vector<1x1x512xf32>
    %16 = vector.shape_cast %15 : vector<1x1x512xf32> to vector<512xf32>
    %17 = vector.extract_strided_slice %4 {offsets = [0, 1, 0], sizes = [1, 1, 512], strides = [1, 1, 1]} : vector<3x2x512xf32> to vector<1x1x512xf32>
    %18 = vector.shape_cast %17 : vector<1x1x512xf32> to vector<512xf32>
    %c0_14 = arith.constant 0 : index
    %c0_15 = arith.constant 0 : index
    %19 = vector.load %arg7[%c0_14, %c0_15] : memref<16x768xbf16, #tpu.memory_space<vmem>>, vector<16x768xbf16>
    %c0_16 = arith.constant 0 : index
    %c0_17 = arith.constant 0 : index
    %20 = vector.load %arg2[%c0_16, %c0_17] : memref<768x512xbf16, #tpu.memory_space<vmem>>, vector<768x512xbf16>
    %cst_18 = arith.constant dense<0.000000e+00> : vector<16x512xf32>
    %21 = tpu.matmul %19, %20, %cst_18 {dimension_numbers = #tpu.dot_dimension_numbers<[1], [0], [0], [1], [0, 0, 1, 1], [], []>} : vector<16x768xbf16>, vector<768x512xbf16>, vector<16x512xf32> -> vector<16x512xf32>
    %22 = vector.shape_cast %16 : vector<512xf32> to vector<1x512xf32>
    %23 = vector.broadcast %22 : vector<1x512xf32> to vector<16x512xf32>
    %24 = arith.mulf %21, %23 : vector<16x512xf32>
    %25 = vector.shape_cast %18 : vector<512xf32> to vector<1x512xf32>
    %26 = vector.broadcast %25 : vector<1x512xf32> to vector<16x512xf32>
    %27 = arith.addf %24, %26 : vector<16x512xf32>
    %cst_19 = arith.constant 0.000000e+00 : f32
    %28 = vector.broadcast %cst_19 : f32 to vector<16x512xf32>
    %29 = arith.maximumf %27, %28 : vector<16x512xf32>
    %30 = arith.truncf %29 : vector<16x512xf32> to vector<16x512xbf16>
    %c0_20 = arith.constant 0 : index
    %c512_21 = arith.constant 512 : index
    %31 = vector.load %arg8[%c0_20, %c512_21] : memref<16x1536xbf16, #tpu.memory_space<vmem>>, vector<16x512xbf16>
    tpu.vector_store %arg8[%c0_20, %c512_21], %30 {strides = array<i32>} : memref<16x1536xbf16, #tpu.memory_space<vmem>>, vector<16x512xbf16>,
    %32 = vector.extract_strided_slice %30 {offsets = [0, 0], sizes = [7, 512], strides = [1, 1]} : vector<16x512xbf16> to vector<7x512xbf16>
    %c1_22 = arith.constant 1 : index
    %c0_23 = arith.constant 0 : index
    %33 = vector.load %arg8[%c1_22, %c0_23] : memref<16x1536xbf16, #tpu.memory_space<vmem>>, vector<7x512xbf16>
    tpu.vector_store %arg8[%c1_22, %c0_23], %32 {strides = array<i32>} : memref<16x1536xbf16, #tpu.memory_space<vmem>>, vector<7x512xbf16>,
    %34 = vector.extract_strided_slice %30 {offsets = [1, 0], sizes = [7, 512], strides = [1, 1]} : vector<16x512xbf16> to vector<7x512xbf16>
    %c0_24 = arith.constant 0 : index
    %c1024 = arith.constant 1024 : index
    %35 = vector.load %arg8[%c0_24, %c1024] : memref<16x1536xbf16, #tpu.memory_space<vmem>>, vector<7x512xbf16>
    tpu.vector_store %arg8[%c0_24, %c1024], %34 {strides = array<i32>} : memref<16x1536xbf16, #tpu.memory_space<vmem>>, vector<7x512xbf16>,
    %36 = vector.extract_strided_slice %30 {offsets = [8, 0], sizes = [7, 512], strides = [1, 1]} : vector<16x512xbf16> to vector<7x512xbf16>
    %c9_25 = arith.constant 9 : index
    %c0_26 = arith.constant 0 : index
    %37 = vector.load %arg8[%c9_25, %c0_26] : memref<16x1536xbf16, #tpu.memory_space<vmem>>, vector<7x512xbf16>
    tpu.vector_store %arg8[%c9_25, %c0_26], %36 {strides = array<i32>} : memref<16x1536xbf16, #tpu.memory_space<vmem>>, vector<7x512xbf16>,
    %38 = vector.extract_strided_slice %30 {offsets = [9, 0], sizes = [7, 512], strides = [1, 1]} : vector<16x512xbf16> to vector<7x512xbf16>
    %c8_27 = arith.constant 8 : index
    %c1024_28 = arith.constant 1024 : index
    %39 = vector.load %arg8[%c8_27, %c1024_28] : memref<16x1536xbf16, #tpu.memory_space<vmem>>, vector<7x512xbf16>
    tpu.vector_store %arg8[%c8_27, %c1024_28], %38 {strides = array<i32>} : memref<16x1536xbf16, #tpu.memory_space<vmem>>, vector<7x512xbf16>,
    %40 = vector.extract_strided_slice %4 {offsets = [1, 0, 0], sizes = [1, 1, 512], strides = [1, 1, 1]} : vector<3x2x512xf32> to vector<1x1x512xf32>
    %41 = vector.shape_cast %40 : vector<1x1x512xf32> to vector<512xf32>
    %42 = vector.extract_strided_slice %4 {offsets = [1, 1, 0], sizes = [1, 1, 512], strides = [1, 1, 1]} : vector<3x2x512xf32> to vector<1x1x512xf32>
    %43 = vector.shape_cast %42 : vector<1x1x512xf32> to vector<512xf32>
    %c0_29 = arith.constant 0 : index
    %c0_30 = arith.constant 0 : index
    %44 = vector.load %arg8[%c0_29, %c0_30] : memref<16x1536xbf16, #tpu.memory_space<vmem>>, vector<16x1536xbf16>
    %c0_31 = arith.constant 0 : index
    %c0_32 = arith.constant 0 : index
    %45 = vector.load %arg3[%c0_31, %c0_32] : memref<1536x512xbf16, #tpu.memory_space<vmem>>, vector<1536x512xbf16>
    %cst_33 = arith.constant dense<0.000000e+00> : vector<16x512xf32>
    %46 = tpu.matmul %44, %45, %cst_33 {dimension_numbers = #tpu.dot_dimension_numbers<[1], [0], [0], [1], [0, 0, 1, 1], [], []>} : vector<16x1536xbf16>, vector<1536x512xbf16>, vector<16x512xf32> -> vector<16x512xf32>
    %47 = vector.shape_cast %41 : vector<512xf32> to vector<1x512xf32>
    %48 = vector.broadcast %47 : vector<1x512xf32> to vector<16x512xf32>
    %49 = arith.mulf %46, %48 : vector<16x512xf32>
    %50 = vector.shape_cast %43 : vector<512xf32> to vector<1x512xf32>
    %51 = vector.broadcast %50 : vector<1x512xf32> to vector<16x512xf32>
    %52 = arith.addf %49, %51 : vector<16x512xf32>
    %cst_34 = arith.constant 0.000000e+00 : f32
    %53 = vector.broadcast %cst_34 : f32 to vector<16x512xf32>
    %54 = arith.maximumf %52, %53 : vector<16x512xf32>
    %55 = arith.truncf %54 : vector<16x512xf32> to vector<16x512xbf16>
    %c0_35 = arith.constant 0 : index
    %c512_36 = arith.constant 512 : index
    %56 = vector.load %arg8[%c0_35, %c512_36] : memref<16x1536xbf16, #tpu.memory_space<vmem>>, vector<16x512xbf16>
    tpu.vector_store %arg8[%c0_35, %c512_36], %55 {strides = array<i32>} : memref<16x1536xbf16, #tpu.memory_space<vmem>>, vector<16x512xbf16>,
    %57 = vector.extract_strided_slice %55 {offsets = [0, 0], sizes = [7, 512], strides = [1, 1]} : vector<16x512xbf16> to vector<7x512xbf16>
    %c1_37 = arith.constant 1 : index
    %c0_38 = arith.constant 0 : index
    %58 = vector.load %arg8[%c1_37, %c0_38] : memref<16x1536xbf16, #tpu.memory_space<vmem>>, vector<7x512xbf16>
    tpu.vector_store %arg8[%c1_37, %c0_38], %57 {strides = array<i32>} : memref<16x1536xbf16, #tpu.memory_space<vmem>>, vector<7x512xbf16>,
    %59 = vector.extract_strided_slice %55 {offsets = [1, 0], sizes = [7, 512], strides = [1, 1]} : vector<16x512xbf16> to vector<7x512xbf16>
    %c0_39 = arith.constant 0 : index
    %c1024_40 = arith.constant 1024 : index
    %60 = vector.load %arg8[%c0_39, %c1024_40] : memref<16x1536xbf16, #tpu.memory_space<vmem>>, vector<7x512xbf16>
    tpu.vector_store %arg8[%c0_39, %c1024_40], %59 {strides = array<i32>} : memref<16x1536xbf16, #tpu.memory_space<vmem>>, vector<7x512xbf16>,
    %61 = vector.extract_strided_slice %55 {offsets = [8, 0], sizes = [7, 512], strides = [1, 1]} : vector<16x512xbf16> to vector<7x512xbf16>
    %c9_41 = arith.constant 9 : index
    %c0_42 = arith.constant 0 : index
    %62 = vector.load %arg8[%c9_41, %c0_42] : memref<16x1536xbf16, #tpu.memory_space<vmem>>, vector<7x512xbf16>
    tpu.vector_store %arg8[%c9_41, %c0_42], %61 {strides = array<i32>} : memref<16x1536xbf16, #tpu.memory_space<vmem>>, vector<7x512xbf16>,
    %63 = vector.extract_strided_slice %55 {offsets = [9, 0], sizes = [7, 512], strides = [1, 1]} : vector<16x512xbf16> to vector<7x512xbf16>
    %c8_43 = arith.constant 8 : index
    %c1024_44 = arith.constant 1024 : index
    %64 = vector.load %arg8[%c8_43, %c1024_44] : memref<16x1536xbf16, #tpu.memory_space<vmem>>, vector<7x512xbf16>
    tpu.vector_store %arg8[%c8_43, %c1024_44], %63 {strides = array<i32>} : memref<16x1536xbf16, #tpu.memory_space<vmem>>, vector<7x512xbf16>,
    %65 = vector.extract_strided_slice %4 {offsets = [2, 0, 0], sizes = [1, 1, 512], strides = [1, 1, 1]} : vector<3x2x512xf32> to vector<1x1x512xf32>
    %66 = vector.shape_cast %65 : vector<1x1x512xf32> to vector<512xf32>
    %67 = vector.extract_strided_slice %4 {offsets = [2, 1, 0], sizes = [1, 1, 512], strides = [1, 1, 1]} : vector<3x2x512xf32> to vector<1x1x512xf32>
    %68 = vector.shape_cast %67 : vector<1x1x512xf32> to vector<512xf32>
    %c0_45 = arith.constant 0 : index
    %c0_46 = arith.constant 0 : index
    %69 = vector.load %arg8[%c0_45, %c0_46] : memref<16x1536xbf16, #tpu.memory_space<vmem>>, vector<16x1536xbf16>
    %c0_47 = arith.constant 0 : index
    %c0_48 = arith.constant 0 : index
    %70 = vector.load %arg4[%c0_47, %c0_48] : memref<1536x512xbf16, #tpu.memory_space<vmem>>, vector<1536x512xbf16>
    %cst_49 = arith.constant dense<0.000000e+00> : vector<16x512xf32>
    %71 = tpu.matmul %69, %70, %cst_49 {dimension_numbers = #tpu.dot_dimension_numbers<[1], [0], [0], [1], [0, 0, 1, 1], [], []>} : vector<16x1536xbf16>, vector<1536x512xbf16>, vector<16x512xf32> -> vector<16x512xf32>
    %72 = vector.shape_cast %66 : vector<512xf32> to vector<1x512xf32>
    %73 = vector.broadcast %72 : vector<1x512xf32> to vector<16x512xf32>
    %74 = arith.mulf %71, %73 : vector<16x512xf32>
    %75 = vector.shape_cast %68 : vector<512xf32> to vector<1x512xf32>
    %76 = vector.broadcast %75 : vector<1x512xf32> to vector<16x512xf32>
    %77 = arith.addf %74, %76 : vector<16x512xf32>
    %78 = arith.addf %29, %77 : vector<16x512xf32>
    %cst_50 = arith.constant 0.000000e+00 : f32
    %79 = vector.broadcast %cst_50 : f32 to vector<16x512xf32>
    %80 = arith.maximumf %78, %79 : vector<16x512xf32>
    %c0_51 = arith.constant 0 : index
    %c0_52 = arith.constant 0 : index
    %81 = vector.load %arg6[%c0_51, %c0_52] : memref<16x512xf32, #tpu.memory_space<vmem>>, vector<16x512xf32>
    tpu.vector_store %arg6[%c0_51, %c0_52], %80 {strides = array<i32>} : memref<16x512xf32, #tpu.memory_space<vmem>>, vector<16x512xf32>,
    return
  }
  func.func @transform_0(%arg0: i32) -> (i32, i32) {
    %c0_i32 = arith.constant 0 : i32
    %c0_i32_0 = arith.constant 0 : i32
    return %arg0, %c0_i32 : i32, i32
  }
  func.func @transform_1(%arg0: i32) -> (i32, i32) {
    %c0_i32 = arith.constant 0 : i32
    %c0_i32_0 = arith.constant 0 : i32
    %c0_i32_1 = arith.constant 0 : i32
    return %c0_i32, %c0_i32_0 : i32, i32
  }
  func.func @transform_2(%arg0: i32) -> (i32, i32) {
    %c0_i32 = arith.constant 0 : i32
    %c0_i32_0 = arith.constant 0 : i32
    %c0_i32_1 = arith.constant 0 : i32
    return %c0_i32, %c0_i32_0 : i32, i32
  }
  func.func @transform_3(%arg0: i32) -> (i32, i32) {
    %c0_i32 = arith.constant 0 : i32
    %c0_i32_0 = arith.constant 0 : i32
    %c0_i32_1 = arith.constant 0 : i32
    return %c0_i32, %c0_i32_0 : i32, i32
  }
  func.func @transform_4(%arg0: i32) -> (i32, i32, i32) {
    %c0_i32 = arith.constant 0 : i32
    %c0_i32_0 = arith.constant 0 : i32
    %c0_i32_1 = arith.constant 0 : i32
    %c0_i32_2 = arith.constant 0 : i32
    return %c0_i32, %c0_i32_0, %c0_i32_1 : i32, i32, i32
  }
  func.func @transform_5(%arg0: i32) -> (i32, i32) {
    %c0_i32 = arith.constant 0 : i32
    %c0_i32_0 = arith.constant 0 : i32
    return %arg0, %c0_i32 : i32, i32
  }
}

</mosaic_0001>

<bundles_post_ra>
// kernel: residual_block_forward.1
= control target key start
LH: loop header
LB: loop body
LE: loop exit
PB: predicated region body
PF: predicated region fallthrough
CT: control target
= control target key end

     0   :  { %10 = vsyncpa [#allocation5], 0  ;;  %s11510_s0 = inlined_call_operand.vmem [shape: bf16[16,256], index: 0, kind: input, shape index: {}]   ;;  %s11511_s1 = inlined_call_operand.vmem [shape: bf16[768,512], index: 1, kind: input, shape index: {}]   ;;  %s11512_s2 = inlined_call_operand.hbm [shape: bf16[1536,512], index: 2, kind: input, shape index: {}]   ;;  %s11513_s3 = inlined_call_operand.hbm [shape: bf16[1536,512], index: 3, kind: input, shape index: {}]   ;;  %s11514_s4 = inlined_call_operand.hbm [shape: f32[3,2,512], index: 4, kind: input, shape index: {}]   ;;  %s11515_s5 = inlined_call_operand.vmem [shape: f32[16,512], index: 5, kind: output, shape index: {}]  }
   0x1   :  { %11 = vsyncpa [#allocation7], 0  ;;  %s10415_s18 = smov [#allocation6]   ;;  %s10416_s20 = smov [#allocation4]  }
   0x2   :  { %s33_s19 = sshll.u32 %s10415_s18, 4  ;;  %s21_s21 = sshll.u32 %s10416_s20, 4  ;;  %s34_s19 = int_to_ptr.vmem [resolvable:$true] %s33_s19  ;;  %s22_s21 = int_to_ptr.vmem [resolvable:$true] %s21_s21 }
   0x3   :  { %s10359_s22 = scalar_lea.vmem %s34_s19, 49152  ;;  %p10364_p1 = scmp.lt.s32.totalorder %s34_s19, %s34_s19 }
   0x4   :  { %p10360_p0 = scmp.ne.s32.totalorder %s34_s19, %s10359_s22  ;;  %p10365_p2 = scmp.lt.s32.totalorder %s10359_s22, %s10359_s22 }
   0x6   :  { %p10366_p3 = por %p10365_p2, %p10364_p1 }
   0x8   :  { %p10367_p4 = pnand %p10366_p3, %p10360_p0 }
   0xa   :  { %10370 = shalt.err (!%p10367_p4)
}
   0xb   :  { %s10417_s23 = smov 256   ;;  %s10418_s24 = smov 16  }
   0xc   :  { %39 = dma.hbm_to_vmem [thread:$0]  %s11513_s3, 49152, %s34_s19, [#allocation7], %s10417_s23, %s10417_s23, %s10418_s24  }
   0xd   :  { %s10379_s27 = scalar_lea.vmem %s22_s21, 49152  ;;  %p10384_p6 = scmp.lt.s32.totalorder %s22_s21, %s22_s21 }
   0xe   :  { %p10380_p5 = scmp.ne.s32.totalorder %s22_s21, %s10379_s27  ;;  %p10385_p7 = scmp.lt.s32.totalorder %s10379_s27, %s10379_s27 }
  0x10   :  { %p10386_p8 = por %p10385_p7, %p10384_p6 }
  0x12   :  { %p10387_p9 = pnand %p10386_p8, %p10380_p5 }
  0x14   :  { %10390 = shalt.err (!%p10387_p9)
}
  0x15   :  { %27 = dma.hbm_to_vmem [thread:$0]  %s11512_s2, 49152, %s22_s21, [#allocation5], %s10417_s23, %s10417_s23, %s10418_s24  }
  0x16   :  { %s10419_s30 = smov [#allocation8]  }
  0x17   :  { %s45_s6 = sshll.u32 %s10419_s30, 4  ;;  %s46_s6 = int_to_ptr.vmem [resolvable:$true] %s45_s6 }
  0x18   :  { %s10399_s7 = scalar_lea.vmem %s46_s6, 384  ;;  %p10404_p11 = scmp.lt.s32.totalorder %s46_s6, %s46_s6 }
  0x19   :  { %p10400_p10 = scmp.ne.s32.totalorder %s46_s6, %s10399_s7  ;;  %p10405_p12 = scmp.lt.s32.totalorder %s10399_s7, %s10399_s7 }
  0x1b   :  { %p10406_p13 = por %p10405_p12, %p10404_p11 }
  0x1d   :  { %p10407_p0 = pnand %p10406_p13, %p10400_p10 }
  0x1f   :  { %10410 = shalt.err (!%p10407_p0)
}
  0x20   :  { %s10420_s3 = smov 128   ;;  %s10421_s8 = smov 8  }
  0x21   :  { %51 = dma.hbm_to_vmem [thread:$0]  %s11514_s4, 384, %s46_s6, [#allocation7], %s10420_s3, %s10420_s3, %s10421_s8  }
  0x22   :  { %10411 = dma.done.wait [#allocation5], 49152  }
  0x23   :  { %10412 = vsyncadd [#allocation5], 4294918144 }
  0x24   :  { %10413 = dma.done.wait [#allocation7], 49536  }
  0x25   :  { %10414 = vsyncadd [#allocation7], 4294917760  ;;  %v8909_v0 = vld [vmem:[%s11511_s1 + $0xe4] ss:$16 sps:$4 sm:$0xff]   ;;  %v8913_v2 = vld [vmem:[%s11511_s1 + $0xe0] ss:$16 sps:$4 sm:$0xff]  }
  0x26   :  { %v8911_v1 = vld [vmem:[%s11511_s1 + $0x2e4] ss:$16 sps:$4 sm:$0xff]   ;;  %1325 = vmatprep.subr.bf16.mxu0 %v8909_v0  ;;  %v8914_v3 = vld [vmem:[%s11511_s1 + $0x2e0] ss:$16 sps:$4 sm:$0xff]   ;;  %vm96_vm0 = vsmask.f32 7938 }
  0x27   :  { %1368 = vmatprep.subr.bf16.mxu1 %v8911_v1  ;;  %v8915_v4 = vld [vmem:[%s11511_s1 + $0xc4] ss:$16 sps:$4 sm:$0xff]   ;;  %1326 = vmatpush1.bf16.msra.mxu0 %v8913_v2  ;;  %v8919_v6 = vld [vmem:[%s11511_s1 + $0xc0] ss:$16 sps:$4 sm:$0xff]   ;;  %vm95_vm1 = vcmask 1043456   ;;  %vm98_vm2 = vcmask 1047556  }
  0x28   :  { %1369 = vmatpush1.bf16.msra.mxu1 %v8914_v3  ;;  %v8917_v5 = vld [vmem:[%s11511_s1 + $0x2c4] ss:$16 sps:$4 sm:$0xff]   ;;  %1327 = vmatprep.subr.bf16.mxu0 %v8915_v4  ;;  %v8920_v7 = vld [vmem:[%s11511_s1 + $0x2c0] ss:$16 sps:$4 sm:$0xff]   ;;  %vm10594_vm3 = vmand %vm95_vm1, %vm96_vm0  ;;  %vm99_vm4 = vsmask.f32 7954 }
  0x29   :  { %1370 = vmatprep.subr.bf16.mxu1 %v8917_v5  ;;  %v8921_v8 = vld [vmem:[%s11511_s1 + $0xa4] ss:$16 sps:$4 sm:$0xff]   ;;  %v8925_v10 = vld [vmem:[%s11511_s1 + $0xa0] ss:$16 sps:$4 sm:$0xff]   ;;  %vm10613_vm5 = vmand %vm98_vm2, %vm99_vm4  ;;  %vm110_vm7 = vsmask.f32 3328 }
  0x2a   :  { %v8923_v9 = vld [vmem:[%s11511_s1 + $0x2a4] ss:$16 sps:$4 sm:$0xff]   ;;  %v8926_v11 = vld [vmem:[%s11511_s1 + $0x2a0] ss:$16 sps:$4 sm:$0xff]   ;;  %v10620_v50 = vld [vmem:[%s11510_s0 + $0x8] sm:$0xff] }
  0x2b   :  { %1328 = vmatpush1.bf16.msra.mxu0 %v8919_v6  ;;  %v8927_v12 = vld [vmem:[%s11511_s1 + $0x84] ss:$16 sps:$4 sm:$0xff]   ;;  %v8931_v14 = vld [vmem:[%s11511_s1 + $0x80] ss:$16 sps:$4 sm:$0xff]   ;;  %v119_v55 = vshrl.u32 %v10620_v50, 16  ;;  %v122_v56 = vshll.u32 %v10620_v50, 16  ;;  %vm10643_vm6 = vmor %vm10613_vm5, %vm10594_vm3 }
  0x2c   :  { %1371 = vmatpush1.bf16.msra.mxu1 %v8920_v7  ;;  %1329 = vmatprep.subr.bf16.mxu0 %v8921_v8  ;;  %v8929_v13 = vld [vmem:[%s11511_s1 + $0x284] ss:$16 sps:$4 sm:$0xff]   ;;  %v8932_v15 = vld [vmem:[%s11511_s1 + $0x280] ss:$16 sps:$4 sm:$0xff]   ;;  %vm112_vm8 = vsmask.f32 7424  ;;  %vm10678_vm9 = vmand %vm95_vm1, %vm110_vm7 }
  0x2d   :  { %1372 = vmatprep.subr.bf16.mxu1 %v8923_v9  ;;  %v8933_v16 = vld [vmem:[%s11511_s1 + $0x64] ss:$16 sps:$4 sm:$0xff]   ;;  %v8937_v18 = vld [vmem:[%s11511_s1 + $0x60] ss:$16 sps:$4 sm:$0xff]   ;;  %v121_v61 = vrot.slane %v119_v55, 7  ;;  %v130_v8 = vrot.slane %v122_v56, 5  ;;  %vm113_vm10 = vmand %vm98_vm2, %vm112_vm8 }
  0x2e   :  { %v8935_v17 = vld [vmem:[%s11511_s1 + $0x264] ss:$16 sps:$4 sm:$0xff]   ;;  %v8938_v19 = vld [vmem:[%s11511_s1 + $0x260] ss:$16 sps:$4 sm:$0xff]   ;;  %vm10701_vm11 = vmor %vm113_vm10, %vm10678_vm9 }
  0x2f   :  { %1330 = vmatpush1.bf16.msra.mxu0 %v8925_v10  ;;  %v8939_v20 = vld [vmem:[%s11511_s1 + $0x44] ss:$16 sps:$4 sm:$0xff]   ;;  %v8943_v22 = vld [vmem:[%s11511_s1 + $0x40] ss:$16 sps:$4 sm:$0xff]   ;;  %v124_v2 = vor.u32 %v122_v56, %v121_v61  ;;  %v9036_v49 = vld [vmem:[%s11511_s1 + $0x6c] ss:$16 sps:$4 sm:$0xff]  }
  0x30   :  { %1373 = vmatpush1.bf16.msra.mxu1 %v8926_v11  ;;  %1331 = vmatprep.subr.bf16.mxu0 %v8927_v12  ;;  %v8941_v21 = vld [vmem:[%s11511_s1 + $0x244] ss:$16 sps:$4 sm:$0xff]   ;;  %v8944_v23 = vld [vmem:[%s11511_s1 + $0x240] ss:$16 sps:$4 sm:$0xff]   ;;  %v129_v11 = vrot.slane %v119_v55, 4 }
  0x31   :  { %1374 = vmatprep.subr.bf16.mxu1 %v8929_v13  ;;  %v8945_v24 = vld [vmem:[%s11511_s1 + $0x24] ss:$16 sps:$4 sm:$0xff]   ;;  %v8949_v26 = vld [vmem:[%s11511_s1 + $0x20] ss:$16 sps:$4 sm:$0xff]   ;;  %v127_v6 = vsel %vm10643_vm6, %v124_v2, 0 }
  0x32   :  { %v8947_v25 = vld [vmem:[%s11511_s1 + $0x224] ss:$16 sps:$4 sm:$0xff]   ;;  %v8950_v27 = vld [vmem:[%s11511_s1 + $0x220] ss:$16 sps:$4 sm:$0xff]   ;;  %v9040_v55 = vld [vmem:[%s11511_s1 + $0x48] ss:$16 sps:$4 sm:$0xff]  }
  0x33   :  { %1332 = vmatpush1.bf16.msra.mxu0 %v8931_v14  ;;  %v8951_v28 = vld [vmem:[%s11511_s1 + $0x4] ss:$16 sps:$4 sm:$0xff]   ;;  %v8955_v30 = vld [vmem:[%s11511_s1] ss:$16 sps:$4 sm:$0xff]   ;;  %v9046_v61 = vld [vmem:[%s11511_s1 + $0x28] ss:$16 sps:$4 sm:$0xff]  }
  0x34   :  { %1375 = vmatpush1.bf16.msra.mxu1 %v8932_v15  ;;  %1333 = vmatprep.subr.bf16.mxu0 %v8933_v16  ;;  %v8953_v29 = vld [vmem:[%s11511_s1 + $0x204] ss:$16 sps:$4 sm:$0xff]   ;;  %v8956_v31 = vld [vmem:[%s11511_s1 + $0x200] ss:$16 sps:$4 sm:$0xff]   ;;  %v9078_v15 = vld [vmem:[%s11511_s1 + $0x18c] ss:$16 sps:$4 sm:$0xff]  }
  0x35   :  { %1376 = vmatprep.subr.bf16.mxu1 %v8935_v17  ;;  %v8957_v32 = vld [vmem:[%s11511_s1 + $0x1e4] ss:$16 sps:$4 sm:$0xff]   ;;  %v8961_v34 = vld [vmem:[%s11511_s1 + $0x1e0] ss:$16 sps:$4 sm:$0xff]  }
  0x36   :  { %v8959_v33 = vld [vmem:[%s11511_s1 + $0x3e4] ss:$16 sps:$4 sm:$0xff]   ;;  %v8962_v35 = vld [vmem:[%s11511_s1 + $0x3e0] ss:$16 sps:$4 sm:$0xff]  }
  0x37   :  { %1334 = vmatpush1.bf16.msra.mxu0 %v8937_v18  ;;  %v8963_v36 = vld [vmem:[%s11511_s1 + $0x1c4] ss:$16 sps:$4 sm:$0xff]   ;;  %v8967_v38 = vld [vmem:[%s11511_s1 + $0x1c0] ss:$16 sps:$4 sm:$0xff]   ;;  %v131_v18 = vor.u32 %v130_v8, %v129_v11  ;;  %v9072_v11 = vld [vmem:[%s11511_s1 + $0x1ac] ss:$16 sps:$4 sm:$0xff]  }
  0x38   :  { %1377 = vmatpush1.bf16.msra.mxu1 %v8938_v19  ;;  %1335 = vmatprep.subr.bf16.mxu0 %v8939_v20  ;;  %v8965_v37 = vld [vmem:[%s11511_s1 + $0x3c4] ss:$16 sps:$4 sm:$0xff]   ;;  %v8968_v39 = vld [vmem:[%s11511_s1 + $0x3c0] ss:$16 sps:$4 sm:$0xff]  }
  0x39   :  { %1378 = vmatprep.subr.bf16.mxu1 %v8941_v21  ;;  %v8969_v40 = vld [vmem:[%s11511_s1 + $0x1a4] ss:$16 sps:$4 sm:$0xff]   ;;  %v8973_v42 = vld [vmem:[%s11511_s1 + $0x1a0] ss:$16 sps:$4 sm:$0xff]  }
  0x3a   :  { %v8971_v41 = vld [vmem:[%s11511_s1 + $0x3a4] ss:$16 sps:$4 sm:$0xff]   ;;  %v8974_v43 = vld [vmem:[%s11511_s1 + $0x3a0] ss:$16 sps:$4 sm:$0xff]  }
  0x3b   :  { %1336 = vmatpush1.bf16.msra.mxu0 %v8943_v22  ;;  %v8975_v45 = vld [vmem:[%s11511_s1 + $0x184] ss:$16 sps:$4 sm:$0xff]   ;;  %v8979_v47 = vld [vmem:[%s11511_s1 + $0x180] ss:$16 sps:$4 sm:$0xff]  }
  0x3c   :  { %1379 = vmatpush1.bf16.msra.mxu1 %v8944_v23  ;;  %1337 = vmatprep.subr.bf16.mxu0 %v8945_v24  ;;  %v8977_v46 = vld [vmem:[%s11511_s1 + $0x384] ss:$16 sps:$4 sm:$0xff]   ;;  %v8980_v53 = vld [vmem:[%s11511_s1 + $0x380] ss:$16 sps:$4 sm:$0xff]  }
  0x3d   :  { %1380 = vmatprep.subr.bf16.mxu1 %v8947_v25  ;;  %v10610_v48 = vld [vmem:[%s11510_s0] sm:$0xff]  ;;  %v132_v25 = vrot.slane %v131_v18, 4 }
  0x3e   :  { %v88_v51 = vshrl.u32 %v10610_v48, 16  ;;  %v91_v52 = vshll.u32 %v10610_v48, 16  ;;  %v8981_v54 = vld [vmem:[%s11511_s1 + $0x164] ss:$16 sps:$4 sm:$0xff]   ;;  %v10634_v57 = vcombine.high %v10610_v48, %v10620_v50  ;;  %v8985_v62 = vld [vmem:[%s11511_s1 + $0x160] ss:$16 sps:$4 sm:$0xff]  }
  0x3f   :  { %1338 = vmatpush1.bf16.msra.mxu0 %v8949_v26  ;;  %v8983_v58 = vld [vmem:[%s11511_s1 + $0x364] ss:$16 sps:$4 sm:$0xff]   ;;  %v8986_v0 = vld [vmem:[%s11511_s1 + $0x360] ss:$16 sps:$4 sm:$0xff]  }
  0x40   :  { %1381 = vmatpush1.bf16.msra.mxu1 %v8950_v27  ;;  %1339 = vmatprep.subr.bf16.mxu0 %v8951_v28  ;;  %v90_v59 = vrot.slane %v88_v51, 7  ;;  %v8987_v1 = vld [vmem:[%s11511_s1 + $0x144] ss:$16 sps:$4 sm:$0xff]   ;;  %v106_v5 = vrot.slane %v91_v52, 5  ;;  %v8991_v7 = vld [vmem:[%s11511_s1 + $0x140] ss:$16 sps:$4 sm:$0xff]  }
  0x41   :  { %1382 = vmatprep.subr.bf16.mxu1 %v8953_v29  ;;  %1400 = vmatprep.mubr.bf16.mxu1 %v10634_v57  ;;  %v8989_v3 = vld [vmem:[%s11511_s1 + $0x344] ss:$16 sps:$4 sm:$0xff]   ;;  %v105_v10 = vrot.slane %v88_v51, 4  ;;  %v8992_v12 = vld [vmem:[%s11511_s1 + $0x340] ss:$16 sps:$4 sm:$0xff]  }
  0x42   :  { %v93_v63 = vor.u32 %v91_v52, %v90_v59  ;;  %v8993_v13 = vld [vmem:[%s11511_s1 + $0x124] ss:$16 sps:$4 sm:$0xff]   ;;  %v8997_v16 = vld [vmem:[%s11511_s1 + $0x120] ss:$16 sps:$4 sm:$0xff]   ;;  %v9012_v28 = vld [vmem:[%s11511_s1 + $0xec] ss:$16 sps:$4 sm:$0xff]  }
  0x43   :  { %1340 = vmatpush1.bf16.msra.mxu0 %v8955_v30  ;;  %v8995_v14 = vld [vmem:[%s11511_s1 + $0x324] ss:$16 sps:$4 sm:$0xff]   ;;  %v107_v17 = vor.u32 %v106_v5, %v105_v10  ;;  %v8998_v19 = vld [vmem:[%s11511_s1 + $0x320] ss:$16 sps:$4 sm:$0xff]   ;;  %v10718_v30 = vcombine.low %v10610_v48, %v10620_v50  ;;  %v9034_v51 = vld [vmem:[%s11511_s1 + $0x68] ss:$16 sps:$4 sm:$0xff]  }
  0x44   :  { %1383 = vmatpush1.bf16.msra.mxu1 %v8956_v31  ;;  %1341 = vmatprep.subr.bf16.mxu0 %v8957_v32  ;;  %v103_v4 = vsel %vm10643_vm6, %v93_v63, 0  ;;  %v8999_v20 = vld [vmem:[%s11511_s1 + $0x104] ss:$16 sps:$4 sm:$0xff]   ;;  %v9003_v22 = vld [vmem:[%s11511_s1 + $0x100] ss:$16 sps:$4 sm:$0xff]  }
  0x45   :  { %1384 = vmatprep.subr.bf16.mxu1 %v8959_v33  ;;  %v7889_v9 = vcombine.high %v103_v4, %v127_v6  ;;  %v9001_v21 = vld [vmem:[%s11511_s1 + $0x304] ss:$16 sps:$4 sm:$0xff]   ;;  %v108_v23 = vrot.slane %v107_v17, 4  ;;  %v9004_v26 = vld [vmem:[%s11511_s1 + $0x300] ss:$16 sps:$4 sm:$0xff]   ;;  %v10714_v29 = vcombine.low %v103_v4, %v127_v6  ;;  %v10729_v33 = vsel %vm10701_vm11, %v132_v25, 0 }
  0x46   :  { %v9009_v27 = vld [vmem:[%s11511_s1 + $0x4e4] ss:$16 sps:$4 sm:$0xff]   ;;  %v9007_v31 = vld [vmem:[%s11511_s1 + $0x4e0] ss:$16 sps:$4 sm:$0xff]   ;;  %v9054_v63 = vld [vmem:[%s11511_s1 + $0xc] ss:$16 sps:$4 sm:$0xff]  }
  0x47   :  { %1342 = vmatpush2.bf16.msra.mxu0 %v8961_v34  ;;  %1357 = vmatprep.mubr.bf16.mxu0 %v7889_v9  ;;  %v10725_v32 = vsel %vm10701_vm11, %v108_v23, 0  ;;  %v9010_v34 = vld [vmem:[%s11511_s1 + $0xe8] ss:$16 sps:$4 sm:$0xff]   ;;  %v9027_v44 = vld [vmem:[%s11511_s1 + $0x484] ss:$16 sps:$4 sm:$0xff]  }
  0x48   :  { %1385 = vmatpush2.bf16.msra.mxu1 %v8962_v35  ;;  %1343 = vmatprep.subr.bf16.mxu0 %v8963_v36  ;;  %v9015_v35 = vld [vmem:[%s11511_s1 + $0x4c4] ss:$16 sps:$4 sm:$0xff]   ;;  %v9018_v36 = vld [vmem:[%s11511_s1 + $0xcc] ss:$16 sps:$4 sm:$0xff]   ;;  %v9031_v50 = vld [vmem:[%s11511_s1 + $0x460] ss:$16 sps:$4 sm:$0xff]  }
  0x49   :  { %1386 = vmatprep.subr.bf16.mxu1 %v8965_v37  ;;  %v10742_v37 = vcombine.high %v10725_v32, %v10729_v33  ;;  %v9033_v48 = vld [vmem:[%s11511_s1 + $0x464] ss:$16 sps:$4 sm:$0xff]   ;;  %v9043_v59 = vld [vmem:[%s11511_s1 + $0x420] ss:$16 sps:$4 sm:$0xff]   ;;  %v9058_v5 = vld [vmem:[%s11511_s1 + $0x1e8] ss:$16 sps:$4 sm:$0xff]  }
  0x4a   :  { %v9039_v52 = vld [vmem:[%s11511_s1 + $0x444] ss:$16 sps:$4 sm:$0xff]   ;;  %v9055_v4 = vld [vmem:[%s11511_s1 + $0x5e0] ss:$16 sps:$4 sm:$0xff]   ;;  %v9076_v17 = vld [vmem:[%s11511_s1 + $0x188] ss:$16 sps:$4 sm:$0xff]  }
  0x4b   :  { %1344 = vmatpush2.bf16.msra.mxu0 %v8967_v38  ;;  %v9013_v38 = vld [vmem:[%s11511_s1 + $0x4c0] ss:$16 sps:$4 sm:$0xff]   ;;  %v9045_v56 = vld [vmem:[%s11511_s1 + $0x424] ss:$16 sps:$4 sm:$0xff]   ;;  %v9090_v23 = vld [vmem:[%s11511_s1 + $0x14c] ss:$16 sps:$4 sm:$0xff]  }
  0x4c   :  { %1387 = vmatpush2.bf16.msra.mxu1 %v8968_v39  ;;  %1345 = vmatprep.subr.bf16.mxu0 %v8969_v40  ;;  %v9016_v39 = vld [vmem:[%s11511_s1 + $0xc8] ss:$16 sps:$4 sm:$0xff]   ;;  %v9021_v40 = vld [vmem:[%s11511_s1 + $0x4a4] ss:$16 sps:$4 sm:$0xff]   ;;  %v9061_v8 = vld [vmem:[%s11511_s1 + $0x5c0] ss:$16 sps:$4 sm:$0xff]  }
  0x4d   :  { %1388 = vmatprep.subr.bf16.mxu1 %v8971_v41  ;;  %v9024_v41 = vld [vmem:[%s11511_s1 + $0xac] ss:$16 sps:$4 sm:$0xff]   ;;  %v9057_v2 = vld [vmem:[%s11511_s1 + $0x5e4] ss:$16 sps:$4 sm:$0xff]   ;;  %v9085_v25 = vld [vmem:[%s11511_s1 + $0x540] ss:$16 sps:$4 sm:$0xff]  }
  0x4e   :  { %v9063_v6 = vld [vmem:[%s11511_s1 + $0x5c4] ss:$16 sps:$4 sm:$0xff]  }
  0x4f   :  { %1346 = vmatpush2.bf16.msra.mxu0 %v8973_v42  ;;  %v9019_v42 = vld [vmem:[%s11511_s1 + $0x4a0] ss:$16 sps:$4 sm:$0xff]   ;;  %v9069_v10 = vld [vmem:[%s11511_s1 + $0x5a4] ss:$16 sps:$4 sm:$0xff]  }
  0x50   :  { %1389 = vmatpush2.bf16.msra.mxu1 %v8974_v43  ;;  %1347 = vmatprep.subr.bf16.mxu0 %v8975_v45  ;;  %v9022_v43 = vld [vmem:[%s11511_s1 + $0xa8] ss:$16 sps:$4 sm:$0xff]   ;;  %v9030_v45 = vld [vmem:[%s11511_s1 + $0x8c] ss:$16 sps:$4 sm:$0xff]   ;;  %v9081_v18 = vld [vmem:[%s11511_s1 + $0x564] ss:$16 sps:$4 sm:$0xff]  }
  0x51   :  { %1390 = vmatprep.subr.bf16.mxu1 %v8977_v46  ;;  %v9025_v46 = vld [vmem:[%s11511_s1 + $0x480] ss:$16 sps:$4 sm:$0xff]   ;;  %v10023_v60 = vld [vmem:[#allocation6 + $0x6c4] ss:$16 sps:$4 sm:$0xff]  }
  0x52   :  { %v10029_v24 = vld [vmem:[#allocation6 + $0x6a4] ss:$16 sps:$4 sm:$0xff]  }
  0x53   :  { %1348 = vmatpush2.bf16.msra.mxu0 %v8979_v47  ;;  %v9028_v47 = vld [vmem:[%s11511_s1 + $0x88] ss:$16 sps:$4 sm:$0xff]  }
  0x54   :  { %1391 = vmatpush2.bf16.msra.mxu1 %v8980_v53  ;;  %1349 = vmatprep.subr.bf16.mxu0 %v8981_v54  ;;  %v9042_v53 = vld [vmem:[%s11511_s1 + $0x4c] ss:$16 sps:$4 sm:$0xff]   ;;  %v9037_v54 = vld [vmem:[%s11511_s1 + $0x440] ss:$16 sps:$4 sm:$0xff]  }
  0x55   :  { %1392 = vmatprep.subr.bf16.mxu1 %v8983_v58  ;;  %v9048_v58 = vld [vmem:[%s11511_s1 + $0x2c] ss:$16 sps:$4 sm:$0xff]  }
  0x57   :  { %1350 = vmatpush2.bf16.msra.mxu0 %v8985_v62  ;;  %v9051_v62 = vld [vmem:[%s11511_s1 + $0x404] ss:$16 sps:$4 sm:$0xff]  }
  0x58   :  { %1393 = vmatpush2.bf16.msra.mxu1 %v8986_v0  ;;  %1351 = vmatprep.subr.bf16.mxu0 %v8987_v1  ;;  %v9049_v0 = vld [vmem:[%s11511_s1 + $0x400] ss:$16 sps:$4 sm:$0xff]   ;;  %v9052_v1 = vld [vmem:[%s11511_s1 + $0x8] ss:$16 sps:$4 sm:$0xff]  }
  0x59   :  { %1394 = vmatprep.subr.bf16.mxu1 %v8989_v3  ;;  %v9060_v3 = vld [vmem:[%s11511_s1 + $0x1ec] ss:$16 sps:$4 sm:$0xff]  }
  0x5b   :  { %1352 = vmatpush2.bf16.msra.mxu0 %v8991_v7  ;;  %v9066_v7 = vld [vmem:[%s11511_s1 + $0x1cc] ss:$16 sps:$4 sm:$0xff]  }
  0x5c   :  { %1395 = vmatpush2.bf16.msra.mxu1 %v8992_v12  ;;  %1353 = vmatprep.subr.bf16.mxu0 %v8993_v13  ;;  %v9067_v12 = vld [vmem:[%s11511_s1 + $0x5a0] ss:$16 sps:$4 sm:$0xff]   ;;  %v9070_v13 = vld [vmem:[%s11511_s1 + $0x1a8] ss:$16 sps:$4 sm:$0xff]  }
  0x5d   :  { %1396 = vmatprep.subr.bf16.mxu1 %v8995_v14  ;;  %v9075_v14 = vld [vmem:[%s11511_s1 + $0x584] ss:$16 sps:$4 sm:$0xff]  }
  0x5f   :  { %1354 = vmatpush2.bf16.msra.mxu0 %v8997_v16  ;;  %v9073_v16 = vld [vmem:[%s11511_s1 + $0x580] ss:$16 sps:$4 sm:$0xff]  }
  0x60   :  { %1397 = vmatpush2.bf16.msra.mxu1 %v8998_v19  ;;  %1355 = vmatprep.subr.bf16.mxu0 %v8999_v20  ;;  %v9084_v19 = vld [vmem:[%s11511_s1 + $0x16c] ss:$16 sps:$4 sm:$0xff]   ;;  %v9079_v20 = vld [vmem:[%s11511_s1 + $0x560] ss:$16 sps:$4 sm:$0xff]  }
  0x61   :  { %1398 = vmatprep.subr.bf16.mxu1 %v9001_v21  ;;  %v9082_v21 = vld [vmem:[%s11511_s1 + $0x168] ss:$16 sps:$4 sm:$0xff]  }
  0x63   :  { %1356 = vmatpush2.bf16.msra.mxu0 %v9003_v22  ;;  %v9087_v22 = vld [vmem:[%s11511_s1 + $0x544] ss:$16 sps:$4 sm:$0xff]  }
  0x64   :  { %1399 = vmatpush2.bf16.msra.mxu1 %v9004_v26  ;;  %1411 = vmatprep.subr.bf16.mxu0 %v9009_v27  ;;  %v9088_v26 = vld [vmem:[%s11511_s1 + $0x148] ss:$16 sps:$4 sm:$0xff]   ;;  %v9093_v27 = vld [vmem:[%s11511_s1 + $0x524] ss:$16 sps:$4 sm:$0xff]  }
  0x65   :  { %1454 = vmatprep.subr.bf16.mxu1 %v9012_v28  ;;  %v9096_v28 = vld [vmem:[%s11511_s1 + $0x12c] ss:$16 sps:$4 sm:$0xff]  }
  0x66   :  { %1358 = vmatmul.mubr.bf16.vlgmr.msra.gmra.mxu0 %v10714_v29 }
  0x67   :  { %1401 = vmatmul.mubr.bf16.vlgmr.msra.gmra.mxu1 %v10718_v30  ;;  %1412 = vmatpush1.bf16.msra.mxu0 %v9007_v31  ;;  %v9091_v31 = vld [vmem:[%s11511_s1 + $0x520] ss:$16 sps:$4 sm:$0xff]  }
  0x68   :  { %1455 = vmatpush1.bf16.msra.mxu1 %v9010_v34  ;;  %1413 = vmatprep.subr.bf16.mxu0 %v9015_v35  ;;  %v9094_v34 = vld [vmem:[%s11511_s1 + $0x128] ss:$16 sps:$4 sm:$0xff]   ;;  %v9099_v35 = vld [vmem:[%s11511_s1 + $0x504] ss:$16 sps:$4 sm:$0xff]  }
  0x69   :  { %1456 = vmatprep.subr.bf16.mxu1 %v9018_v36  ;;  %1443 = vmatprep.mubr.bf16.mxu0 %v10742_v37  ;;  %v9102_v36 = vld [vmem:[%s11511_s1 + $0x10c] ss:$16 sps:$4 sm:$0xff]  }
  0x6a   :  { %1486 = vmatprep.mubr.bf16.mxu1 %v7889_v9  ;;  %v9064_v9 = vld [vmem:[%s11511_s1 + $0x1c8] ss:$16 sps:$4 sm:$0xff]  }
  0x6b   :  { %1414 = vmatpush1.bf16.msra.mxu0 %v9013_v38  ;;  %v9097_v38 = vld [vmem:[%s11511_s1 + $0x500] ss:$16 sps:$4 sm:$0xff]  }
  0x6c   :  { %1457 = vmatpush1.bf16.msra.mxu1 %v9016_v39  ;;  %1415 = vmatprep.subr.bf16.mxu0 %v9021_v40  ;;  %v9100_v39 = vld [vmem:[%s11511_s1 + $0x108] ss:$16 sps:$4 sm:$0xff]   ;;  %v9105_v40 = vld [vmem:[%s11511_s1 + $0x2ec] ss:$16 sps:$4 sm:$0xff]  }
  0x6d   :  { %1458 = vmatprep.subr.bf16.mxu1 %v9024_v41  ;;  %v9108_v41 = vld [vmem:[%s11511_s1 + $0x4ec] ss:$16 sps:$4 sm:$0xff]  }
  0x6f   :  { %1416 = vmatpush1.bf16.msra.mxu0 %v9019_v42  ;;  %v10929_v42 = vcombine.low %v10725_v32, %v10729_v33  ;;  %v9109_v32 = vld [vmem:[%s11511_s1 + $0x2c8] ss:$16 sps:$4 sm:$0xff]  }
  0x70   :  { %1459 = vmatpush1.bf16.msra.mxu1 %v9022_v43  ;;  %1417 = vmatprep.subr.bf16.mxu0 %v9027_v44  ;;  %v9103_v43 = vld [vmem:[%s11511_s1 + $0x2e8] ss:$16 sps:$4 sm:$0xff]  }
  0x71   :  { %1460 = vmatprep.subr.bf16.mxu1 %v9030_v45  ;;  %v9106_v44 = vld [vmem:[%s11511_s1 + $0x4e8] ss:$16 sps:$4 sm:$0xff]   ;;  %v9111_v45 = vld [vmem:[%s11511_s1 + $0x2cc] ss:$16 sps:$4 sm:$0xff]  }
  0x72   :  { %v9112_v33 = vld [vmem:[%s11511_s1 + $0x4c8] ss:$16 sps:$4 sm:$0xff]  }
  0x73   :  { %1418 = vmatpush1.bf16.msra.mxu0 %v9025_v46  ;;  %v9114_v46 = vld [vmem:[%s11511_s1 + $0x4cc] ss:$16 sps:$4 sm:$0xff]  }
  0x74   :  { %1461 = vmatpush1.bf16.msra.mxu1 %v9028_v47  ;;  %1419 = vmatprep.subr.bf16.mxu0 %v9033_v48  ;;  %v9117_v47 = vld [vmem:[%s11511_s1 + $0x2ac] ss:$16 sps:$4 sm:$0xff]  }
  0x75   :  { %1462 = vmatprep.subr.bf16.mxu1 %v9036_v49  ;;  %v9120_v48 = vld [vmem:[%s11511_s1 + $0x4ac] ss:$16 sps:$4 sm:$0xff]   ;;  %v9115_v49 = vld [vmem:[%s11511_s1 + $0x2a8] ss:$16 sps:$4 sm:$0xff]  }
  0x77   :  { %1420 = vmatpush1.bf16.msra.mxu0 %v9031_v50  ;;  %v9123_v50 = vld [vmem:[%s11511_s1 + $0x28c] ss:$16 sps:$4 sm:$0xff]  }
  0x78   :  { %1463 = vmatpush1.bf16.msra.mxu1 %v9034_v51  ;;  %1421 = vmatprep.subr.bf16.mxu0 %v9039_v52  ;;  %v9126_v51 = vld [vmem:[%s11511_s1 + $0x48c] ss:$16 sps:$4 sm:$0xff]  }
  0x79   :  { %1464 = vmatprep.subr.bf16.mxu1 %v9042_v53  ;;  %v9129_v52 = vld [vmem:[%s11511_s1 + $0x26c] ss:$16 sps:$4 sm:$0xff]  }
  0x7a   :  { %v9132_v53 = vld [vmem:[%s11511_s1 + $0x46c] ss:$16 sps:$4 sm:$0xff]  }
  0x7b   :  { %1422 = vmatpush1.bf16.msra.mxu0 %v9037_v54  ;;  %v9127_v54 = vld [vmem:[%s11511_s1 + $0x268] ss:$16 sps:$4 sm:$0xff]  }
  0x7c   :  { %1465 = vmatpush1.bf16.msra.mxu1 %v9040_v55  ;;  %1423 = vmatprep.subr.bf16.mxu0 %v9045_v56  ;;  %v9130_v55 = vld [vmem:[%s11511_s1 + $0x468] ss:$16 sps:$4 sm:$0xff]   ;;  %v9135_v56 = vld [vmem:[%s11511_s1 + $0x24c] ss:$16 sps:$4 sm:$0xff]  }
  0x7d   :  { %1466 = vmatprep.subr.bf16.mxu1 %v9048_v58  ;;  %v9138_v58 = vld [vmem:[%s11511_s1 + $0x44c] ss:$16 sps:$4 sm:$0xff]  }
  0x7f   :  { %1424 = vmatpush1.bf16.msra.mxu0 %v9043_v59  ;;  %v9133_v59 = vld [vmem:[%s11511_s1 + $0x248] ss:$16 sps:$4 sm:$0xff]  }
  0x80   :  { %1467 = vmatpush1.bf16.msra.mxu1 %v9046_v61  ;;  %1425 = vmatprep.subr.bf16.mxu0 %v9051_v62  ;;  %v9136_v61 = vld [vmem:[%s11511_s1 + $0x448] ss:$16 sps:$4 sm:$0xff]   ;;  %v9141_v62 = vld [vmem:[%s11511_s1 + $0x22c] ss:$16 sps:$4 sm:$0xff]  }
  0x81   :  { %1468 = vmatprep.subr.bf16.mxu1 %v9054_v63  ;;  %v9144_v63 = vld [vmem:[%s11511_s1 + $0x42c] ss:$16 sps:$4 sm:$0xff]  }
  0x83   :  { %1426 = vmatpush1.bf16.msra.mxu0 %v9049_v0  ;;  %v9139_v0 = vld [vmem:[%s11511_s1 + $0x228] ss:$16 sps:$4 sm:$0xff]  }
  0x84   :  { %1469 = vmatpush1.bf16.msra.mxu1 %v9052_v1  ;;  %1427 = vmatprep.subr.bf16.mxu0 %v9057_v2  ;;  %v9142_v1 = vld [vmem:[%s11511_s1 + $0x428] ss:$16 sps:$4 sm:$0xff]   ;;  %v9147_v2 = vld [vmem:[%s11511_s1 + $0x20c] ss:$16 sps:$4 sm:$0xff]  }
  0x85   :  { %1470 = vmatprep.subr.bf16.mxu1 %v9060_v3  ;;  %v9150_v3 = vld [vmem:[%s11511_s1 + $0x40c] ss:$16 sps:$4 sm:$0xff]  }
  0x87   :  { %1428 = vmatpush2.bf16.msra.mxu0 %v9055_v4  ;;  %v9145_v4 = vld [vmem:[%s11511_s1 + $0x208] ss:$16 sps:$4 sm:$0xff]  }
  0x88   :  { %1471 = vmatpush2.bf16.msra.mxu1 %v9058_v5  ;;  %1429 = vmatprep.subr.bf16.mxu0 %v9063_v6  ;;  %v9148_v5 = vld [vmem:[%s11511_s1 + $0x408] ss:$16 sps:$4 sm:$0xff]   ;;  %v9153_v6 = vld [vmem:[%s11511_s1 + $0x3ec] ss:$16 sps:$4 sm:$0xff]  }
  0x89   :  { %1472 = vmatprep.subr.bf16.mxu1 %v9066_v7  ;;  %v9156_v7 = vld [vmem:[%s11511_s1 + $0x5ec] ss:$16 sps:$4 sm:$0xff]  }
  0x8b   :  { %1430 = vmatpush2.bf16.msra.mxu0 %v9061_v8  ;;  %v9151_v8 = vld [vmem:[%s11511_s1 + $0x3e8] ss:$16 sps:$4 sm:$0xff]  }
  0x8c   :  { %1473 = vmatpush2.bf16.msra.mxu1 %v9064_v9  ;;  %1431 = vmatprep.subr.bf16.mxu0 %v9069_v10  ;;  %v9154_v9 = vld [vmem:[%s11511_s1 + $0x5e8] ss:$16 sps:$4 sm:$0xff]   ;;  %v9159_v10 = vld [vmem:[%s11511_s1 + $0x3cc] ss:$16 sps:$4 sm:$0xff]  }
  0x8d   :  { %1474 = vmatprep.subr.bf16.mxu1 %v9072_v11  ;;  %v9162_v11 = vld [vmem:[%s11511_s1 + $0x5cc] ss:$16 sps:$4 sm:$0xff]  }
  0x8f   :  { %1432 = vmatpush2.bf16.msra.mxu0 %v9067_v12  ;;  %v9157_v12 = vld [vmem:[%s11511_s1 + $0x3c8] ss:$16 sps:$4 sm:$0xff]  }
  0x90   :  { %1475 = vmatpush2.bf16.msra.mxu1 %v9070_v13  ;;  %1433 = vmatprep.subr.bf16.mxu0 %v9075_v14  ;;  %v9160_v13 = vld [vmem:[%s11511_s1 + $0x5c8] ss:$16 sps:$4 sm:$0xff]   ;;  %v9165_v14 = vld [vmem:[%s11511_s1 + $0x3ac] ss:$16 sps:$4 sm:$0xff]  }
  0x91   :  { %1476 = vmatprep.subr.bf16.mxu1 %v9078_v15  ;;  %v9168_v15 = vld [vmem:[%s11511_s1 + $0x5ac] ss:$16 sps:$4 sm:$0xff]  }
  0x93   :  { %1434 = vmatpush2.bf16.msra.mxu0 %v9073_v16  ;;  %v9163_v16 = vld [vmem:[%s11511_s1 + $0x3a8] ss:$16 sps:$4 sm:$0xff]  }
  0x94   :  { %1477 = vmatpush2.bf16.msra.mxu1 %v9076_v17  ;;  %1435 = vmatprep.subr.bf16.mxu0 %v9081_v18  ;;  %v9166_v17 = vld [vmem:[%s11511_s1 + $0x5a8] ss:$16 sps:$4 sm:$0xff]   ;;  %v9171_v18 = vld [vmem:[%s11511_s1 + $0x38c] ss:$16 sps:$4 sm:$0xff]  }
  0x95   :  { %1478 = vmatprep.subr.bf16.mxu1 %v9084_v19  ;;  %v9174_v19 = vld [vmem:[%s11511_s1 + $0x58c] ss:$16 sps:$4 sm:$0xff]  }
  0x97   :  { %1436 = vmatpush2.bf16.msra.mxu0 %v9079_v20  ;;  %v9169_v20 = vld [vmem:[%s11511_s1 + $0x388] ss:$16 sps:$4 sm:$0xff]  }
  0x98   :  { %1479 = vmatpush2.bf16.msra.mxu1 %v9082_v21  ;;  %1437 = vmatprep.subr.bf16.mxu0 %v9087_v22  ;;  %v9172_v21 = vld [vmem:[%s11511_s1 + $0x588] ss:$16 sps:$4 sm:$0xff]   ;;  %v9177_v22 = vld [vmem:[%s11511_s1 + $0x36c] ss:$16 sps:$4 sm:$0xff]  }
  0x99   :  { %1480 = vmatprep.subr.bf16.mxu1 %v9090_v23  ;;  %v9180_v23 = vld [vmem:[%s11511_s1 + $0x56c] ss:$16 sps:$4 sm:$0xff]  }
  0x9b   :  { %1438 = vmatpush2.bf16.msra.mxu0 %v9085_v25  ;;  %v9175_v25 = vld [vmem:[%s11511_s1 + $0x368] ss:$16 sps:$4 sm:$0xff]  }
  0x9c   :  { %1481 = vmatpush2.bf16.msra.mxu1 %v9088_v26  ;;  %1439 = vmatprep.subr.bf16.mxu0 %v9093_v27  ;;  %v9178_v26 = vld [vmem:[%s11511_s1 + $0x568] ss:$16 sps:$4 sm:$0xff]   ;;  %v9183_v27 = vld [vmem:[%s11511_s1 + $0x34c] ss:$16 sps:$4 sm:$0xff]  }
  0x9d   :  { %1482 = vmatprep.subr.bf16.mxu1 %v9096_v28  ;;  %v9186_v28 = vld [vmem:[%s11511_s1 + $0x54c] ss:$16 sps:$4 sm:$0xff]  }
  0x9f   :  { %1440 = vmatpush2.bf16.msra.mxu0 %v9091_v31  ;;  %v9181_v31 = vld [vmem:[%s11511_s1 + $0x348] ss:$16 sps:$4 sm:$0xff]  }
  0xa0   :  { %1483 = vmatpush2.bf16.msra.mxu1 %v9094_v34  ;;  %1441 = vmatprep.subr.bf16.mxu0 %v9099_v35  ;;  %v9184_v34 = vld [vmem:[%s11511_s1 + $0x548] ss:$16 sps:$4 sm:$0xff]   ;;  %v9189_v35 = vld [vmem:[%s11511_s1 + $0x32c] ss:$16 sps:$4 sm:$0xff]  }
  0xa1   :  { %1484 = vmatprep.subr.bf16.mxu1 %v9102_v36  ;;  %v9192_v36 = vld [vmem:[%s11511_s1 + $0x52c] ss:$16 sps:$4 sm:$0xff]  }
  0xa3   :  { %1442 = vmatpush2.bf16.msra.mxu0 %v9097_v38  ;;  %v9187_v38 = vld [vmem:[%s11511_s1 + $0x328] ss:$16 sps:$4 sm:$0xff]  }
  0xa4   :  { %1485 = vmatpush2.bf16.msra.mxu1 %v9100_v39  ;;  %1497 = vmatprep.subr.bf16.mxu0 %v9105_v40  ;;  %v9190_v39 = vld [vmem:[%s11511_s1 + $0x528] ss:$16 sps:$4 sm:$0xff]   ;;  %v9195_v40 = vld [vmem:[%s11511_s1 + $0x30c] ss:$16 sps:$4 sm:$0xff]  }
  0xa5   :  { %1540 = vmatprep.subr.bf16.mxu1 %v9108_v41  ;;  %v9198_v41 = vld [vmem:[%s11511_s1 + $0x50c] ss:$16 sps:$4 sm:$0xff]  }
  0xa6   :  { %1444 = vmatmul.mubr.bf16.vlgmr.msra.gmra.mxu0 %v10929_v42 }
  0xa7   :  { %1487 = vmatmul.mubr.bf16.vlgmr.msra.gmra.mxu1 %v10714_v29  ;;  %1498 = vmatpush1.bf16.msra.mxu0 %v9103_v43  ;;  %v9118_v29 = vld [vmem:[%s11511_s1 + $0x4a8] ss:$16 sps:$4 sm:$0xff]  }
  0xa8   :  { %1541 = vmatpush1.bf16.msra.mxu1 %v9106_v44  ;;  %1499 = vmatprep.subr.bf16.mxu0 %v9111_v45  ;;  %v9193_v43 = vld [vmem:[%s11511_s1 + $0x308] ss:$16 sps:$4 sm:$0xff]   ;;  %v9201_v45 = vld [vmem:[#allocation4 + $0xe4] ss:$16 sps:$4 sm:$0xff]  }
  0xa9   :  { %1542 = vmatprep.subr.bf16.mxu1 %v9114_v46  ;;  %1529 = vmatprep.mubr.bf16.mxu0 %v10634_v57  ;;  %v9121_v57 = vld [vmem:[%s11511_s1 + $0x288] ss:$16 sps:$4 sm:$0xff]   ;;  %v9199_v46 = vld [vmem:[#allocation4 + $0xe0] ss:$16 sps:$4 sm:$0xff]  }
  0xaa   :  { %1572 = vmatprep.mubr.bf16.mxu1 %v10742_v37  ;;  %v9124_v37 = vld [vmem:[%s11511_s1 + $0x488] ss:$16 sps:$4 sm:$0xff]  }
  0xab   :  { %1500 = vmatpush1.bf16.msra.mxu0 %v9109_v32  ;;  %v9196_v44 = vld [vmem:[%s11511_s1 + $0x508] ss:$16 sps:$4 sm:$0xff]   ;;  %v9204_v32 = vld [vmem:[#allocation4 + $0xc4] ss:$16 sps:$4 sm:$0xff]  }
  0xac   :  { %1543 = vmatpush1.bf16.msra.mxu1 %v9112_v33  ;;  %1501 = vmatprep.subr.bf16.mxu0 %v9117_v47  ;;  %v9202_v33 = vld [vmem:[#allocation4 + $0xc0] ss:$16 sps:$4 sm:$0xff]   ;;  %v9207_v47 = vld [vmem:[#allocation4 + $0xa4] ss:$16 sps:$4 sm:$0xff]  }
  0xad   :  { %1544 = vmatprep.subr.bf16.mxu1 %v9120_v48  ;;  %v9205_v48 = vld [vmem:[#allocation4 + $0xa0] ss:$16 sps:$4 sm:$0xff]  }
  0xaf   :  { %1502 = vmatpush1.bf16.msra.mxu0 %v9115_v49  ;;  %v9210_v49 = vld [vmem:[#allocation4 + $0x84] ss:$16 sps:$4 sm:$0xff]  }
  0xb0   :  { %1545 = vmatpush1.bf16.msra.mxu1 %v9118_v29  ;;  %1503 = vmatprep.subr.bf16.mxu0 %v9123_v50  ;;  %v9208_v29 = vld [vmem:[#allocation4 + $0x80] ss:$16 sps:$4 sm:$0xff]   ;;  %v9213_v50 = vld [vmem:[#allocation4 + $0x64] ss:$16 sps:$4 sm:$0xff]  }
  0xb1   :  { %1546 = vmatprep.subr.bf16.mxu1 %v9126_v51  ;;  %v9211_v51 = vld [vmem:[#allocation4 + $0x60] ss:$16 sps:$4 sm:$0xff]  }
  0xb3   :  { %1504 = vmatpush1.bf16.msra.mxu0 %v9121_v57  ;;  %v9216_v57 = vld [vmem:[#allocation4 + $0x44] ss:$16 sps:$4 sm:$0xff]  }
  0xb4   :  { %1547 = vmatpush1.bf16.msra.mxu1 %v9124_v37  ;;  %1505 = vmatprep.subr.bf16.mxu0 %v9129_v52  ;;  %v9219_v37 = vld [vmem:[#allocation4 + $0x24] ss:$16 sps:$4 sm:$0xff]  }
  0xb5   :  { %1548 = vmatprep.subr.bf16.mxu1 %v9132_v53  ;;  %v9222_v52 = vld [vmem:[#allocation4 + $0x4] ss:$16 sps:$4 sm:$0xff]   ;;  %v9220_v53 = vld [vmem:[#allocation4] ss:$16 sps:$4 sm:$0xff]  }
  0xb7   :  { %1506 = vmatpush1.bf16.msra.mxu0 %v9127_v54  ;;  %v9225_v54 = vld [vmem:[#allocation4 + $0x1e4] ss:$16 sps:$4 sm:$0xff]  }
  0xb8   :  { %1549 = vmatpush1.bf16.msra.mxu1 %v9130_v55  ;;  %1507 = vmatprep.subr.bf16.mxu0 %v9135_v56  ;;  %v9252_v55 = vld [vmem:[#allocation4 + $0x2e4] ss:$16 sps:$4 sm:$0xff]   ;;  %v9223_v56 = vld [vmem:[#allocation4 + $0x1e0] ss:$16 sps:$4 sm:$0xff]  }
  0xb9   :  { %1550 = vmatprep.subr.bf16.mxu1 %v9138_v58  ;;  %v9228_v58 = vld [vmem:[#allocation4 + $0x1c4] ss:$16 sps:$4 sm:$0xff]  }
  0xbb   :  { %1508 = vmatpush1.bf16.msra.mxu0 %v9133_v59  ;;  %v9250_v59 = vld [vmem:[#allocation4 + $0x2e0] ss:$16 sps:$4 sm:$0xff]  }
  0xbc   :  { %1551 = vmatpush1.bf16.msra.mxu1 %v9136_v61  ;;  %1509 = vmatprep.subr.bf16.mxu0 %v9141_v62  ;;  %v9258_v61 = vld [vmem:[#allocation4 + $0x2c4] ss:$16 sps:$4 sm:$0xff]   ;;  %v9226_v62 = vld [vmem:[#allocation4 + $0x1c0] ss:$16 sps:$4 sm:$0xff]  }
  0xbd   :  { %1552 = vmatprep.subr.bf16.mxu1 %v9144_v63  ;;  %v9231_v63 = vld [vmem:[#allocation4 + $0x1a4] ss:$16 sps:$4 sm:$0xff]  }
  0xbf   :  { %1510 = vmatpush1.bf16.msra.mxu0 %v9139_v0  ;;  %v9256_v0 = vld [vmem:[#allocation4 + $0x2c0] ss:$16 sps:$4 sm:$0xff]  }
  0xc0   :  { %1553 = vmatpush1.bf16.msra.mxu1 %v9142_v1  ;;  %1511 = vmatprep.subr.bf16.mxu0 %v9147_v2  ;;  %v9264_v1 = vld [vmem:[#allocation4 + $0x2a4] ss:$16 sps:$4 sm:$0xff]   ;;  %v9229_v2 = vld [vmem:[#allocation4 + $0x1a0] ss:$16 sps:$4 sm:$0xff]  }
  0xc1   :  { %1554 = vmatprep.subr.bf16.mxu1 %v9150_v3  ;;  %v9234_v3 = vld [vmem:[#allocation4 + $0x184] ss:$16 sps:$4 sm:$0xff]  }
  0xc3   :  { %1512 = vmatpush1.bf16.msra.mxu0 %v9145_v4  ;;  %v9262_v4 = vld [vmem:[#allocation4 + $0x2a0] ss:$16 sps:$4 sm:$0xff]  }
  0xc4   :  { %1555 = vmatpush1.bf16.msra.mxu1 %v9148_v5  ;;  %1513 = vmatprep.subr.bf16.mxu0 %v9153_v6  ;;  %v9270_v5 = vld [vmem:[#allocation4 + $0x284] ss:$16 sps:$4 sm:$0xff]   ;;  %v9232_v6 = vld [vmem:[#allocation4 + $0x180] ss:$16 sps:$4 sm:$0xff]  }
  0xc5   :  { %1556 = vmatprep.subr.bf16.mxu1 %v9156_v7  ;;  %v9237_v7 = vld [vmem:[#allocation4 + $0x164] ss:$16 sps:$4 sm:$0xff]  }
  0xc7   :  { %1514 = vmatpush2.bf16.msra.mxu0 %v9151_v8  ;;  %v9268_v8 = vld [vmem:[#allocation4 + $0x280] ss:$16 sps:$4 sm:$0xff]  }
  0xc8   :  { %1557 = vmatpush2.bf16.msra.mxu1 %v9154_v9  ;;  %1515 = vmatprep.subr.bf16.mxu0 %v9159_v10  ;;  %v9276_v9 = vld [vmem:[#allocation4 + $0x264] ss:$16 sps:$4 sm:$0xff]   ;;  %v9235_v10 = vld [vmem:[#allocation4 + $0x160] ss:$16 sps:$4 sm:$0xff]  }
  0xc9   :  { %1558 = vmatprep.subr.bf16.mxu1 %v9162_v11  ;;  %v9240_v11 = vld [vmem:[#allocation4 + $0x144] ss:$16 sps:$4 sm:$0xff]  }
  0xcb   :  { %1516 = vmatpush2.bf16.msra.mxu0 %v9157_v12  ;;  %v9274_v12 = vld [vmem:[#allocation4 + $0x260] ss:$16 sps:$4 sm:$0xff]  }
  0xcc   :  { %1559 = vmatpush2.bf16.msra.mxu1 %v9160_v13  ;;  %1517 = vmatprep.subr.bf16.mxu0 %v9165_v14  ;;  %v9282_v13 = vld [vmem:[#allocation4 + $0x244] ss:$16 sps:$4 sm:$0xff]   ;;  %v9238_v14 = vld [vmem:[#allocation4 + $0x140] ss:$16 sps:$4 sm:$0xff]  }
  0xcd   :  { %1560 = vmatprep.subr.bf16.mxu1 %v9168_v15  ;;  %v9243_v15 = vld [vmem:[#allocation4 + $0x124] ss:$16 sps:$4 sm:$0xff]  }
  0xcf   :  { %1518 = vmatpush2.bf16.msra.mxu0 %v9163_v16  ;;  %v9280_v16 = vld [vmem:[#allocation4 + $0x240] ss:$16 sps:$4 sm:$0xff]  }
  0xd0   :  { %1561 = vmatpush2.bf16.msra.mxu1 %v9166_v17  ;;  %1519 = vmatprep.subr.bf16.mxu0 %v9171_v18  ;;  %v9288_v17 = vld [vmem:[#allocation4 + $0x224] ss:$16 sps:$4 sm:$0xff]   ;;  %v9241_v18 = vld [vmem:[#allocation4 + $0x120] ss:$16 sps:$4 sm:$0xff]  }
  0xd1   :  { %1562 = vmatprep.subr.bf16.mxu1 %v9174_v19  ;;  %v9246_v19 = vld [vmem:[#allocation4 + $0x104] ss:$16 sps:$4 sm:$0xff]  }
  0xd3   :  { %1520 = vmatpush2.bf16.msra.mxu0 %v9169_v20  ;;  %v9286_v20 = vld [vmem:[#allocation4 + $0x220] ss:$16 sps:$4 sm:$0xff]  }
  0xd4   :  { %1563 = vmatpush2.bf16.msra.mxu1 %v9172_v21  ;;  %1521 = vmatprep.subr.bf16.mxu0 %v9177_v22  ;;  %v9294_v21 = vld [vmem:[#allocation4 + $0x204] ss:$16 sps:$4 sm:$0xff]   ;;  %v9244_v22 = vld [vmem:[#allocation4 + $0x100] ss:$16 sps:$4 sm:$0xff]  }
  0xd5   :  { %1564 = vmatprep.subr.bf16.mxu1 %v9180_v23  ;;  %v9249_v23 = vld [vmem:[#allocation4 + $0x4e4] ss:$16 sps:$4 sm:$0xff]  }
  0xd7   :  { %1522 = vmatpush2.bf16.msra.mxu0 %v9175_v25  ;;  %v9292_v25 = vld [vmem:[#allocation4 + $0x200] ss:$16 sps:$4 sm:$0xff]  }
  0xd8   :  { %1565 = vmatpush2.bf16.msra.mxu1 %v9178_v26  ;;  %1523 = vmatprep.subr.bf16.mxu0 %v9183_v27  ;;  %v9300_v26 = vld [vmem:[#allocation4 + $0x3e4] ss:$16 sps:$4 sm:$0xff]   ;;  %v9298_v27 = vld [vmem:[#allocation4 + $0x3e0] ss:$16 sps:$4 sm:$0xff]  }
  0xd9   :  { %1566 = vmatprep.subr.bf16.mxu1 %v9186_v28  ;;  %v9306_v28 = vld [vmem:[#allocation4 + $0x3c4] ss:$16 sps:$4 sm:$0xff]  }
  0xdb   :  { %1524 = vmatpush2.bf16.msra.mxu0 %v9181_v31  ;;  %v9304_v31 = vld [vmem:[#allocation4 + $0x3c0] ss:$16 sps:$4 sm:$0xff]  }
  0xdc   :  { %1567 = vmatpush2.bf16.msra.mxu1 %v9184_v34  ;;  %1525 = vmatprep.subr.bf16.mxu0 %v9189_v35  ;;  %v9312_v34 = vld [vmem:[#allocation4 + $0x3a4] ss:$16 sps:$4 sm:$0xff]   ;;  %v9310_v35 = vld [vmem:[#allocation4 + $0x3a0] ss:$16 sps:$4 sm:$0xff]  }
  0xdd   :  { %1568 = vmatprep.subr.bf16.mxu1 %v9192_v36  ;;  %v9318_v36 = vld [vmem:[#allocation4 + $0x384] ss:$16 sps:$4 sm:$0xff]  }
  0xdf   :  { %1526 = vmatpush2.bf16.msra.mxu0 %v9187_v38  ;;  %v9316_v38 = vld [vmem:[#allocation4 + $0x380] ss:$16 sps:$4 sm:$0xff]  }
  0xe0   :  { %1569 = vmatpush2.bf16.msra.mxu1 %v9190_v39  ;;  %1527 = vmatprep.subr.bf16.mxu0 %v9195_v40  ;;  %v9324_v39 = vld [vmem:[#allocation4 + $0x364] ss:$16 sps:$4 sm:$0xff]   ;;  %v9322_v40 = vld [vmem:[#allocation4 + $0x360] ss:$16 sps:$4 sm:$0xff]  }
  0xe1   :  { %1570 = vmatprep.subr.bf16.mxu1 %v9198_v41  ;;  %v9330_v41 = vld [vmem:[#allocation4 + $0x344] ss:$16 sps:$4 sm:$0xff]  }
  0xe3   :  { %1528 = vmatpush2.bf16.msra.mxu0 %v9193_v43  ;;  %v9328_v43 = vld [vmem:[#allocation4 + $0x340] ss:$16 sps:$4 sm:$0xff]  }
  0xe4   :  { %1571 = vmatpush2.bf16.msra.mxu1 %v9196_v44  ;;  %4160 = vmatprep.subr.bf16.mxu0 %v9201_v45  ;;  %v9336_v44 = vld [vmem:[#allocation4 + $0x324] ss:$16 sps:$4 sm:$0xff]   ;;  %v9334_v45 = vld [vmem:[#allocation4 + $0x320] ss:$16 sps:$4 sm:$0xff]  }
  0xe5   :  { %4203 = vmatprep.subr.bf16.mxu1 %v9252_v55 }
  0xe6   :  { %1530 = vmatmul.mubr.bf16.vlgmr.msra.gmra.mxu0 %v10718_v30  ;;  %v9214_v30 = vld [vmem:[#allocation4 + $0x40] ss:$16 sps:$4 sm:$0xff]  }
  0xe7   :  { %1573 = vmatmul.mubr.bf16.vlgmr.msra.gmra.mxu1 %v10929_v42  ;;  %4161 = vmatpush1.bf16.msra.mxu0 %v9199_v46  ;;  %v9217_v42 = vld [vmem:[#allocation4 + $0x20] ss:$16 sps:$4 sm:$0xff]   ;;  %v9342_v46 = vld [vmem:[#allocation4 + $0x304] ss:$16 sps:$4 sm:$0xff]  }
  0xe8   :  { %4162 = vmatprep.subr.bf16.mxu0 %v9204_v32  ;;  %4204 = vmatpush1.bf16.msra.mxu1 %v9250_v59  ;;  %v9340_v32 = vld [vmem:[#allocation4 + $0x300] ss:$16 sps:$4 sm:$0xff]  }
  0xe9   :  { %4205 = vmatprep.subr.bf16.mxu1 %v9258_v61 }
  0xeb   :  { %4163 = vmatpush1.bf16.msra.mxu0 %v9202_v33  ;;  %v9348_v33 = vld [vmem:[#allocation4 + $0x6e4] ss:$16 sps:$4 sm:$0xff]  }
  0xec   :  { %4164 = vmatprep.subr.bf16.mxu0 %v9207_v47  ;;  %4206 = vmatpush1.bf16.msra.mxu1 %v9256_v0  ;;  %v1584_v47 = vlaneseq }
  0xed   :  { %4207 = vmatprep.subr.bf16.mxu1 %v9264_v1 }
  0xef   :  { %4165 = vmatpush1.bf16.msra.mxu0 %v9205_v48 }
  0xf0   :  { %4166 = vmatprep.subr.bf16.mxu0 %v9210_v49  ;;  %4208 = vmatpush1.bf16.msra.mxu1 %v9262_v4  ;;  %v11123_v49 = vshrl.u32 %v1584_v47, 7  ;;  %v9255_v47 = vld [vmem:[#allocation4 + $0x4c4] ss:$16 sps:$4 sm:$0xff]  }
  0xf1   :  { %4209 = vmatprep.subr.bf16.mxu1 %v9270_v5 }
  0xf3   :  { %4167 = vmatpush1.bf16.msra.mxu0 %v9208_v29 }
  0xf4   :  { %4168 = vmatprep.subr.bf16.mxu0 %v9213_v50  ;;  %4210 = vmatpush1.bf16.msra.mxu1 %v9268_v8 }
  0xf5   :  { %4211 = vmatprep.subr.bf16.mxu1 %v9276_v9 }
  0xf7   :  { %4169 = vmatpush1.bf16.msra.mxu0 %v9211_v51  ;;  %v11126_v51 = vsub.s32 0, %v11123_v49 }
  0xf8   :  { %4170 = vmatprep.subr.bf16.mxu0 %v9216_v57  ;;  %4212 = vmatpush1.bf16.msra.mxu1 %v9274_v12  ;;  %v11128_v57 = vld [vmem:[#allocation8] sm:$0xff] }
  0xf9   :  { %4213 = vmatprep.subr.bf16.mxu1 %v9282_v13 }
  0xfb   :  { %4171 = vmatpush1.bf16.msra.mxu0 %v9214_v30  ;;  %v11131_v30 = vsub.s32 1, %v11123_v49 }
  0xfc   :  { %4172 = vmatprep.subr.bf16.mxu0 %v9219_v37  ;;  %4214 = vmatpush1.bf16.msra.mxu1 %v9280_v16  ;;  %v11134_v37 = vsub.s32 2, %v11123_v49 }
  0xfd   :  { %4215 = vmatprep.subr.bf16.mxu1 %v9288_v17  ;;  %v1631_v55 = vrot.slane %v11128_v57, %v11131_v30 }
  0xff   :  { %4173 = vmatpush1.bf16.msra.mxu0 %v9217_v42 }
 0x100   :  { %4174 = vmatprep.subr.bf16.mxu0 %v9222_v52  ;;  %4216 = vmatpush1.bf16.msra.mxu1 %v9286_v20 }
 0x101   :  { %4217 = vmatprep.subr.bf16.mxu1 %v9294_v21 }
 0x103   :  { %4175 = vmatpush1.bf16.msra.mxu0 %v9220_v53  ;;  %v1587_v53 = vrot.slane %v11128_v57, %v11126_v51 }
 0x104   :  { %4176 = vmatprep.subr.bf16.mxu0 %v9225_v54  ;;  %4218 = vmatpush1.bf16.msra.mxu1 %v9292_v25  ;;  %v11139_v54 = vsub.s32 3, %v11123_v49 }
 0x105   :  { %4219 = vmatprep.subr.bf16.mxu1 %v9300_v26 }
 0x107   :  { %4177 = vmatpush2.bf16.msra.mxu0 %v9223_v56  ;;  %v1591_v56 = vrot.slane %v11128_v57, %v11134_v37 }
 0x108   :  { %4178 = vmatprep.subr.bf16.mxu0 %v9228_v58  ;;  %4220 = vmatpush2.bf16.msra.mxu1 %v9298_v27 }
 0x109   :  { %4221 = vmatprep.subr.bf16.mxu1 %v9306_v28  ;;  %v1611_v4 = vrot.slane %v1591_v56, %v11126_v51  ;;  %v9271_v56 = vld [vmem:[#allocation4 + $0x460] ss:$16 sps:$4 sm:$0xff]  }
 0x10b   :  { %4179 = vmatpush2.bf16.msra.mxu0 %v9226_v62  ;;  %v1607_v62 = vrot.slane %v1587_v53, %v11126_v51  ;;  %v9265_v53 = vld [vmem:[#allocation4 + $0x480] ss:$16 sps:$4 sm:$0xff]  }
 0x10c   :  { %4180 = vmatprep.subr.bf16.mxu0 %v9231_v63  ;;  %4222 = vmatpush2.bf16.msra.mxu1 %v9304_v31  ;;  %v1635_v63 = vrot.slane %v11128_v57, %v11139_v54 }
 0x10d   :  { %4223 = vmatprep.subr.bf16.mxu1 %v9312_v34 }
 0x10f   :  { %4181 = vmatpush2.bf16.msra.mxu0 %v9229_v2 }
 0x110   :  { %4182 = vmatprep.subr.bf16.mxu0 %v9234_v3  ;;  %4224 = vmatpush2.bf16.msra.mxu1 %v9310_v35  ;;  %v1651_v3 = vrot.slane %v1631_v55, %v11131_v30  ;;  %v9273_v55 = vld [vmem:[#allocation4 + $0x464] ss:$16 sps:$4 sm:$0xff]  }
 0x111   :  { %4225 = vmatprep.subr.bf16.mxu1 %v9318_v36 }
 0x113   :  { %4183 = vmatpush2.bf16.msra.mxu0 %v9232_v6 }
 0x114   :  { %4184 = vmatprep.subr.bf16.mxu0 %v9237_v7  ;;  %4226 = vmatpush2.bf16.msra.mxu1 %v9316_v38 }
 0x115   :  { %4227 = vmatprep.subr.bf16.mxu1 %v9324_v39 }
 0x117   :  { %4185 = vmatpush2.bf16.msra.mxu0 %v9235_v10  ;;  %v1655_v10 = vrot.slane %v1635_v63, %v11131_v30  ;;  %v9291_v63 = vld [vmem:[#allocation4 + $0x404] ss:$16 sps:$4 sm:$0xff]  }
 0x118   :  { %4186 = vmatprep.subr.bf16.mxu0 %v9240_v11  ;;  %4228 = vmatpush2.bf16.msra.mxu1 %v9322_v40 }
 0x119   :  { %4229 = vmatprep.subr.bf16.mxu1 %v9330_v41 }
 0x11b   :  { %4187 = vmatpush2.bf16.msra.mxu0 %v9238_v14 }
 0x11c   :  { %4188 = vmatprep.subr.bf16.mxu0 %v9243_v15  ;;  %4230 = vmatpush2.bf16.msra.mxu1 %v9328_v43 }
 0x11d   :  { %4231 = vmatprep.subr.bf16.mxu1 %v9336_v44 }
 0x11f   :  { %4189 = vmatpush2.bf16.msra.mxu0 %v9241_v18 }
 0x120   :  { %4190 = vmatprep.subr.bf16.mxu0 %v9246_v19  ;;  %4232 = vmatpush2.bf16.msra.mxu1 %v9334_v45 }
 0x121   :  { %4233 = vmatprep.subr.bf16.mxu1 %v9342_v46 }
 0x123   :  { %4191 = vmatpush2.bf16.msra.mxu0 %v9244_v22 }
 0x124   :  { %4246 = vmatprep.subr.bf16.mxu0 %v9249_v23  ;;  %4234 = vmatpush2.bf16.msra.mxu1 %v9340_v32  ;;  %v9247_v32 = vld [vmem:[#allocation4 + $0x4e0] ss:$16 sps:$4 sm:$0xff]  }
 0x125   :  { %4289 = vmatprep.subr.bf16.mxu1 %v9348_v33 }
 0x126   :  { %v1359_v48 = vpop.f32.mrf.mxu0 }
 0x127   :  { %v1402_v29 = vpop.f32.mrf.mxu1 }
 0x128   :  { %v1361_v50 = vpop.f32.mrf.mxu0  ;;  %v1403_v61 = vadd.f32 %v1402_v29, %v1359_v48  ;;  %v9253_v29 = vld [vmem:[#allocation4 + $0x4c0] ss:$16 sps:$4 sm:$0xff]  }
 0x129   :  { %v1404_v42 = vpop.f32.mrf.mxu1 }
 0x12a   :  { %v1363_v52 = vpop.f32.mrf.mxu0  ;;  %v1405_v1 = vadd.f32 %v1404_v42, %v1361_v50  ;;  %v9261_v50 = vld [vmem:[#allocation4 + $0x4a4] ss:$16 sps:$4 sm:$0xff]   ;;  %v9259_v42 = vld [vmem:[#allocation4 + $0x4a0] ss:$16 sps:$4 sm:$0xff]  }
 0x12b   :  { %v1406_v58 = vpop.f32.mrf.mxu1 }
 0x12c   :  { %v1365_v59 = vpop.f32.mrf.mxu0  ;;  %v1407_v7 = vadd.f32 %v1406_v58, %v1363_v52  ;;  %v9267_v52 = vld [vmem:[#allocation4 + $0x484] ss:$16 sps:$4 sm:$0xff]  }
 0x12d   :  { %v1408_v5 = vpop.f32.mrf.mxu1  ;;  %v9279_v58 = vld [vmem:[#allocation4 + $0x444] ss:$16 sps:$4 sm:$0xff]  }
 0x12e   :  { %v1409_v12 = vadd.f32 %v1408_v5, %v1365_v59  ;;  %v9277_v59 = vld [vmem:[#allocation4 + $0x440] ss:$16 sps:$4 sm:$0xff]   ;;  %v9303_v5 = vld [vmem:[#allocation4 + $0x5c4] ss:$16 sps:$4 sm:$0xff]  }
 0x166   :  { %v1445_v0 = vpop.f32.mrf.mxu0 }
 0x167   :  { %v1446_v2 = vadd.f32 %v1445_v0, %v1403_v61  ;;  %v9285_v61 = vld [vmem:[#allocation4 + $0x424] ss:$16 sps:$4 sm:$0xff]   ;;  %v1488_v0 = vpop.f32.mrf.mxu1 }
 0x168   :  { %v1447_v6 = vpop.f32.mrf.mxu0 }
 0x169   :  { %v1620_v8 = vmul.f32 %v1607_v62, %v1446_v2  ;;  %v1448_v9 = vadd.f32 %v1447_v6, %v1405_v1  ;;  %v9289_v1 = vld [vmem:[#allocation4 + $0x400] ss:$16 sps:$4 sm:$0xff]   ;;  %v9297_v2 = vld [vmem:[#allocation4 + $0x5e4] ss:$16 sps:$4 sm:$0xff]   ;;  %v11203_v6 = vsub.s32 4, %v11123_v49 }
 0x16a   :  { %v1449_v11 = vpop.f32.mrf.mxu0 }
 0x16b   :  { %v1664_v13 = vadd.f32 %v1651_v3, %v1620_v8  ;;  %v1621_v14 = vmul.f32 %v1611_v4, %v1448_v9  ;;  %v1450_v15 = vadd.f32 %v1449_v11, %v1407_v7  ;;  %v11206_v8 = vsub.s32 5, %v11123_v49  ;;  %v9309_v11 = vld [vmem:[#allocation4 + $0x5a4] ss:$16 sps:$4 sm:$0xff]  }
 0x16c   :  { %v1451_v16 = vpop.f32.mrf.mxu0  ;;  %v11209_v9 = vsub.s32 6, %v11123_v49 }
 0x16d   :  { %v1665_v17 = vadd.f32 %v1655_v10, %v1621_v14  ;;  %v1624_v18 = vmul.f32 %v1607_v62, %v1450_v15  ;;  %v1452_v19 = vadd.f32 %v1451_v16, %v1409_v12  ;;  %v11151_v20 = vmax.f32 %v1664_v13, 0.0  ;;  %v9283_v62 = vld [vmem:[#allocation4 + $0x420] ss:$16 sps:$4 sm:$0xff]  }
 0x16e   :  { %v1595_v12 = vrot.slane %v11128_v57, %v11203_v6  ;;  %v11214_v13 = vsub.s32 7, %v11123_v49  ;;  %v1639_v15 = vrot.slane %v11128_v57, %v11206_v8  ;;  %v1599_v16 = vrot.slane %v11128_v57, %v11209_v9 }
 0x16f   :  { %v11153_v21 = vmax.f32 %v1665_v17, 0.0  ;;  %v1668_v22 = vadd.f32 %v1651_v3, %v1624_v18  ;;  %v1625_v23 = vmul.f32 %v1611_v4, %v1452_v19  ;;  %v1490_v3 = vpop.f32.mrf.mxu1  ;;  %v9295_v4 = vld [vmem:[#allocation4 + $0x5e0] ss:$16 sps:$4 sm:$0xff]  }
 0x170   :  { %v9307_v19 = vld [vmem:[#allocation4 + $0x5a0] ss:$16 sps:$4 sm:$0xff]  }
 0x171   :  { %v11157_v25 = vpack.c.bf16 %v11153_v21, %v11151_v20  ;;  %v1669_v26 = vadd.f32 %v1655_v10, %v1625_v23  ;;  %v11160_v28 = vmax.f32 %v1668_v22, 0.0  ;;  %v1492_v7 = vpop.f32.mrf.mxu1  ;;  %v9301_v10 = vld [vmem:[#allocation4 + $0x5c0] ss:$16 sps:$4 sm:$0xff]   ;;  %v9315_v22 = vld [vmem:[#allocation4 + $0x584] ss:$16 sps:$4 sm:$0xff]  }
 0x173   :  { %v1709_v27 = vshrl.u32 %v11157_v25, 16  ;;  %v11162_v31 = vmax.f32 %v1669_v26, 0.0  ;;  %v1712_v38 = vshll.u32 %v11157_v25, 16  ;;  %v1494_v14 = vpop.f32.mrf.mxu1  ;;  %v1615_v26 = vrot.slane %v1595_v12, %v11126_v51 }
 0x175   :  { %v11166_v34 = vpack.c.bf16 %v11162_v31, %v11160_v28  ;;  %v1711_v35 = vrot.slane %v1709_v27, 7  ;;  %v11198_v48 = vpack.c.bf16 %v11162_v31, %v11153_v21 }
 0x177   :  { %v1747_v36 = vshrl.u32 %v11166_v34, 16  ;;  %v1714_v39 = vor.u32 %v1712_v38, %v1711_v35  ;;  %v1750_v41 = vshll.u32 %v11166_v34, 16  ;;  %v1643_v35 = vrot.slane %v11128_v57, %v11214_v13 }
 0x178   :  { %v1731_v34 = vrot.slane %v1712_v38, 5 }
 0x179   :  { %v1749_v40 = vrot.slane %v1747_v36, 7  ;;  %v11181_v44 = vsel %vm10643_vm6, %v1714_v39, 0 }
 0x17b   :  { %v1752_v43 = vor.u32 %v1750_v41, %v1749_v40 }
 0x17d   :  { %v11185_v45 = vsel %vm10643_vm6, %v1752_v43, 0  ;;  %v1659_v43 = vrot.slane %v1639_v15, %v11131_v30 }
 0x17e   :  { %v11189_v46 = vcombine.high %v11181_v44, %v11185_v45  ;;  %v11193_v33 = vcombine.low %v11181_v44, %v11185_v45 }
 0x180   :  { %4192 = vmatprep.mubr.bf16.mxu0 %v11189_v46 }
 0x181   :  { %4193 = vmatmul.mubr.bf16.vlgmr.msra.gmra.mxu0 %v11193_v33 }
 0x182   :  { %4247 = vmatpush1.bf16.msra.mxu0 %v9247_v32  ;;  %4278 = vmatprep.mubr.bf16.mxu0 %v11198_v48 }
 0x183   :  { %4248 = vmatprep.subr.bf16.mxu0 %v9255_v47  ;;  %v1619_v47 = vrot.slane %v1599_v16, %v11126_v51  ;;  %v9325_v16 = vld [vmem:[#allocation4 + $0x540] ss:$16 sps:$4 sm:$0xff]  }
 0x186   :  { %4249 = vmatpush1.bf16.msra.mxu0 %v9253_v29 }
 0x187   :  { %4250 = vmatprep.subr.bf16.mxu0 %v9261_v50 }
 0x18a   :  { %4251 = vmatpush1.bf16.msra.mxu0 %v9259_v42  ;;  %v9313_v42 = vld [vmem:[#allocation4 + $0x580] ss:$16 sps:$4 sm:$0xff]  }
 0x18b   :  { %4252 = vmatprep.subr.bf16.mxu0 %v9267_v52  ;;  %v9321_v52 = vld [vmem:[#allocation4 + $0x564] ss:$16 sps:$4 sm:$0xff]  }
 0x18e   :  { %4253 = vmatpush1.bf16.msra.mxu0 %v9265_v53 }
 0x18f   :  { %4254 = vmatprep.subr.bf16.mxu0 %v9273_v55 }
 0x192   :  { %4255 = vmatpush1.bf16.msra.mxu0 %v9271_v56  ;;  %v1663_v56 = vrot.slane %v1643_v35, %v11131_v30  ;;  %v9331_v35 = vld [vmem:[#allocation4 + $0x520] ss:$16 sps:$4 sm:$0xff]  }
 0x193   :  { %4256 = vmatprep.subr.bf16.mxu0 %v9279_v58 }
 0x196   :  { %4257 = vmatpush1.bf16.msra.mxu0 %v9277_v59 }
 0x197   :  { %4258 = vmatprep.subr.bf16.mxu0 %v9285_v61 }
 0x19a   :  { %4259 = vmatpush1.bf16.msra.mxu0 %v9283_v62 }
 0x19b   :  { %4260 = vmatprep.subr.bf16.mxu0 %v9291_v63 }
 0x19e   :  { %4261 = vmatpush1.bf16.msra.mxu0 %v9289_v1  ;;  %v9319_v1 = vld [vmem:[#allocation4 + $0x560] ss:$16 sps:$4 sm:$0xff]  }
 0x19f   :  { %4262 = vmatprep.subr.bf16.mxu0 %v9297_v2  ;;  %v9327_v2 = vld [vmem:[#allocation4 + $0x544] ss:$16 sps:$4 sm:$0xff]  }
 0x1a2   :  { %4263 = vmatpush2.bf16.msra.mxu0 %v9295_v4 }
 0x1a3   :  { %4264 = vmatprep.subr.bf16.mxu0 %v9303_v5 }
 0x1a6   :  { %4265 = vmatpush2.bf16.msra.mxu0 %v9301_v10  ;;  %v1531_v17 = vpop.f32.mrf.mxu0  ;;  %v1768_v10 = vrot.slane %v1747_v36, 4  ;;  %v1730_v36 = vrot.slane %v1709_v27, 4 }
 0x1a7   :  { %v1574_v18 = vpop.f32.mrf.mxu1  ;;  %v1532_v23 = vadd.f32 %v1531_v17, %v1488_v0  ;;  %4266 = vmatprep.subr.bf16.mxu0 %v9309_v11  ;;  %v9333_v17 = vld [vmem:[#allocation4 + $0x524] ss:$16 sps:$4 sm:$0xff]  }
 0x1a8   :  { %v1533_v49 = vpop.f32.mrf.mxu0 }
 0x1a9   :  { %v1576_v39 = vpop.f32.mrf.mxu1  ;;  %v1575_v40 = vadd.f32 %v1574_v18, %v1532_v23  ;;  %v1534_v32 = vadd.f32 %v1533_v49, %v1490_v3  ;;  %v9339_v49 = vld [vmem:[#allocation4 + $0x504] ss:$16 sps:$4 sm:$0xff]  }
 0x1aa   :  { %4267 = vmatpush2.bf16.msra.mxu0 %v9307_v19  ;;  %v1535_v29 = vpop.f32.mrf.mxu0 }
 0x1ab   :  { %v1578_v50 = vpop.f32.mrf.mxu1  ;;  %v1622_v53 = vmul.f32 %v1615_v26, %v1575_v40  ;;  %v1577_v55 = vadd.f32 %v1576_v39, %v1534_v32  ;;  %v1536_v58 = vadd.f32 %v1535_v29, %v1492_v7  ;;  %4268 = vmatprep.subr.bf16.mxu0 %v9315_v22  ;;  %v1769_v7 = vrot.slane %v1750_v41, 5  ;;  %v9337_v32 = vld [vmem:[#allocation4 + $0x500] ss:$16 sps:$4 sm:$0xff]  }
 0x1ac   :  { %v1537_v57 = vpop.f32.mrf.mxu0  ;;  %v1732_v40 = vor.u32 %v1731_v34, %v1730_v36  ;;  %v9366_v36 = vld [vmem:[#allocation4 + $0x684] ss:$16 sps:$4 sm:$0xff]  }
 0x1ad   :  { %v1666_v59 = vadd.f32 %v1659_v43, %v1622_v53  ;;  %v1623_v61 = vmul.f32 %v1619_v47, %v1577_v55  ;;  %v1579_v62 = vadd.f32 %v1578_v50, %v1536_v58  ;;  %v1538_v63 = vadd.f32 %v1537_v57, %v1494_v14  ;;  %v1580_v0 = vpop.f32.mrf.mxu1  ;;  %v9351_v58 = vld [vmem:[#allocation4 + $0x8c4] ss:$16 sps:$4 sm:$0xff]  }
 0x1ae   :  { %4269 = vmatpush2.bf16.msra.mxu0 %v9313_v42  ;;  %v1733_v29 = vrot.slane %v1732_v40, 4  ;;  %v11268_v57 = vpack.c.bf16 %v11160_v28, %v11151_v20  ;;  %v9369_v34 = vld [vmem:[#allocation4 + $0x864] ss:$16 sps:$4 sm:$0xff]  }
 0x1af   :  { %v1667_v3 = vadd.f32 %v1663_v56, %v1623_v61  ;;  %v1626_v4 = vmul.f32 %v1615_v26, %v1579_v62  ;;  %v1581_v5 = vadd.f32 %v1580_v0, %v1538_v63  ;;  %4270 = vmatprep.subr.bf16.mxu0 %v9321_v52  ;;  %v11230_v11 = vmax.f32 %v1666_v59, 0.0  ;;  %v9375_v40 = vld [vmem:[#allocation4 + $0x844] ss:$16 sps:$4 sm:$0xff]  }
 0x1b0   :  { %v1770_v26 = vor.u32 %v1769_v7, %v1768_v10  ;;  %v11272_v59 = vsel %vm10701_vm11, %v1733_v29, 0  ;;  %v9357_v10 = vld [vmem:[#allocation4 + $0x8a4] ss:$16 sps:$4 sm:$0xff]   ;;  %v9352_v7 = vld [vmem:[#allocation4 + $0x6c0] ss:$16 sps:$4 sm:$0xff]  }
 0x1b1   :  { %v11232_v12 = vmax.f32 %v1667_v3, 0.0  ;;  %v1670_v15 = vadd.f32 %v1659_v43, %v1626_v4  ;;  %v1627_v14 = vmul.f32 %v1619_v47, %v1581_v5  ;;  %v9345_v47 = vld [vmem:[#allocation4 + $0x8e4] ss:$16 sps:$4 sm:$0xff]   ;;  %v9349_v3 = vld [vmem:[#allocation4 + $0x8c0] ss:$16 sps:$4 sm:$0xff]  }
 0x1b2   :  { %4271 = vmatpush2.bf16.msra.mxu0 %v9319_v1  ;;  %v1771_v38 = vrot.slane %v1770_v26, 4  ;;  %v9346_v1 = vld [vmem:[#allocation4 + $0x6e0] ss:$16 sps:$4 sm:$0xff]   ;;  %v9354_v4 = vld [vmem:[#allocation4 + $0x6c4] ss:$16 sps:$4 sm:$0xff]  }
 0x1b3   :  { %v11236_v18 = vpack.c.bf16 %v11232_v12, %v11230_v11  ;;  %v1671_v19 = vadd.f32 %v1663_v56, %v1627_v14  ;;  %4272 = vmatprep.subr.bf16.mxu0 %v9327_v2  ;;  %v11243_v22 = vmax.f32 %v1670_v15, 0.0  ;;  %v9343_v56 = vld [vmem:[#allocation4 + $0x8e0] ss:$16 sps:$4 sm:$0xff]   ;;  %v9360_v14 = vld [vmem:[#allocation4 + $0x6a4] ss:$16 sps:$4 sm:$0xff]  }
 0x1b4   :  { %v11262_v53 = vsel %vm10701_vm11, %v1771_v38, 0  ;;  %v9355_v15 = vld [vmem:[#allocation4 + $0x8a0] ss:$16 sps:$4 sm:$0xff]  }
 0x1b5   :  { %v1716_v41 = vshrl.u32 %v11236_v18, 16  ;;  %v11245_v23 = vmax.f32 %v1671_v19, 0.0  ;;  %v1719_v43 = vshll.u32 %v11236_v18, 16  ;;  %v11284_v63 = vcombine.high %v11272_v59, %v11262_v53  ;;  %v9361_v19 = vld [vmem:[#allocation4 + $0x880] ss:$16 sps:$4 sm:$0xff]  }
 0x1b6   :  { %4273 = vmatpush2.bf16.msra.mxu0 %v9325_v16  ;;  %v9363_v16 = vld [vmem:[#allocation4 + $0x884] ss:$16 sps:$4 sm:$0xff]   ;;  %v9364_v26 = vld [vmem:[#allocation4 + $0x680] ss:$16 sps:$4 sm:$0xff]  }
 0x1b7   :  { %v11249_v39 = vpack.c.bf16 %v11245_v23, %v11243_v22  ;;  %4274 = vmatprep.subr.bf16.mxu0 %v9333_v17  ;;  %v1718_v25 = vrot.slane %v1716_v41, 7  ;;  %v11299_v5 = vpack.c.bf16 %v11245_v23, %v11232_v12  ;;  %v9358_v17 = vld [vmem:[#allocation4 + $0x6a0] ss:$16 sps:$4 sm:$0xff]  }
 0x1b8   :  { %v9373_v38 = vld [vmem:[#allocation4 + $0x840] ss:$16 sps:$4 sm:$0xff]  }
 0x1b9   :  { %v1754_v27 = vshrl.u32 %v11249_v39, 16  ;;  %v1721_v50 = vor.u32 %v1719_v43, %v1718_v25  ;;  %v1757_v52 = vshll.u32 %v11249_v39, 16  ;;  %v9370_v25 = vld [vmem:[#allocation4 + $0x660] ss:$16 sps:$4 sm:$0xff]   ;;  %v9438_v39 = vld [vmem:[#allocation4 + $0x704] ss:$16 sps:$4 sm:$0xff]  }
 0x1ba   :  { %4275 = vmatpush2.bf16.msra.mxu0 %v9331_v35  ;;  %v9367_v35 = vld [vmem:[#allocation4 + $0x860] ss:$16 sps:$4 sm:$0xff]  }
 0x1bb   :  { %4276 = vmatprep.subr.bf16.mxu0 %v9339_v49  ;;  %v1756_v42 = vrot.slane %v1754_v27, 7  ;;  %v11276_v61 = vsel %vm10643_vm6, %v1721_v50, 0  ;;  %v9372_v49 = vld [vmem:[#allocation4 + $0x664] ss:$16 sps:$4 sm:$0xff]   ;;  %v9376_v29 = vld [vmem:[#allocation4 + $0x640] ss:$16 sps:$4 sm:$0xff]  }
 0x1bc   :  { %v9379_v50 = vld [vmem:[#allocation4 + $0x820] ss:$16 sps:$4 sm:$0xff]  }
 0x1bd   :  { %v1759_v55 = vor.u32 %v1757_v52, %v1756_v42  ;;  %v9384_v42 = vld [vmem:[#allocation4 + $0x624] ss:$16 sps:$4 sm:$0xff]  }
 0x1be   :  { %4277 = vmatpush2.bf16.msra.mxu0 %v9337_v32  ;;  %v9378_v32 = vld [vmem:[#allocation4 + $0x644] ss:$16 sps:$4 sm:$0xff]  }
 0x1bf   :  { %4332 = vmatprep.subr.bf16.mxu0 %v9345_v47  ;;  %v11280_v62 = vsel %vm10643_vm6, %v1759_v55, 0  ;;  %v9381_v47 = vld [vmem:[#allocation4 + $0x824] ss:$16 sps:$4 sm:$0xff]  }
 0x1c0   :  { %v11288_v0 = vcombine.high %v11276_v61, %v11280_v62  ;;  %v11292_v2 = vcombine.low %v11276_v61, %v11280_v62  ;;  %v9387_v55 = vld [vmem:[#allocation4 + $0x804] ss:$16 sps:$4 sm:$0xff]  }
 0x1c1   :  { %4279 = vmatmul.mubr.bf16.vlgmr.msra.gmra.mxu0 %v11268_v57 }
 0x1c2   :  { %4333 = vmatpush1.bf16.msra.mxu0 %v9343_v56  ;;  %4364 = vmatprep.mubr.bf16.mxu0 %v11284_v63  ;;  %v9382_v56 = vld [vmem:[#allocation4 + $0x620] ss:$16 sps:$4 sm:$0xff]  }
 0x1c3   :  { %4235 = vmatprep.mubr.bf16.mxu1 %v11288_v0  ;;  %4334 = vmatprep.subr.bf16.mxu0 %v9351_v58  ;;  %v9385_v58 = vld [vmem:[#allocation4 + $0x800] ss:$16 sps:$4 sm:$0xff]  }
 0x1c4   :  { %4236 = vmatmul.mubr.bf16.vlgmr.msra.gmra.mxu1 %v11292_v2 }
 0x1c5   :  { %4290 = vmatpush1.bf16.msra.mxu1 %v9346_v1  ;;  %4321 = vmatprep.mubr.bf16.mxu1 %v11299_v5  ;;  %v9390_v1 = vld [vmem:[#allocation4 + $0x604] ss:$16 sps:$4 sm:$0xff]  }
 0x1c6   :  { %4335 = vmatpush1.bf16.msra.mxu0 %v9349_v3  ;;  %4291 = vmatprep.subr.bf16.mxu1 %v9354_v4  ;;  %v9393_v3 = vld [vmem:[#allocation4 + $0x9e4] ss:$16 sps:$4 sm:$0xff]   ;;  %v9388_v4 = vld [vmem:[#allocation4 + $0x600] ss:$16 sps:$4 sm:$0xff]  }
 0x1c7   :  { %4336 = vmatprep.subr.bf16.mxu0 %v9357_v10  ;;  %v9391_v10 = vld [vmem:[#allocation4 + $0x9e0] ss:$16 sps:$4 sm:$0xff]  }
 0x1c9   :  { %4292 = vmatpush1.bf16.msra.mxu1 %v9352_v7  ;;  %v9396_v7 = vld [vmem:[#allocation4 + $0x7e4] ss:$16 sps:$4 sm:$0xff]  }
 0x1ca   :  { %4337 = vmatpush1.bf16.msra.mxu0 %v9355_v15  ;;  %4293 = vmatprep.subr.bf16.mxu1 %v9360_v14  ;;  %v9399_v15 = vld [vmem:[#allocation4 + $0x9c4] ss:$16 sps:$4 sm:$0xff]   ;;  %v9394_v14 = vld [vmem:[#allocation4 + $0x7e0] ss:$16 sps:$4 sm:$0xff]  }
 0x1cb   :  { %4338 = vmatprep.subr.bf16.mxu0 %v9363_v16  ;;  %v9397_v16 = vld [vmem:[#allocation4 + $0x9c0] ss:$16 sps:$4 sm:$0xff]  }
 0x1cd   :  { %4294 = vmatpush1.bf16.msra.mxu1 %v9358_v17  ;;  %v9402_v17 = vld [vmem:[#allocation4 + $0x7c4] ss:$16 sps:$4 sm:$0xff]  }
 0x1ce   :  { %4339 = vmatpush1.bf16.msra.mxu0 %v9361_v19  ;;  %4295 = vmatprep.subr.bf16.mxu1 %v9366_v36  ;;  %v9405_v19 = vld [vmem:[#allocation4 + $0x9a4] ss:$16 sps:$4 sm:$0xff]   ;;  %v9400_v36 = vld [vmem:[#allocation4 + $0x7c0] ss:$16 sps:$4 sm:$0xff]  }
 0x1cf   :  { %4340 = vmatprep.subr.bf16.mxu0 %v9369_v34  ;;  %v9403_v34 = vld [vmem:[#allocation4 + $0x9a0] ss:$16 sps:$4 sm:$0xff]  }
 0x1d1   :  { %4296 = vmatpush1.bf16.msra.mxu1 %v9364_v26  ;;  %v9408_v26 = vld [vmem:[#allocation4 + $0x7a4] ss:$16 sps:$4 sm:$0xff]  }
 0x1d2   :  { %4341 = vmatpush1.bf16.msra.mxu0 %v9367_v35  ;;  %4297 = vmatprep.subr.bf16.mxu1 %v9372_v49  ;;  %v9411_v35 = vld [vmem:[#allocation4 + $0x984] ss:$16 sps:$4 sm:$0xff]   ;;  %v9406_v49 = vld [vmem:[#allocation4 + $0x7a0] ss:$16 sps:$4 sm:$0xff]  }
 0x1d3   :  { %4342 = vmatprep.subr.bf16.mxu0 %v9375_v40  ;;  %v9409_v40 = vld [vmem:[#allocation4 + $0x980] ss:$16 sps:$4 sm:$0xff]  }
 0x1d5   :  { %4298 = vmatpush1.bf16.msra.mxu1 %v9370_v25  ;;  %v9414_v25 = vld [vmem:[#allocation4 + $0x784] ss:$16 sps:$4 sm:$0xff]  }
 0x1d6   :  { %4343 = vmatpush1.bf16.msra.mxu0 %v9373_v38  ;;  %4299 = vmatprep.subr.bf16.mxu1 %v9378_v32  ;;  %v9417_v38 = vld [vmem:[#allocation4 + $0x964] ss:$16 sps:$4 sm:$0xff]   ;;  %v9412_v32 = vld [vmem:[#allocation4 + $0x780] ss:$16 sps:$4 sm:$0xff]  }
 0x1d7   :  { %4344 = vmatprep.subr.bf16.mxu0 %v9381_v47  ;;  %v9415_v47 = vld [vmem:[#allocation4 + $0x960] ss:$16 sps:$4 sm:$0xff]  }
 0x1d9   :  { %4300 = vmatpush1.bf16.msra.mxu1 %v9376_v29  ;;  %v9420_v29 = vld [vmem:[#allocation4 + $0x764] ss:$16 sps:$4 sm:$0xff]  }
 0x1da   :  { %4345 = vmatpush1.bf16.msra.mxu0 %v9379_v50  ;;  %4301 = vmatprep.subr.bf16.mxu1 %v9384_v42  ;;  %v9423_v50 = vld [vmem:[#allocation4 + $0x944] ss:$16 sps:$4 sm:$0xff]   ;;  %v9418_v42 = vld [vmem:[#allocation4 + $0x760] ss:$16 sps:$4 sm:$0xff]  }
 0x1db   :  { %4346 = vmatprep.subr.bf16.mxu0 %v9387_v55  ;;  %v9421_v55 = vld [vmem:[#allocation4 + $0x940] ss:$16 sps:$4 sm:$0xff]  }
 0x1dd   :  { %4302 = vmatpush1.bf16.msra.mxu1 %v9382_v56  ;;  %v9426_v56 = vld [vmem:[#allocation4 + $0x744] ss:$16 sps:$4 sm:$0xff]  }
 0x1de   :  { %4347 = vmatpush1.bf16.msra.mxu0 %v9385_v58  ;;  %4303 = vmatprep.subr.bf16.mxu1 %v9390_v1  ;;  %v9429_v58 = vld [vmem:[#allocation4 + $0x924] ss:$16 sps:$4 sm:$0xff]   ;;  %v9424_v1 = vld [vmem:[#allocation4 + $0x740] ss:$16 sps:$4 sm:$0xff]  }
 0x1df   :  { %4348 = vmatprep.subr.bf16.mxu0 %v9393_v3  ;;  %v9427_v3 = vld [vmem:[#allocation4 + $0x920] ss:$16 sps:$4 sm:$0xff]  }
 0x1e1   :  { %4304 = vmatpush1.bf16.msra.mxu1 %v9388_v4  ;;  %v1772_v4 = vrot.slane %v1754_v27, 4  ;;  %v9441_v27 = vld [vmem:[#allocation4 + $0xec] ss:$16 sps:$4 sm:$0xff]  }
 0x1e2   :  { %4349 = vmatpush2.bf16.msra.mxu0 %v9391_v10  ;;  %4305 = vmatprep.subr.bf16.mxu1 %v9396_v7  ;;  %v1773_v10 = vrot.slane %v1757_v52, 5  ;;  %v9432_v7 = vld [vmem:[#allocation4 + $0x724] ss:$16 sps:$4 sm:$0xff]  }
 0x1e3   :  { %4350 = vmatprep.subr.bf16.mxu0 %v9399_v15  ;;  %v9435_v15 = vld [vmem:[#allocation4 + $0x904] ss:$16 sps:$4 sm:$0xff]  }
 0x1e5   :  { %4306 = vmatpush2.bf16.msra.mxu1 %v9394_v14  ;;  %v1734_v14 = vrot.slane %v1716_v41, 4  ;;  %v9444_v41 = vld [vmem:[#allocation4 + $0xae4] ss:$16 sps:$4 sm:$0xff]  }
 0x1e6   :  { %4351 = vmatpush2.bf16.msra.mxu0 %v9397_v16  ;;  %4307 = vmatprep.subr.bf16.mxu1 %v9402_v17  ;;  %v1735_v16 = vrot.slane %v1719_v43, 5  ;;  %v9430_v17 = vld [vmem:[#allocation4 + $0x720] ss:$16 sps:$4 sm:$0xff]   ;;  %v9447_v43 = vld [vmem:[#allocation4 + $0xcc] ss:$16 sps:$4 sm:$0xff]  }
 0x1e7   :  { %4352 = vmatprep.subr.bf16.mxu0 %v9405_v19  ;;  %v1774_v19 = vor.u32 %v1773_v10, %v1772_v4  ;;  %v9462_v4 = vld [vmem:[#allocation4 + $0xa84] ss:$16 sps:$4 sm:$0xff]   ;;  %v9465_v10 = vld [vmem:[#allocation4 + $0x6c] ss:$16 sps:$4 sm:$0xff]  }
 0x1e8   :  { %v1736_v52 = vor.u32 %v1735_v16, %v1734_v14  ;;  %v9468_v14 = vld [vmem:[#allocation4 + $0xa64] ss:$16 sps:$4 sm:$0xff]   ;;  %v9471_v16 = vld [vmem:[#allocation4 + $0x4c] ss:$16 sps:$4 sm:$0xff]  }
 0x1e9   :  { %4308 = vmatpush2.bf16.msra.mxu1 %v9400_v36  ;;  %v9433_v36 = vld [vmem:[#allocation4 + $0x900] ss:$16 sps:$4 sm:$0xff]  }
 0x1ea   :  { %4353 = vmatpush2.bf16.msra.mxu0 %v9403_v34  ;;  %4309 = vmatprep.subr.bf16.mxu1 %v9408_v26  ;;  %v9436_v34 = vld [vmem:[#allocation4 + $0x700] ss:$16 sps:$4 sm:$0xff]   ;;  %v1775_v26 = vrot.slane %v1774_v19, 4  ;;  %v1737_v18 = vrot.slane %v1736_v52, 4  ;;  %v9469_v19 = vld [vmem:[#allocation4 + $0x48] ss:$16 sps:$4 sm:$0xff]  }
 0x1eb   :  { %4354 = vmatprep.subr.bf16.mxu0 %v9411_v35  ;;  %v9439_v35 = vld [vmem:[#allocation4 + $0xe8] ss:$16 sps:$4 sm:$0xff]  }
 0x1ec   :  { %v9475_v52 = vld [vmem:[#allocation4 + $0x28] ss:$16 sps:$4 sm:$0xff]  }
 0x1ed   :  { %4310 = vmatpush2.bf16.msra.mxu1 %v9406_v49  ;;  %v11313_v49 = vcombine.low %v11272_v59, %v11262_v53 }
 0x1ee   :  { %4355 = vmatpush2.bf16.msra.mxu0 %v9409_v40  ;;  %4311 = vmatprep.subr.bf16.mxu1 %v9414_v25  ;;  %v9442_v40 = vld [vmem:[#allocation4 + $0xae0] ss:$16 sps:$4 sm:$0xff]   ;;  %v11317_v25 = vsel %vm10701_vm11, %v1775_v26, 0  ;;  %v9483_v26 = vld [vmem:[#allocation4 + $0xc] ss:$16 sps:$4 sm:$0xff]  }
 0x1ef   :  { %4356 = vmatprep.subr.bf16.mxu0 %v9417_v38  ;;  %v9445_v38 = vld [vmem:[#allocation4 + $0xc8] ss:$16 sps:$4 sm:$0xff]  }
 0x1f1   :  { %4312 = vmatpush2.bf16.msra.mxu1 %v9412_v32  ;;  %v11323_v32 = vpack.c.bf16 %v11243_v22, %v11230_v11 }
 0x1f2   :  { %4357 = vmatpush2.bf16.msra.mxu0 %v9415_v47  ;;  %4313 = vmatprep.subr.bf16.mxu1 %v9420_v29  ;;  %v11327_v47 = vsel %vm10701_vm11, %v1737_v18, 0  ;;  %v9450_v29 = vld [vmem:[#allocation4 + $0xac4] ss:$16 sps:$4 sm:$0xff]  }
 0x1f3   :  { %4358 = vmatprep.subr.bf16.mxu0 %v9423_v50  ;;  %v11331_v50 = vcombine.high %v11327_v47, %v11317_v25  ;;  %v9486_v18 = vld [vmem:[#allocation4 + $0xa04] ss:$16 sps:$4 sm:$0xff]  }
 0x1f5   :  { %4314 = vmatpush2.bf16.msra.mxu1 %v9418_v42  ;;  %v9453_v42 = vld [vmem:[#allocation4 + $0xac] ss:$16 sps:$4 sm:$0xff]  }
 0x1f6   :  { %4359 = vmatpush2.bf16.msra.mxu0 %v9421_v55  ;;  %4315 = vmatprep.subr.bf16.mxu1 %v9426_v56  ;;  %v9448_v55 = vld [vmem:[#allocation4 + $0xac0] ss:$16 sps:$4 sm:$0xff]   ;;  %v9456_v56 = vld [vmem:[#allocation4 + $0xaa4] ss:$16 sps:$4 sm:$0xff]  }
 0x1f7   :  { %4360 = vmatprep.subr.bf16.mxu0 %v9429_v58  ;;  %v9459_v58 = vld [vmem:[#allocation4 + $0x8c] ss:$16 sps:$4 sm:$0xff]  }
 0x1f9   :  { %4316 = vmatpush2.bf16.msra.mxu1 %v9424_v1  ;;  %v9454_v1 = vld [vmem:[#allocation4 + $0xaa0] ss:$16 sps:$4 sm:$0xff]  }
 0x1fa   :  { %4361 = vmatpush2.bf16.msra.mxu0 %v9427_v3  ;;  %4317 = vmatprep.subr.bf16.mxu1 %v9432_v7  ;;  %v9457_v3 = vld [vmem:[#allocation4 + $0x88] ss:$16 sps:$4 sm:$0xff]   ;;  %v9460_v7 = vld [vmem:[#allocation4 + $0xa80] ss:$16 sps:$4 sm:$0xff]  }
 0x1fb   :  { %4362 = vmatprep.subr.bf16.mxu0 %v9435_v15  ;;  %v9463_v15 = vld [vmem:[#allocation4 + $0x68] ss:$16 sps:$4 sm:$0xff]  }
 0x1fd   :  { %4318 = vmatpush2.bf16.msra.mxu1 %v9430_v17  ;;  %v9466_v17 = vld [vmem:[#allocation4 + $0xa60] ss:$16 sps:$4 sm:$0xff]  }
 0x1fe   :  { %4363 = vmatpush2.bf16.msra.mxu0 %v9433_v36  ;;  %4319 = vmatprep.subr.bf16.mxu1 %v9438_v39  ;;  %v9474_v36 = vld [vmem:[#allocation4 + $0xa44] ss:$16 sps:$4 sm:$0xff]   ;;  %v9477_v39 = vld [vmem:[#allocation4 + $0x2c] ss:$16 sps:$4 sm:$0xff]  }
 0x1ff   :  { %4418 = vmatprep.subr.bf16.mxu0 %v9441_v27  ;;  %v9472_v27 = vld [vmem:[#allocation4 + $0xa40] ss:$16 sps:$4 sm:$0xff]  }
 0x201   :  { %4320 = vmatpush2.bf16.msra.mxu1 %v9436_v34  ;;  %4365 = vmatmul.mubr.bf16.vlgmr.msra.gmra.mxu0 %v11313_v49  ;;  %v9480_v34 = vld [vmem:[#allocation4 + $0xa24] ss:$16 sps:$4 sm:$0xff]  }
 0x202   :  { %4419 = vmatpush1.bf16.msra.mxu0 %v9439_v35  ;;  %4450 = vmatprep.mubr.bf16.mxu0 %v11189_v46  ;;  %v9451_v46 = vld [vmem:[#allocation4 + $0xa8] ss:$16 sps:$4 sm:$0xff]   ;;  %v9478_v35 = vld [vmem:[#allocation4 + $0xa20] ss:$16 sps:$4 sm:$0xff]  }
 0x203   :  { %4375 = vmatprep.subr.bf16.mxu1 %v9444_v41  ;;  %4420 = vmatprep.subr.bf16.mxu0 %v9447_v43  ;;  %v9481_v41 = vld [vmem:[#allocation4 + $0x8] ss:$16 sps:$4 sm:$0xff]   ;;  %v9489_v43 = vld [vmem:[#allocation4 + $0x1ec] ss:$16 sps:$4 sm:$0xff]  }
 0x204   :  { %4322 = vmatmul.mubr.bf16.vlgmr.msra.gmra.mxu1 %v11323_v32 }
 0x205   :  { %4376 = vmatpush1.bf16.msra.mxu1 %v9442_v40  ;;  %4407 = vmatprep.mubr.bf16.mxu1 %v11331_v50  ;;  %v9484_v40 = vld [vmem:[#allocation4 + $0xa00] ss:$16 sps:$4 sm:$0xff]  }
 0x206   :  { %4421 = vmatpush1.bf16.msra.mxu0 %v9445_v38  ;;  %4377 = vmatprep.subr.bf16.mxu1 %v9450_v29  ;;  %v9487_v38 = vld [vmem:[#allocation4 + $0x1e8] ss:$16 sps:$4 sm:$0xff]   ;;  %v9492_v29 = vld [vmem:[#allocation4 + $0xbe4] ss:$16 sps:$4 sm:$0xff]  }
 0x207   :  { %4422 = vmatprep.subr.bf16.mxu0 %v9453_v42  ;;  %v9495_v42 = vld [vmem:[#allocation4 + $0x1cc] ss:$16 sps:$4 sm:$0xff]  }
 0x209   :  { %4378 = vmatpush1.bf16.msra.mxu1 %v9448_v55  ;;  %v9490_v55 = vld [vmem:[#allocation4 + $0xbe0] ss:$16 sps:$4 sm:$0xff]  }
 0x20a   :  { %4423 = vmatpush1.bf16.msra.mxu0 %v9451_v46  ;;  %4379 = vmatprep.subr.bf16.mxu1 %v9456_v56  ;;  %v9493_v46 = vld [vmem:[#allocation4 + $0x1c8] ss:$16 sps:$4 sm:$0xff]   ;;  %v9498_v56 = vld [vmem:[#allocation4 + $0xbc4] ss:$16 sps:$4 sm:$0xff]  }
 0x20b   :  { %4424 = vmatprep.subr.bf16.mxu0 %v9459_v58  ;;  %v9501_v58 = vld [vmem:[#allocation4 + $0x1ac] ss:$16 sps:$4 sm:$0xff]  }
 0x20d   :  { %4380 = vmatpush1.bf16.msra.mxu1 %v9454_v1  ;;  %v9496_v1 = vld [vmem:[#allocation4 + $0xbc0] ss:$16 sps:$4 sm:$0xff]  }
 0x20e   :  { %4425 = vmatpush1.bf16.msra.mxu0 %v9457_v3  ;;  %4381 = vmatprep.subr.bf16.mxu1 %v9462_v4  ;;  %v9499_v3 = vld [vmem:[#allocation4 + $0x1a8] ss:$16 sps:$4 sm:$0xff]   ;;  %v9504_v4 = vld [vmem:[#allocation4 + $0xba4] ss:$16 sps:$4 sm:$0xff]  }
 0x20f   :  { %4426 = vmatprep.subr.bf16.mxu0 %v9465_v10  ;;  %v9507_v10 = vld [vmem:[#allocation4 + $0x18c] ss:$16 sps:$4 sm:$0xff]  }
 0x211   :  { %4382 = vmatpush1.bf16.msra.mxu1 %v9460_v7  ;;  %v9502_v7 = vld [vmem:[#allocation4 + $0xba0] ss:$16 sps:$4 sm:$0xff]  }
 0x212   :  { %4427 = vmatpush1.bf16.msra.mxu0 %v9463_v15  ;;  %4383 = vmatprep.subr.bf16.mxu1 %v9468_v14  ;;  %v9505_v15 = vld [vmem:[#allocation4 + $0x188] ss:$16 sps:$4 sm:$0xff]   ;;  %v9510_v14 = vld [vmem:[#allocation4 + $0xb84] ss:$16 sps:$4 sm:$0xff]  }
 0x213   :  { %4428 = vmatprep.subr.bf16.mxu0 %v9471_v16  ;;  %v9513_v16 = vld [vmem:[#allocation4 + $0x16c] ss:$16 sps:$4 sm:$0xff]  }
 0x215   :  { %4384 = vmatpush1.bf16.msra.mxu1 %v9466_v17  ;;  %v9508_v17 = vld [vmem:[#allocation4 + $0xb80] ss:$16 sps:$4 sm:$0xff]  }
 0x216   :  { %4429 = vmatpush1.bf16.msra.mxu0 %v9469_v19  ;;  %4385 = vmatprep.subr.bf16.mxu1 %v9474_v36  ;;  %v9511_v19 = vld [vmem:[#allocation4 + $0x168] ss:$16 sps:$4 sm:$0xff]   ;;  %v9516_v36 = vld [vmem:[#allocation4 + $0xb64] ss:$16 sps:$4 sm:$0xff]  }
 0x217   :  { %4430 = vmatprep.subr.bf16.mxu0 %v9477_v39  ;;  %v9519_v39 = vld [vmem:[#allocation4 + $0x14c] ss:$16 sps:$4 sm:$0xff]  }
 0x219   :  { %4386 = vmatpush1.bf16.msra.mxu1 %v9472_v27  ;;  %v9514_v27 = vld [vmem:[#allocation4 + $0xb60] ss:$16 sps:$4 sm:$0xff]  }
 0x21a   :  { %4431 = vmatpush1.bf16.msra.mxu0 %v9475_v52  ;;  %4387 = vmatprep.subr.bf16.mxu1 %v9480_v34  ;;  %v9517_v52 = vld [vmem:[#allocation4 + $0x148] ss:$16 sps:$4 sm:$0xff]   ;;  %v9522_v34 = vld [vmem:[#allocation4 + $0xb44] ss:$16 sps:$4 sm:$0xff]  }
 0x21b   :  { %4432 = vmatprep.subr.bf16.mxu0 %v9483_v26  ;;  %v9525_v26 = vld [vmem:[#allocation4 + $0x12c] ss:$16 sps:$4 sm:$0xff]  }
 0x21d   :  { %4388 = vmatpush1.bf16.msra.mxu1 %v9478_v35  ;;  %v9520_v35 = vld [vmem:[#allocation4 + $0xb40] ss:$16 sps:$4 sm:$0xff]  }
 0x21e   :  { %4433 = vmatpush1.bf16.msra.mxu0 %v9481_v41  ;;  %4389 = vmatprep.subr.bf16.mxu1 %v9486_v18  ;;  %v9523_v41 = vld [vmem:[#allocation4 + $0x128] ss:$16 sps:$4 sm:$0xff]   ;;  %v9528_v18 = vld [vmem:[#allocation4 + $0xb24] ss:$16 sps:$4 sm:$0xff]  }
 0x21f   :  { %4434 = vmatprep.subr.bf16.mxu0 %v9489_v43  ;;  %v9531_v43 = vld [vmem:[#allocation4 + $0x10c] ss:$16 sps:$4 sm:$0xff]  }
 0x221   :  { %4390 = vmatpush1.bf16.msra.mxu1 %v9484_v40  ;;  %v9526_v40 = vld [vmem:[#allocation4 + $0xb20] ss:$16 sps:$4 sm:$0xff]  }
 0x222   :  { %4435 = vmatpush2.bf16.msra.mxu0 %v9487_v38  ;;  %4391 = vmatprep.subr.bf16.mxu1 %v9492_v29  ;;  %v9529_v38 = vld [vmem:[#allocation4 + $0x108] ss:$16 sps:$4 sm:$0xff]   ;;  %v9534_v29 = vld [vmem:[#allocation4 + $0xb04] ss:$16 sps:$4 sm:$0xff]  }
 0x223   :  { %4436 = vmatprep.subr.bf16.mxu0 %v9495_v42  ;;  %v9537_v42 = vld [vmem:[#allocation4 + $0x4ec] ss:$16 sps:$4 sm:$0xff]  }
 0x225   :  { %4392 = vmatpush2.bf16.msra.mxu1 %v9490_v55  ;;  %v9532_v55 = vld [vmem:[#allocation4 + $0xb00] ss:$16 sps:$4 sm:$0xff]  }
 0x226   :  { %4437 = vmatpush2.bf16.msra.mxu0 %v9493_v46  ;;  %4393 = vmatprep.subr.bf16.mxu1 %v9498_v56  ;;  %v9535_v46 = vld [vmem:[#allocation4 + $0x4e8] ss:$16 sps:$4 sm:$0xff]   ;;  %v9540_v56 = vld [vmem:[#allocation4 + $0x2ec] ss:$16 sps:$4 sm:$0xff]  }
 0x227   :  { %4438 = vmatprep.subr.bf16.mxu0 %v9501_v58  ;;  %v9543_v58 = vld [vmem:[#allocation4 + $0x4cc] ss:$16 sps:$4 sm:$0xff]  }
 0x229   :  { %4394 = vmatpush2.bf16.msra.mxu1 %v9496_v1  ;;  %v9538_v1 = vld [vmem:[#allocation4 + $0x2e8] ss:$16 sps:$4 sm:$0xff]  }
 0x22a   :  { %4439 = vmatpush2.bf16.msra.mxu0 %v9499_v3  ;;  %4395 = vmatprep.subr.bf16.mxu1 %v9504_v4  ;;  %v11339_v3 = vcombine.low %v11327_v47, %v11317_v25  ;;  %v9541_v4 = vld [vmem:[#allocation4 + $0x4c8] ss:$16 sps:$4 sm:$0xff]  }
 0x22b   :  { %4440 = vmatprep.subr.bf16.mxu0 %v9507_v10  ;;  %v9546_v10 = vld [vmem:[#allocation4 + $0x2cc] ss:$16 sps:$4 sm:$0xff]  }
 0x22d   :  { %4396 = vmatpush2.bf16.msra.mxu1 %v9502_v7  ;;  %v9549_v7 = vld [vmem:[#allocation4 + $0x4ac] ss:$16 sps:$4 sm:$0xff]  }
 0x22e   :  { %4441 = vmatpush2.bf16.msra.mxu0 %v9505_v15  ;;  %4397 = vmatprep.subr.bf16.mxu1 %v9510_v14  ;;  %v9544_v15 = vld [vmem:[#allocation4 + $0x2c8] ss:$16 sps:$4 sm:$0xff]   ;;  %v9552_v14 = vld [vmem:[#allocation4 + $0x2ac] ss:$16 sps:$4 sm:$0xff]  }
 0x22f   :  { %4442 = vmatprep.subr.bf16.mxu0 %v9513_v16  ;;  %v9550_v16 = vld [vmem:[#allocation4 + $0x2a8] ss:$16 sps:$4 sm:$0xff]  }
 0x231   :  { %4398 = vmatpush2.bf16.msra.mxu1 %v9508_v17  ;;  %v9553_v17 = vld [vmem:[#allocation4 + $0x488] ss:$16 sps:$4 sm:$0xff]  }
 0x232   :  { %4443 = vmatpush2.bf16.msra.mxu0 %v9511_v19  ;;  %4399 = vmatprep.subr.bf16.mxu1 %v9516_v36  ;;  %v9558_v19 = vld [vmem:[#allocation4 + $0x28c] ss:$16 sps:$4 sm:$0xff]  }
 0x233   :  { %4444 = vmatprep.subr.bf16.mxu0 %v9519_v39  ;;  %v9561_v36 = vld [vmem:[#allocation4 + $0x46c] ss:$16 sps:$4 sm:$0xff]   ;;  %v9556_v39 = vld [vmem:[#allocation4 + $0x288] ss:$16 sps:$4 sm:$0xff]  }
 0x235   :  { %4400 = vmatpush2.bf16.msra.mxu1 %v9514_v27  ;;  %v9564_v27 = vld [vmem:[#allocation4 + $0x26c] ss:$16 sps:$4 sm:$0xff]  }
 0x236   :  { %4445 = vmatpush2.bf16.msra.mxu0 %v9517_v52  ;;  %4401 = vmatprep.subr.bf16.mxu1 %v9522_v34  ;;  %v9567_v52 = vld [vmem:[#allocation4 + $0x44c] ss:$16 sps:$4 sm:$0xff]   ;;  %v9562_v34 = vld [vmem:[#allocation4 + $0x268] ss:$16 sps:$4 sm:$0xff]  }
 0x237   :  { %4446 = vmatprep.subr.bf16.mxu0 %v9525_v26  ;;  %v9565_v26 = vld [vmem:[#allocation4 + $0x448] ss:$16 sps:$4 sm:$0xff]  }
 0x239   :  { %4402 = vmatpush2.bf16.msra.mxu1 %v9520_v35  ;;  %v9570_v35 = vld [vmem:[#allocation4 + $0x24c] ss:$16 sps:$4 sm:$0xff]  }
 0x23a   :  { %4447 = vmatpush2.bf16.msra.mxu0 %v9523_v41  ;;  %4403 = vmatprep.subr.bf16.mxu1 %v9528_v18  ;;  %v9573_v41 = vld [vmem:[#allocation4 + $0x42c] ss:$16 sps:$4 sm:$0xff]   ;;  %v9568_v18 = vld [vmem:[#allocation4 + $0x248] ss:$16 sps:$4 sm:$0xff]  }
 0x23b   :  { %4448 = vmatprep.subr.bf16.mxu0 %v9531_v43  ;;  %v9571_v43 = vld [vmem:[#allocation4 + $0x428] ss:$16 sps:$4 sm:$0xff]  }
 0x23d   :  { %4404 = vmatpush2.bf16.msra.mxu1 %v9526_v40  ;;  %v9576_v40 = vld [vmem:[#allocation4 + $0x22c] ss:$16 sps:$4 sm:$0xff]  }
 0x23e   :  { %4449 = vmatpush2.bf16.msra.mxu0 %v9529_v38  ;;  %4405 = vmatprep.subr.bf16.mxu1 %v9534_v29  ;;  %v9579_v38 = vld [vmem:[#allocation4 + $0x40c] ss:$16 sps:$4 sm:$0xff]   ;;  %v9574_v29 = vld [vmem:[#allocation4 + $0x228] ss:$16 sps:$4 sm:$0xff]  }
 0x23f   :  { %4504 = vmatprep.subr.bf16.mxu0 %v9537_v42  ;;  %v9577_v42 = vld [vmem:[#allocation4 + $0x408] ss:$16 sps:$4 sm:$0xff]  }
 0x241   :  { %4406 = vmatpush2.bf16.msra.mxu1 %v9532_v55  ;;  %4451 = vmatmul.mubr.bf16.vlgmr.msra.gmra.mxu0 %v11193_v33  ;;  %v9547_v33 = vld [vmem:[#allocation4 + $0x4a8] ss:$16 sps:$4 sm:$0xff]   ;;  %v9582_v55 = vld [vmem:[#allocation4 + $0x20c] ss:$16 sps:$4 sm:$0xff]  }
 0x242   :  { %4505 = vmatpush1.bf16.msra.mxu0 %v9535_v46  ;;  %4536 = vmatprep.mubr.bf16.mxu0 %v11198_v48  ;;  %v9555_v48 = vld [vmem:[#allocation4 + $0x48c] ss:$16 sps:$4 sm:$0xff]  }
 0x243   :  { %4461 = vmatprep.subr.bf16.mxu1 %v9540_v56  ;;  %4506 = vmatprep.subr.bf16.mxu0 %v9543_v58  ;;  %v9585_v46 = vld [vmem:[#allocation4 + $0x5ec] ss:$16 sps:$4 sm:$0xff]   ;;  %v9580_v56 = vld [vmem:[#allocation4 + $0x208] ss:$16 sps:$4 sm:$0xff]  }
 0x244   :  { %4408 = vmatmul.mubr.bf16.vlgmr.msra.gmra.mxu1 %v11339_v3  ;;  %v9583_v58 = vld [vmem:[#allocation4 + $0x5e8] ss:$16 sps:$4 sm:$0xff]  }
 0x245   :  { %4462 = vmatpush1.bf16.msra.mxu1 %v9538_v1  ;;  %4493 = vmatprep.mubr.bf16.mxu1 %v11288_v0  ;;  %v9559_v0 = vld [vmem:[#allocation4 + $0x468] ss:$16 sps:$4 sm:$0xff]   ;;  %v9588_v1 = vld [vmem:[#allocation4 + $0x3ec] ss:$16 sps:$4 sm:$0xff]  }
 0x246   :  { %4507 = vmatpush1.bf16.msra.mxu0 %v9541_v4  ;;  %4463 = vmatprep.subr.bf16.mxu1 %v9546_v10  ;;  %v9591_v4 = vld [vmem:[#allocation4 + $0x5cc] ss:$16 sps:$4 sm:$0xff]   ;;  %v9586_v10 = vld [vmem:[#allocation4 + $0x3e8] ss:$16 sps:$4 sm:$0xff]  }
 0x247   :  { %4508 = vmatprep.subr.bf16.mxu0 %v9549_v7  ;;  %v9589_v7 = vld [vmem:[#allocation4 + $0x5c8] ss:$16 sps:$4 sm:$0xff]  }
 0x249   :  { %4464 = vmatpush1.bf16.msra.mxu1 %v9544_v15  ;;  %v9594_v15 = vld [vmem:[#allocation4 + $0x3cc] ss:$16 sps:$4 sm:$0xff]  }
 0x24a   :  { %4509 = vmatpush1.bf16.msra.mxu0 %v9547_v33  ;;  %4465 = vmatprep.subr.bf16.mxu1 %v9552_v14  ;;  %v9597_v33 = vld [vmem:[#allocation4 + $0x5ac] ss:$16 sps:$4 sm:$0xff]   ;;  %v9592_v14 = vld [vmem:[#allocation4 + $0x3c8] ss:$16 sps:$4 sm:$0xff]  }
 0x24b   :  { %4510 = vmatprep.subr.bf16.mxu0 %v9555_v48  ;;  %v9595_v48 = vld [vmem:[#allocation4 + $0x5a8] ss:$16 sps:$4 sm:$0xff]  }
 0x24d   :  { %4466 = vmatpush1.bf16.msra.mxu1 %v9550_v16  ;;  %v9600_v16 = vld [vmem:[#allocation4 + $0x3ac] ss:$16 sps:$4 sm:$0xff]  }
 0x24e   :  { %4511 = vmatpush1.bf16.msra.mxu0 %v9553_v17  ;;  %4467 = vmatprep.subr.bf16.mxu1 %v9558_v19  ;;  %v9603_v17 = vld [vmem:[#allocation4 + $0x58c] ss:$16 sps:$4 sm:$0xff]   ;;  %v9598_v19 = vld [vmem:[#allocation4 + $0x3a8] ss:$16 sps:$4 sm:$0xff]  }
 0x24f   :  { %4512 = vmatprep.subr.bf16.mxu0 %v9561_v36  ;;  %v9601_v36 = vld [vmem:[#allocation4 + $0x588] ss:$16 sps:$4 sm:$0xff]  }
 0x251   :  { %4468 = vmatpush1.bf16.msra.mxu1 %v9556_v39  ;;  %v9606_v39 = vld [vmem:[#allocation4 + $0x38c] ss:$16 sps:$4 sm:$0xff]  }
 0x252   :  { %4513 = vmatpush1.bf16.msra.mxu0 %v9559_v0  ;;  %4469 = vmatprep.subr.bf16.mxu1 %v9564_v27  ;;  %v9609_v0 = vld [vmem:[#allocation4 + $0x56c] ss:$16 sps:$4 sm:$0xff]   ;;  %v9604_v27 = vld [vmem:[#allocation4 + $0x388] ss:$16 sps:$4 sm:$0xff]  }
 0x253   :  { %4514 = vmatprep.subr.bf16.mxu0 %v9567_v52  ;;  %v9607_v52 = vld [vmem:[#allocation4 + $0x568] ss:$16 sps:$4 sm:$0xff]  }
 0x255   :  { %4470 = vmatpush1.bf16.msra.mxu1 %v9562_v34  ;;  %v9612_v34 = vld [vmem:[#allocation4 + $0x36c] ss:$16 sps:$4 sm:$0xff]  }
 0x256   :  { %4515 = vmatpush1.bf16.msra.mxu0 %v9565_v26  ;;  %4471 = vmatprep.subr.bf16.mxu1 %v9570_v35  ;;  %v9615_v26 = vld [vmem:[#allocation4 + $0x54c] ss:$16 sps:$4 sm:$0xff]   ;;  %v9610_v35 = vld [vmem:[#allocation4 + $0x368] ss:$16 sps:$4 sm:$0xff]  }
 0x257   :  { %4516 = vmatprep.subr.bf16.mxu0 %v9573_v41  ;;  %v9613_v41 = vld [vmem:[#allocation4 + $0x548] ss:$16 sps:$4 sm:$0xff]  }
 0x259   :  { %4472 = vmatpush1.bf16.msra.mxu1 %v9568_v18  ;;  %v9618_v18 = vld [vmem:[#allocation4 + $0x34c] ss:$16 sps:$4 sm:$0xff]  }
 0x25a   :  { %4517 = vmatpush1.bf16.msra.mxu0 %v9571_v43  ;;  %4473 = vmatprep.subr.bf16.mxu1 %v9576_v40  ;;  %v9621_v43 = vld [vmem:[#allocation4 + $0x52c] ss:$16 sps:$4 sm:$0xff]   ;;  %v9616_v40 = vld [vmem:[#allocation4 + $0x348] ss:$16 sps:$4 sm:$0xff]  }
 0x25b   :  { %4518 = vmatprep.subr.bf16.mxu0 %v9579_v38  ;;  %v9619_v38 = vld [vmem:[#allocation4 + $0x528] ss:$16 sps:$4 sm:$0xff]  }
 0x25d   :  { %4474 = vmatpush1.bf16.msra.mxu1 %v9574_v29  ;;  %v9624_v29 = vld [vmem:[#allocation4 + $0x32c] ss:$16 sps:$4 sm:$0xff]  }
 0x25e   :  { %4519 = vmatpush1.bf16.msra.mxu0 %v9577_v42  ;;  %4475 = vmatprep.subr.bf16.mxu1 %v9582_v55  ;;  %v9627_v42 = vld [vmem:[#allocation4 + $0x50c] ss:$16 sps:$4 sm:$0xff]   ;;  %v9622_v55 = vld [vmem:[#allocation4 + $0x328] ss:$16 sps:$4 sm:$0xff]  }
 0x25f   :  { %4520 = vmatprep.subr.bf16.mxu0 %v9585_v46  ;;  %v9625_v46 = vld [vmem:[#allocation4 + $0x508] ss:$16 sps:$4 sm:$0xff]  }
 0x261   :  { %4476 = vmatpush1.bf16.msra.mxu1 %v9580_v56  ;;  %v9630_v56 = vld [vmem:[#allocation4 + $0x30c] ss:$16 sps:$4 sm:$0xff]  }
 0x262   :  { %4521 = vmatpush2.bf16.msra.mxu0 %v9583_v58  ;;  %4477 = vmatprep.subr.bf16.mxu1 %v9588_v1  ;;  %v9633_v58 = vld [vmem:[#allocation4 + $0x8ec] ss:$16 sps:$4 sm:$0xff]   ;;  %v9628_v1 = vld [vmem:[#allocation4 + $0x308] ss:$16 sps:$4 sm:$0xff]  }
 0x263   :  { %4522 = vmatprep.subr.bf16.mxu0 %v9591_v4  ;;  %v9631_v4 = vld [vmem:[#allocation4 + $0x8e8] ss:$16 sps:$4 sm:$0xff]  }
 0x265   :  { %4478 = vmatpush2.bf16.msra.mxu1 %v9586_v10  ;;  %v9636_v10 = vld [vmem:[#allocation4 + $0x6ec] ss:$16 sps:$4 sm:$0xff]  }
 0x266   :  { %4523 = vmatpush2.bf16.msra.mxu0 %v9589_v7  ;;  %4479 = vmatprep.subr.bf16.mxu1 %v9594_v15  ;;  %v9639_v7 = vld [vmem:[#allocation4 + $0x8cc] ss:$16 sps:$4 sm:$0xff]   ;;  %v9634_v15 = vld [vmem:[#allocation4 + $0x6e8] ss:$16 sps:$4 sm:$0xff]  }
 0x267   :  { %4524 = vmatprep.subr.bf16.mxu0 %v9597_v33  ;;  %v9637_v33 = vld [vmem:[#allocation4 + $0x8c8] ss:$16 sps:$4 sm:$0xff]  }
 0x269   :  { %4480 = vmatpush2.bf16.msra.mxu1 %v9592_v14  ;;  %v9642_v14 = vld [vmem:[#allocation4 + $0x6cc] ss:$16 sps:$4 sm:$0xff]  }
 0x26a   :  { %4525 = vmatpush2.bf16.msra.mxu0 %v9595_v48  ;;  %4481 = vmatprep.subr.bf16.mxu1 %v9600_v16  ;;  %v9645_v48 = vld [vmem:[#allocation4 + $0x8ac] ss:$16 sps:$4 sm:$0xff]   ;;  %v9640_v16 = vld [vmem:[#allocation4 + $0x6c8] ss:$16 sps:$4 sm:$0xff]  }
 0x26b   :  { %4526 = vmatprep.subr.bf16.mxu0 %v9603_v17  ;;  %v9643_v17 = vld [vmem:[#allocation4 + $0x8a8] ss:$16 sps:$4 sm:$0xff]  }
 0x26d   :  { %4482 = vmatpush2.bf16.msra.mxu1 %v9598_v19  ;;  %v9648_v19 = vld [vmem:[#allocation4 + $0x6ac] ss:$16 sps:$4 sm:$0xff]  }
 0x26e   :  { %4527 = vmatpush2.bf16.msra.mxu0 %v9601_v36  ;;  %4483 = vmatprep.subr.bf16.mxu1 %v9606_v39  ;;  %v9646_v36 = vld [vmem:[#allocation4 + $0x6a8] ss:$16 sps:$4 sm:$0xff]   ;;  %v9654_v39 = vld [vmem:[#allocation4 + $0x68c] ss:$16 sps:$4 sm:$0xff]  }
 0x26f   :  { %4528 = vmatprep.subr.bf16.mxu0 %v9609_v0  ;;  %v9657_v0 = vld [vmem:[#allocation4 + $0x86c] ss:$16 sps:$4 sm:$0xff]  }
 0x271   :  { %4484 = vmatpush2.bf16.msra.mxu1 %v9604_v27  ;;  %v9660_v27 = vld [vmem:[#allocation4 + $0x66c] ss:$16 sps:$4 sm:$0xff]  }
 0x272   :  { %4529 = vmatpush2.bf16.msra.mxu0 %v9607_v52  ;;  %4485 = vmatprep.subr.bf16.mxu1 %v9612_v34  ;;  %v9663_v52 = vld [vmem:[#allocation4 + $0x84c] ss:$16 sps:$4 sm:$0xff]   ;;  %v9658_v34 = vld [vmem:[#allocation4 + $0x668] ss:$16 sps:$4 sm:$0xff]  }
 0x273   :  { %4530 = vmatprep.subr.bf16.mxu0 %v9615_v26  ;;  %v9661_v26 = vld [vmem:[#allocation4 + $0x848] ss:$16 sps:$4 sm:$0xff]  }
 0x275   :  { %4486 = vmatpush2.bf16.msra.mxu1 %v9610_v35  ;;  %v9666_v35 = vld [vmem:[#allocation4 + $0x64c] ss:$16 sps:$4 sm:$0xff]  }
 0x276   :  { %4531 = vmatpush2.bf16.msra.mxu0 %v9613_v41  ;;  %4487 = vmatprep.subr.bf16.mxu1 %v9618_v18  ;;  %v9669_v41 = vld [vmem:[#allocation4 + $0x82c] ss:$16 sps:$4 sm:$0xff]   ;;  %v9664_v18 = vld [vmem:[#allocation4 + $0x648] ss:$16 sps:$4 sm:$0xff]  }
 0x277   :  { %4532 = vmatprep.subr.bf16.mxu0 %v9621_v43  ;;  %v9667_v43 = vld [vmem:[#allocation4 + $0x828] ss:$16 sps:$4 sm:$0xff]  }
 0x279   :  { %4488 = vmatpush2.bf16.msra.mxu1 %v9616_v40  ;;  %v9672_v40 = vld [vmem:[#allocation4 + $0x62c] ss:$16 sps:$4 sm:$0xff]  }
 0x27a   :  { %4533 = vmatpush2.bf16.msra.mxu0 %v9619_v38  ;;  %4489 = vmatprep.subr.bf16.mxu1 %v9624_v29  ;;  %v9675_v38 = vld [vmem:[#allocation4 + $0x80c] ss:$16 sps:$4 sm:$0xff]   ;;  %v9670_v29 = vld [vmem:[#allocation4 + $0x628] ss:$16 sps:$4 sm:$0xff]  }
 0x27b   :  { %4534 = vmatprep.subr.bf16.mxu0 %v9627_v42  ;;  %v9673_v42 = vld [vmem:[#allocation4 + $0x808] ss:$16 sps:$4 sm:$0xff]  }
 0x27d   :  { %4490 = vmatpush2.bf16.msra.mxu1 %v9622_v55  ;;  %v9678_v55 = vld [vmem:[#allocation4 + $0x60c] ss:$16 sps:$4 sm:$0xff]  }
 0x27e   :  { %4535 = vmatpush2.bf16.msra.mxu0 %v9625_v46  ;;  %4491 = vmatprep.subr.bf16.mxu1 %v9630_v56  ;;  %v9681_v46 = vld [vmem:[#allocation4 + $0x9ec] ss:$16 sps:$4 sm:$0xff]   ;;  %v9676_v56 = vld [vmem:[#allocation4 + $0x608] ss:$16 sps:$4 sm:$0xff]  }
 0x27f   :  { %4590 = vmatprep.subr.bf16.mxu0 %v9633_v58  ;;  %v9679_v58 = vld [vmem:[#allocation4 + $0x9e8] ss:$16 sps:$4 sm:$0xff]  }
 0x281   :  { %4492 = vmatpush2.bf16.msra.mxu1 %v9628_v1  ;;  %4537 = vmatmul.mubr.bf16.vlgmr.msra.gmra.mxu0 %v11268_v57  ;;  %v9651_v57 = vld [vmem:[#allocation4 + $0x88c] ss:$16 sps:$4 sm:$0xff]  }
 0x282   :  { %4591 = vmatpush1.bf16.msra.mxu0 %v9631_v4  ;;  %4622 = vmatprep.mubr.bf16.mxu0 %v11284_v63  ;;  %v9649_v63 = vld [vmem:[#allocation4 + $0x888] ss:$16 sps:$4 sm:$0xff]   ;;  %v9684_v1 = vld [vmem:[#allocation4 + $0x7ec] ss:$16 sps:$4 sm:$0xff]  }
 0x283   :  { %4547 = vmatprep.subr.bf16.mxu1 %v9636_v10  ;;  %4592 = vmatprep.subr.bf16.mxu0 %v9639_v7  ;;  %v9687_v4 = vld [vmem:[#allocation4 + $0x9cc] ss:$16 sps:$4 sm:$0xff]   ;;  %v9682_v10 = vld [vmem:[#allocation4 + $0x7e8] ss:$16 sps:$4 sm:$0xff]  }
 0x284   :  { %4494 = vmatmul.mubr.bf16.vlgmr.msra.gmra.mxu1 %v11292_v2  ;;  %v9652_v2 = vld [vmem:[#allocation4 + $0x688] ss:$16 sps:$4 sm:$0xff]  }
 0x285   :  { %4548 = vmatpush1.bf16.msra.mxu1 %v9634_v15  ;;  %4579 = vmatprep.mubr.bf16.mxu1 %v11299_v5  ;;  %v9655_v5 = vld [vmem:[#allocation4 + $0x868] ss:$16 sps:$4 sm:$0xff]   ;;  %v9690_v15 = vld [vmem:[#allocation4 + $0x7cc] ss:$16 sps:$4 sm:$0xff]  }
 0x286   :  { %4593 = vmatpush1.bf16.msra.mxu0 %v9637_v33  ;;  %4549 = vmatprep.subr.bf16.mxu1 %v9642_v14  ;;  %v9685_v7 = vld [vmem:[#allocation4 + $0x9c8] ss:$16 sps:$4 sm:$0xff]   ;;  %v9693_v33 = vld [vmem:[#allocation4 + $0x9ac] ss:$16 sps:$4 sm:$0xff]  }
 0x287   :  { %4594 = vmatprep.subr.bf16.mxu0 %v9645_v48  ;;  %v9688_v14 = vld [vmem:[#allocation4 + $0x7c8] ss:$16 sps:$4 sm:$0xff]  }
 0x288   :  { %v9691_v48 = vld [vmem:[#allocation4 + $0x9a8] ss:$16 sps:$4 sm:$0xff]  }
 0x289   :  { %4550 = vmatpush1.bf16.msra.mxu1 %v9640_v16  ;;  %v9696_v16 = vld [vmem:[#allocation4 + $0x7ac] ss:$16 sps:$4 sm:$0xff]  }
 0x28a   :  { %4595 = vmatpush1.bf16.msra.mxu0 %v9643_v17  ;;  %4551 = vmatprep.subr.bf16.mxu1 %v9648_v19  ;;  %v9699_v17 = vld [vmem:[#allocation4 + $0x98c] ss:$16 sps:$4 sm:$0xff]   ;;  %v9694_v19 = vld [vmem:[#allocation4 + $0x7a8] ss:$16 sps:$4 sm:$0xff]  }
 0x28b   :  { %4596 = vmatprep.subr.bf16.mxu0 %v9651_v57  ;;  %v9697_v57 = vld [vmem:[#allocation4 + $0x988] ss:$16 sps:$4 sm:$0xff]  }
 0x28d   :  { %4552 = vmatpush1.bf16.msra.mxu1 %v9646_v36  ;;  %v9702_v36 = vld [vmem:[#allocation4 + $0x78c] ss:$16 sps:$4 sm:$0xff]  }
 0x28e   :  { %4597 = vmatpush1.bf16.msra.mxu0 %v9649_v63  ;;  %4553 = vmatprep.subr.bf16.mxu1 %v9654_v39  ;;  %v9705_v63 = vld [vmem:[#allocation4 + $0x96c] ss:$16 sps:$4 sm:$0xff]   ;;  %v9700_v39 = vld [vmem:[#allocation4 + $0x788] ss:$16 sps:$4 sm:$0xff]  }
 0x28f   :  { %4598 = vmatprep.subr.bf16.mxu0 %v9657_v0  ;;  %v9703_v0 = vld [vmem:[#allocation4 + $0x968] ss:$16 sps:$4 sm:$0xff]  }
 0x291   :  { %4554 = vmatpush1.bf16.msra.mxu1 %v9652_v2  ;;  %v9708_v2 = vld [vmem:[#allocation4 + $0x76c] ss:$16 sps:$4 sm:$0xff]  }
 0x292   :  { %4599 = vmatpush1.bf16.msra.mxu0 %v9655_v5  ;;  %4555 = vmatprep.subr.bf16.mxu1 %v9660_v27  ;;  %v9711_v5 = vld [vmem:[#allocation4 + $0x94c] ss:$16 sps:$4 sm:$0xff]   ;;  %v9706_v27 = vld [vmem:[#allocation4 + $0x768] ss:$16 sps:$4 sm:$0xff]  }
 0x293   :  { %4600 = vmatprep.subr.bf16.mxu0 %v9663_v52  ;;  %v9709_v52 = vld [vmem:[#allocation4 + $0x948] ss:$16 sps:$4 sm:$0xff]  }
 0x295   :  { %4556 = vmatpush1.bf16.msra.mxu1 %v9658_v34  ;;  %v9714_v34 = vld [vmem:[#allocation4 + $0x74c] ss:$16 sps:$4 sm:$0xff]  }
 0x296   :  { %4601 = vmatpush1.bf16.msra.mxu0 %v9661_v26  ;;  %4557 = vmatprep.subr.bf16.mxu1 %v9666_v35  ;;  %v9717_v26 = vld [vmem:[#allocation4 + $0x92c] ss:$16 sps:$4 sm:$0xff]   ;;  %v9712_v35 = vld [vmem:[#allocation4 + $0x748] ss:$16 sps:$4 sm:$0xff]  }
 0x297   :  { %4602 = vmatprep.subr.bf16.mxu0 %v9669_v41  ;;  %v9715_v41 = vld [vmem:[#allocation4 + $0x928] ss:$16 sps:$4 sm:$0xff]  }
 0x299   :  { %4558 = vmatpush1.bf16.msra.mxu1 %v9664_v18  ;;  %v9720_v18 = vld [vmem:[#allocation4 + $0x72c] ss:$16 sps:$4 sm:$0xff]  }
 0x29a   :  { %4603 = vmatpush1.bf16.msra.mxu0 %v9667_v43  ;;  %4559 = vmatprep.subr.bf16.mxu1 %v9672_v40  ;;  %v9723_v43 = vld [vmem:[#allocation4 + $0x90c] ss:$16 sps:$4 sm:$0xff]   ;;  %v9718_v40 = vld [vmem:[#allocation4 + $0x728] ss:$16 sps:$4 sm:$0xff]  }
 0x29b   :  { %4604 = vmatprep.subr.bf16.mxu0 %v9675_v38  ;;  %v9721_v38 = vld [vmem:[#allocation4 + $0x908] ss:$16 sps:$4 sm:$0xff]  }
 0x29d   :  { %4560 = vmatpush1.bf16.msra.mxu1 %v9670_v29  ;;  %v9726_v29 = vld [vmem:[#allocation4 + $0x70c] ss:$16 sps:$4 sm:$0xff]  }
 0x29e   :  { %4605 = vmatpush1.bf16.msra.mxu0 %v9673_v42  ;;  %4561 = vmatprep.subr.bf16.mxu1 %v9678_v55  ;;  %v9750_v42 = vld [vmem:[#allocation6 + $0xe4] ss:$16 sps:$4 sm:$0xff]   ;;  %v9724_v55 = vld [vmem:[#allocation4 + $0x708] ss:$16 sps:$4 sm:$0xff]  }
 0x29f   :  { %4606 = vmatprep.subr.bf16.mxu0 %v9681_v46  ;;  %v9729_v46 = vld [vmem:[#allocation4 + $0xaec] ss:$16 sps:$4 sm:$0xff]  }
 0x2a1   :  { %4562 = vmatpush1.bf16.msra.mxu1 %v9676_v56  ;;  %v9748_v56 = vld [vmem:[#allocation6 + $0xe0] ss:$16 sps:$4 sm:$0xff]  }
 0x2a2   :  { %4607 = vmatpush2.bf16.msra.mxu0 %v9679_v58  ;;  %4563 = vmatprep.subr.bf16.mxu1 %v9684_v1  ;;  %v9756_v58 = vld [vmem:[#allocation6 + $0xc4] ss:$16 sps:$4 sm:$0xff]   ;;  %v9727_v1 = vld [vmem:[#allocation4 + $0xae8] ss:$16 sps:$4 sm:$0xff]  }
 0x2a3   :  { %4608 = vmatprep.subr.bf16.mxu0 %v9687_v4  ;;  %v9732_v4 = vld [vmem:[#allocation4 + $0xacc] ss:$16 sps:$4 sm:$0xff]  }
 0x2a5   :  { %4564 = vmatpush2.bf16.msra.mxu1 %v9682_v10  ;;  %v9754_v10 = vld [vmem:[#allocation6 + $0xc0] ss:$16 sps:$4 sm:$0xff]  }
 0x2a6   :  { %4609 = vmatpush2.bf16.msra.mxu0 %v9685_v7  ;;  %4565 = vmatprep.subr.bf16.mxu1 %v9690_v15  ;;  %v9762_v7 = vld [vmem:[#allocation6 + $0xa4] ss:$16 sps:$4 sm:$0xff]   ;;  %v9730_v15 = vld [vmem:[#allocation4 + $0xac8] ss:$16 sps:$4 sm:$0xff]  }
 0x2a7   :  { %4610 = vmatprep.subr.bf16.mxu0 %v9693_v33  ;;  %v9735_v33 = vld [vmem:[#allocation4 + $0xaac] ss:$16 sps:$4 sm:$0xff]  }
 0x2a9   :  { %4566 = vmatpush2.bf16.msra.mxu1 %v9688_v14  ;;  %v9760_v14 = vld [vmem:[#allocation6 + $0xa0] ss:$16 sps:$4 sm:$0xff]  }
 0x2aa   :  { %4611 = vmatpush2.bf16.msra.mxu0 %v9691_v48  ;;  %4567 = vmatprep.subr.bf16.mxu1 %v9696_v16  ;;  %v9768_v48 = vld [vmem:[#allocation6 + $0x84] ss:$16 sps:$4 sm:$0xff]   ;;  %v9738_v16 = vld [vmem:[#allocation4 + $0xa8c] ss:$16 sps:$4 sm:$0xff]  }
 0x2ab   :  { %4612 = vmatprep.subr.bf16.mxu0 %v9699_v17  ;;  %v9766_v17 = vld [vmem:[#allocation6 + $0x80] ss:$16 sps:$4 sm:$0xff]  }
 0x2ad   :  { %4568 = vmatpush2.bf16.msra.mxu1 %v9694_v19  ;;  %v9774_v19 = vld [vmem:[#allocation6 + $0x64] ss:$16 sps:$4 sm:$0xff]  }
 0x2ae   :  { %4613 = vmatpush2.bf16.msra.mxu0 %v9697_v57  ;;  %4569 = vmatprep.subr.bf16.mxu1 %v9702_v36  ;;  %v9741_v57 = vld [vmem:[#allocation4 + $0xa6c] ss:$16 sps:$4 sm:$0xff]   ;;  %v9780_v36 = vld [vmem:[#allocation6 + $0x44] ss:$16 sps:$4 sm:$0xff]  }
 0x2af   :  { %4614 = vmatprep.subr.bf16.mxu0 %v9705_v63  ;;  %v9739_v63 = vld [vmem:[#allocation4 + $0xa68] ss:$16 sps:$4 sm:$0xff]  }
 0x2b1   :  { %4570 = vmatpush2.bf16.msra.mxu1 %v9700_v39  ;;  %v9744_v39 = vld [vmem:[#allocation4 + $0xa4c] ss:$16 sps:$4 sm:$0xff]  }
 0x2b2   :  { %4615 = vmatpush2.bf16.msra.mxu0 %v9703_v0  ;;  %4571 = vmatprep.subr.bf16.mxu1 %v9708_v2  ;;  %v9778_v0 = vld [vmem:[#allocation6 + $0x40] ss:$16 sps:$4 sm:$0xff]   ;;  %v9786_v2 = vld [vmem:[#allocation6 + $0x24] ss:$16 sps:$4 sm:$0xff]  }
 0x2b3   :  { %4616 = vmatprep.subr.bf16.mxu0 %v9711_v5  ;;  %v9742_v5 = vld [vmem:[#allocation4 + $0xa48] ss:$16 sps:$4 sm:$0xff]  }
 0x2b5   :  { %4572 = vmatpush2.bf16.msra.mxu1 %v9706_v27  ;;  %v9747_v27 = vld [vmem:[#allocation4 + $0xa2c] ss:$16 sps:$4 sm:$0xff]  }
 0x2b6   :  { %4617 = vmatpush2.bf16.msra.mxu0 %v9709_v52  ;;  %4573 = vmatprep.subr.bf16.mxu1 %v9714_v34  ;;  %v9784_v52 = vld [vmem:[#allocation6 + $0x20] ss:$16 sps:$4 sm:$0xff]   ;;  %v9792_v34 = vld [vmem:[#allocation6 + $0x4] ss:$16 sps:$4 sm:$0xff]  }
 0x2b7   :  { %4618 = vmatprep.subr.bf16.mxu0 %v9717_v26  ;;  %v9745_v26 = vld [vmem:[#allocation4 + $0xa28] ss:$16 sps:$4 sm:$0xff]  }
 0x2b9   :  { %4574 = vmatpush2.bf16.msra.mxu1 %v9712_v35  ;;  %v9753_v35 = vld [vmem:[#allocation4 + $0xa0c] ss:$16 sps:$4 sm:$0xff]  }
 0x2ba   :  { %4619 = vmatpush2.bf16.msra.mxu0 %v9715_v41  ;;  %4575 = vmatprep.subr.bf16.mxu1 %v9720_v18  ;;  %v9790_v41 = vld [vmem:[#allocation6] ss:$16 sps:$4 sm:$0xff]   ;;  %v9798_v18 = vld [vmem:[#allocation6 + $0x1e4] ss:$16 sps:$4 sm:$0xff]  }
 0x2bb   :  { %4620 = vmatprep.subr.bf16.mxu0 %v9723_v43  ;;  %v9751_v43 = vld [vmem:[#allocation4 + $0xa08] ss:$16 sps:$4 sm:$0xff]  }
 0x2bd   :  { %4576 = vmatpush2.bf16.msra.mxu1 %v9718_v40  ;;  %v9759_v40 = vld [vmem:[#allocation4 + $0xbec] ss:$16 sps:$4 sm:$0xff]  }
 0x2be   :  { %4621 = vmatpush2.bf16.msra.mxu0 %v9721_v38  ;;  %4577 = vmatprep.subr.bf16.mxu1 %v9726_v29  ;;  %v9796_v38 = vld [vmem:[#allocation6 + $0x1e0] ss:$16 sps:$4 sm:$0xff]   ;;  %v9804_v29 = vld [vmem:[#allocation6 + $0x1c4] ss:$16 sps:$4 sm:$0xff]  }
 0x2bf   :  { %7253 = vmatprep.subr.bf16.mxu0 %v9750_v42  ;;  %v4194_v42 = vpop.f32.mrf.mxu0 }
 0x2c1   :  { %4578 = vmatpush2.bf16.msra.mxu1 %v9724_v55  ;;  %4623 = vmatmul.mubr.bf16.vlgmr.msra.gmra.mxu0 %v11313_v49  ;;  %v9733_v49 = vld [vmem:[#allocation4 + $0xaa8] ss:$16 sps:$4 sm:$0xff]  }
 0x2c2   :  { %4633 = vmatprep.subr.bf16.mxu1 %v9729_v46  ;;  %7254 = vmatpush1.bf16.msra.mxu0 %v9748_v56  ;;  %v9757_v55 = vld [vmem:[#allocation4 + $0xbe8] ss:$16 sps:$4 sm:$0xff]   ;;  %v9765_v46 = vld [vmem:[#allocation4 + $0xbcc] ss:$16 sps:$4 sm:$0xff]   ;;  %v9802_v56 = vld [vmem:[#allocation6 + $0x1c0] ss:$16 sps:$4 sm:$0xff]  }
 0x2c3   :  { %7255 = vmatprep.subr.bf16.mxu0 %v9756_v58  ;;  %v9807_v58 = vld [vmem:[#allocation6 + $0x1a4] ss:$16 sps:$4 sm:$0xff]  }
 0x2c4   :  { %4580 = vmatmul.mubr.bf16.vlgmr.msra.gmra.mxu1 %v11323_v32  ;;  %v9736_v32 = vld [vmem:[#allocation4 + $0xa88] ss:$16 sps:$4 sm:$0xff]  }
 0x2c5   :  { %4634 = vmatpush1.bf16.msra.mxu1 %v9727_v1  ;;  %4665 = vmatprep.mubr.bf16.mxu1 %v11331_v50  ;;  %v9772_v50 = vld [vmem:[#allocation6 + $0x60] ss:$16 sps:$4 sm:$0xff]   ;;  %v4196_v1 = vpop.f32.mrf.mxu0 }
 0x2c6   :  { %4635 = vmatprep.subr.bf16.mxu1 %v9732_v4  ;;  %7256 = vmatpush1.bf16.msra.mxu0 %v9754_v10  ;;  %v9763_v4 = vld [vmem:[#allocation4 + $0xbc8] ss:$16 sps:$4 sm:$0xff]   ;;  %v9771_v10 = vld [vmem:[#allocation4 + $0xbac] ss:$16 sps:$4 sm:$0xff]  }
 0x2c7   :  { %7257 = vmatprep.subr.bf16.mxu0 %v9762_v7  ;;  %v9805_v7 = vld [vmem:[#allocation6 + $0x1a0] ss:$16 sps:$4 sm:$0xff]  }
 0x2c9   :  { %4636 = vmatpush1.bf16.msra.mxu1 %v9730_v15  ;;  %v9810_v15 = vld [vmem:[#allocation6 + $0x184] ss:$16 sps:$4 sm:$0xff]  }
 0x2ca   :  { %4637 = vmatprep.subr.bf16.mxu1 %v9735_v33  ;;  %7258 = vmatpush1.bf16.msra.mxu0 %v9760_v14  ;;  %v4198_v33 = vpop.f32.mrf.mxu0  ;;  %v4237_v14 = vpop.f32.mrf.mxu1 }
 0x2cb   :  { %7259 = vmatprep.subr.bf16.mxu0 %v9768_v48  ;;  %v9769_v48 = vld [vmem:[#allocation4 + $0xba8] ss:$16 sps:$4 sm:$0xff]  }
 0x2cd   :  { %4638 = vmatpush1.bf16.msra.mxu1 %v9733_v49  ;;  %v9777_v49 = vld [vmem:[#allocation4 + $0xb8c] ss:$16 sps:$4 sm:$0xff]  }
 0x2ce   :  { %4639 = vmatprep.subr.bf16.mxu1 %v9738_v16  ;;  %7260 = vmatpush1.bf16.msra.mxu0 %v9766_v17  ;;  %v9808_v16 = vld [vmem:[#allocation6 + $0x180] ss:$16 sps:$4 sm:$0xff]   ;;  %v9813_v17 = vld [vmem:[#allocation6 + $0x164] ss:$16 sps:$4 sm:$0xff]  }
 0x2cf   :  { %7261 = vmatprep.subr.bf16.mxu0 %v9774_v19  ;;  %v4200_v19 = vpop.f32.mrf.mxu0 }
 0x2d1   :  { %4640 = vmatpush1.bf16.msra.mxu1 %v9736_v32  ;;  %v4239_v32 = vpop.f32.mrf.mxu1 }
 0x2d2   :  { %4641 = vmatprep.subr.bf16.mxu1 %v9741_v57  ;;  %7262 = vmatpush1.bf16.msra.mxu0 %v9772_v50  ;;  %v9775_v57 = vld [vmem:[#allocation4 + $0xb88] ss:$16 sps:$4 sm:$0xff]   ;;  %v4280_v50 = vpop.f32.mrf.mxu0 }
 0x2d3   :  { %7263 = vmatprep.subr.bf16.mxu0 %v9780_v36  ;;  %v9783_v36 = vld [vmem:[#allocation4 + $0xb6c] ss:$16 sps:$4 sm:$0xff]  }
 0x2d5   :  { %4642 = vmatpush1.bf16.msra.mxu1 %v9739_v63  ;;  %v9811_v63 = vld [vmem:[#allocation6 + $0x160] ss:$16 sps:$4 sm:$0xff]  }
 0x2d6   :  { %4643 = vmatprep.subr.bf16.mxu1 %v9744_v39  ;;  %7264 = vmatpush1.bf16.msra.mxu0 %v9778_v0  ;;  %v9816_v39 = vld [vmem:[#allocation6 + $0x144] ss:$16 sps:$4 sm:$0xff]   ;;  %v4241_v0 = vpop.f32.mrf.mxu1 }
 0x2d7   :  { %7265 = vmatprep.subr.bf16.mxu0 %v9786_v2  ;;  %v9781_v2 = vld [vmem:[#allocation4 + $0xb68] ss:$16 sps:$4 sm:$0xff]  }
 0x2d9   :  { %4644 = vmatpush1.bf16.msra.mxu1 %v9742_v5  ;;  %v4282_v5 = vpop.f32.mrf.mxu0 }
 0x2da   :  { %4645 = vmatprep.subr.bf16.mxu1 %v9747_v27  ;;  %7266 = vmatpush1.bf16.msra.mxu0 %v9784_v52  ;;  %v9789_v27 = vld [vmem:[#allocation4 + $0xb4c] ss:$16 sps:$4 sm:$0xff]   ;;  %v9814_v52 = vld [vmem:[#allocation6 + $0x140] ss:$16 sps:$4 sm:$0xff]  }
 0x2db   :  { %7267 = vmatprep.subr.bf16.mxu0 %v9792_v34  ;;  %v9819_v34 = vld [vmem:[#allocation6 + $0x124] ss:$16 sps:$4 sm:$0xff]  }
 0x2dd   :  { %4646 = vmatpush1.bf16.msra.mxu1 %v9745_v26  ;;  %v4243_v26 = vpop.f32.mrf.mxu1 }
 0x2de   :  { %4647 = vmatprep.subr.bf16.mxu1 %v9753_v35  ;;  %7268 = vmatpush1.bf16.msra.mxu0 %v9790_v41  ;;  %v9787_v35 = vld [vmem:[#allocation4 + $0xb48] ss:$16 sps:$4 sm:$0xff]   ;;  %v4284_v41 = vpop.f32.mrf.mxu0 }
 0x2df   :  { %7269 = vmatprep.subr.bf16.mxu0 %v9798_v18  ;;  %v4323_v18 = vpop.f32.mrf.mxu1 }
 0x2e1   :  { %4648 = vmatpush1.bf16.msra.mxu1 %v9751_v43  ;;  %v9795_v43 = vld [vmem:[#allocation4 + $0xb2c] ss:$16 sps:$4 sm:$0xff]  }
 0x2e2   :  { %4649 = vmatprep.subr.bf16.mxu1 %v9759_v40  ;;  %7270 = vmatpush2.bf16.msra.mxu0 %v9796_v38  ;;  %v9817_v40 = vld [vmem:[#allocation6 + $0x120] ss:$16 sps:$4 sm:$0xff]   ;;  %v9822_v38 = vld [vmem:[#allocation6 + $0x104] ss:$16 sps:$4 sm:$0xff]  }
 0x2e3   :  { %7271 = vmatprep.subr.bf16.mxu0 %v9804_v29  ;;  %v4238_v29 = vadd.f32 %v4237_v14, %v4194_v42  ;;  %v4244_v14 = vadd.f32 %v4243_v26, %v4200_v19 }
 0x2e5   :  { %4650 = vmatpush2.bf16.msra.mxu1 %v9757_v55  ;;  %v9793_v55 = vld [vmem:[#allocation4 + $0xb28] ss:$16 sps:$4 sm:$0xff]  }
 0x2e6   :  { %4651 = vmatprep.subr.bf16.mxu1 %v9765_v46  ;;  %7272 = vmatpush2.bf16.msra.mxu0 %v9802_v56  ;;  %v4286_v46 = vpop.f32.mrf.mxu0  ;;  %v4325_v56 = vpop.f32.mrf.mxu1 }
 0x2e7   :  { %7273 = vmatprep.subr.bf16.mxu0 %v9807_v58  ;;  %v9801_v58 = vld [vmem:[#allocation4 + $0xb0c] ss:$16 sps:$4 sm:$0xff]  }
 0x2e9   :  { %4652 = vmatpush2.bf16.msra.mxu1 %v9763_v4  ;;  %v9820_v4 = vld [vmem:[#allocation6 + $0x100] ss:$16 sps:$4 sm:$0xff]  }
 0x2ea   :  { %4653 = vmatprep.subr.bf16.mxu1 %v9771_v10  ;;  %7274 = vmatpush2.bf16.msra.mxu0 %v9805_v7  ;;  %v4240_v10 = vadd.f32 %v4239_v32, %v4196_v1  ;;  %v11350_v7 = vld [vmem:[#allocation8 + $0x8] sm:$0xff] }
 0x2eb   :  { %7275 = vmatprep.subr.bf16.mxu0 %v9810_v15  ;;  %v9825_v15 = vld [vmem:[#allocation6 + $0x4e4] ss:$16 sps:$4 sm:$0xff]   ;;  %v4680_v42 = vrot.slane %v11350_v7, %v11126_v51  ;;  %v4724_v32 = vrot.slane %v11350_v7, %v11131_v30  ;;  %v4728_v19 = vrot.slane %v11350_v7, %v11139_v54 }
 0x2ed   :  { %4654 = vmatpush2.bf16.msra.mxu1 %v9769_v48  ;;  %v4366_v48 = vpop.f32.mrf.mxu0 }
 0x2ee   :  { %4655 = vmatprep.subr.bf16.mxu1 %v9777_v49  ;;  %7276 = vmatpush2.bf16.msra.mxu0 %v9808_v16  ;;  %v4242_v49 = vadd.f32 %v4241_v0, %v4198_v33  ;;  %v4281_v16 = vadd.f32 %v4280_v50, %v4238_v29  ;;  %v4684_v33 = vrot.slane %v11350_v7, %v11134_v37 }
 0x2ef   :  { %7277 = vmatprep.subr.bf16.mxu0 %v9813_v17  ;;  %v9799_v17 = vld [vmem:[#allocation4 + $0xb08] ss:$16 sps:$4 sm:$0xff]   ;;  %v4368_v1 = vpop.f32.mrf.mxu0  ;;  %v4700_v0 = vrot.slane %v4680_v42, %v11126_v51 }
 0x2f1   :  { %4656 = vmatpush2.bf16.msra.mxu1 %v9775_v57  ;;  %v4327_v57 = vpop.f32.mrf.mxu1 }
 0x2f2   :  { %4657 = vmatprep.subr.bf16.mxu1 %v9783_v36  ;;  %7278 = vmatpush2.bf16.msra.mxu0 %v9811_v63  ;;  %v4324_v36 = vadd.f32 %v4323_v18, %v4281_v16  ;;  %v4283_v63 = vadd.f32 %v4282_v5, %v4240_v10  ;;  %v4370_v5 = vpop.f32.mrf.mxu0 }
 0x2f3   :  { %7279 = vmatprep.subr.bf16.mxu0 %v9816_v39  ;;  %v4329_v50 = vpop.f32.mrf.mxu1 }
 0x2f4   :  { %v4326_v39 = vadd.f32 %v4325_v56, %v4283_v63 }
 0x2f5   :  { %4658 = vmatpush2.bf16.msra.mxu1 %v9781_v2  ;;  %v4285_v2 = vadd.f32 %v4284_v41, %v4242_v49 }
 0x2f6   :  { %4659 = vmatprep.subr.bf16.mxu1 %v9789_v27  ;;  %7280 = vmatpush2.bf16.msra.mxu0 %v9814_v52  ;;  %v4287_v52 = vadd.f32 %v4286_v46, %v4244_v14  ;;  %v4748_v46 = vrot.slane %v4728_v19, %v11131_v30 }
 0x2f7   :  { %7281 = vmatprep.subr.bf16.mxu0 %v9819_v34  ;;  %v4328_v27 = vadd.f32 %v4327_v57, %v4285_v2  ;;  %v4367_v34 = vadd.f32 %v4366_v48, %v4324_v36 }
 0x2f8   :  { %v4330_v41 = vadd.f32 %v4329_v50, %v4287_v52 }
 0x2f9   :  { %4660 = vmatpush2.bf16.msra.mxu1 %v9787_v35  ;;  %v4744_v35 = vrot.slane %v4724_v32, %v11131_v30  ;;  %v4371_v56 = vadd.f32 %v4370_v5, %v4328_v27 }
 0x2fa   :  { %4661 = vmatprep.subr.bf16.mxu1 %v9795_v43  ;;  %7282 = vmatpush2.bf16.msra.mxu0 %v9817_v40  ;;  %v4369_v43 = vadd.f32 %v4368_v1, %v4326_v39  ;;  %v4704_v40 = vrot.slane %v4684_v33, %v11126_v51 }
 0x2fb   :  { %7283 = vmatprep.subr.bf16.mxu0 %v9822_v38 }
 0x2fd   :  { %4662 = vmatpush2.bf16.msra.mxu1 %v9793_v55 }
 0x2fe   :  { %4663 = vmatprep.subr.bf16.mxu1 %v9801_v58  ;;  %7284 = vmatpush2.bf16.msra.mxu0 %v9820_v4  ;;  %v4372_v58 = vpop.f32.mrf.mxu0 }
 0x2ff   :  { %7339 = vmatprep.subr.bf16.mxu0 %v9825_v15  ;;  %v4373_v49 = vadd.f32 %v4372_v58, %v4330_v41 }
 0x301   :  { %4664 = vmatpush2.bf16.msra.mxu1 %v9799_v17 }
 0x304   :  { %v4409_v26 = vpop.f32.mrf.mxu1  ;;  %4666 = vmatmul.mubr.bf16.vlgmr.msra.gmra.mxu1 %v11339_v3 }
 0x305   :  { %v4410_v18 = vadd.f32 %v4409_v26, %v4367_v34 }
 0x306   :  { %v4411_v38 = vpop.f32.mrf.mxu1 }
 0x307   :  { %v4713_v29 = vmul.f32 %v4700_v0, %v4410_v18  ;;  %v4412_v55 = vadd.f32 %v4411_v38, %v4369_v43 }
 0x308   :  { %v4413_v4 = vpop.f32.mrf.mxu1 }
 0x309   :  { %v4757_v10 = vadd.f32 %v4744_v35, %v4713_v29  ;;  %v4714_v15 = vmul.f32 %v4704_v40, %v4412_v55  ;;  %v4414_v48 = vadd.f32 %v4413_v4, %v4371_v56 }
 0x30a   :  { %v4415_v16 = vpop.f32.mrf.mxu1 }
 0x30b   :  { %v4758_v17 = vadd.f32 %v4748_v46, %v4714_v15  ;;  %v4717_v3 = vmul.f32 %v4700_v0, %v4414_v48  ;;  %v4416_v57 = vadd.f32 %v4415_v16, %v4373_v49  ;;  %v4765_v42 = vmax.f32 %v4757_v10, 0.0  ;;  %v9823_v15 = vld [vmem:[#allocation6 + $0x4e0] ss:$16 sps:$4 sm:$0xff]   ;;  %v9921_v49 = vld [vmem:[#allocation6 + $0x2e4] ss:$16 sps:$4 sm:$0xff]  }
 0x30c   :  { %v9919_v48 = vld [vmem:[#allocation6 + $0x2e0] ss:$16 sps:$4 sm:$0xff]   ;;  %v9828_v16 = vld [vmem:[#allocation6 + $0x4c4] ss:$16 sps:$4 sm:$0xff]   ;;  %7296 = vmatprep.subr.bf16.mxu1 %v9921_v49 }
 0x30d   :  { %v4766_v14 = vmax.f32 %v4758_v17, 0.0  ;;  %v4761_v36 = vadd.f32 %v4744_v35, %v4717_v3  ;;  %v4718_v63 = vmul.f32 %v4704_v40, %v4416_v57  ;;  %7297 = vmatpush1.bf16.msra.mxu1 %v9919_v48  ;;  %v9969_v48 = vld [vmem:[#allocation6 + $0x3e4] ss:$16 sps:$4 sm:$0xff]  }
 0x30e   :  { %v9852_v49 = vld [vmem:[#allocation6 + $0x5c4] ss:$16 sps:$4 sm:$0xff]  }
 0x30f   :  { %v8890_v1 = vpack.c.bf16 %v4766_v14, %v4765_v42  ;;  %v4769_v32 = vmax.f32 %v4761_v36, 0.0  ;;  %v4762_v39 = vadd.f32 %v4748_v46, %v4718_v63  ;;  %v9927_v36 = vld [vmem:[#allocation6 + $0x2c4] ss:$16 sps:$4 sm:$0xff]   ;;  %v9931_v63 = vld [vmem:[#allocation6 + $0x2a0] ss:$16 sps:$4 sm:$0xff]  }
 0x310   :  { %7298 = vmatprep.subr.bf16.mxu1 %v9927_v36  ;;  %v9858_v36 = vld [vmem:[#allocation6 + $0x584] ss:$16 sps:$4 sm:$0xff]  }
 0x311   :  { %v4802_v2 = vshrl.u32 %v8890_v1, 16  ;;  %v4805_v33 = vshll.u32 %v8890_v1, 16  ;;  %v11365_v50 = vpack.c.bf16 %v4769_v32, %v4765_v42  ;;  %v4770_v27 = vmax.f32 %v4762_v39, 0.0  ;;  %v9925_v42 = vld [vmem:[#allocation6 + $0x2c0] ss:$16 sps:$4 sm:$0xff]  }
 0x312   :  { %7299 = vmatpush1.bf16.msra.mxu1 %v9925_v42  ;;  %v9933_v1 = vld [vmem:[#allocation6 + $0x2a4] ss:$16 sps:$4 sm:$0xff]   ;;  %v9832_v39 = vld [vmem:[#allocation6 + $0x480] ss:$16 sps:$4 sm:$0xff]  }
 0x313   :  { %v4804_v52 = vrot.slane %v4802_v2, 7  ;;  %v4823_v34 = vrot.slane %v4802_v2, 4  ;;  %v4824_v19 = vrot.slane %v4805_v33, 5  ;;  %v8892_v5 = vpack.c.bf16 %v4770_v27, %v4769_v32  ;;  %v9834_v32 = vld [vmem:[#allocation6 + $0x484] ss:$16 sps:$4 sm:$0xff]   ;;  %7300 = vmatprep.subr.bf16.mxu1 %v9933_v1 }
 0x314   :  { %v9937_v2 = vld [vmem:[#allocation6 + $0x280] ss:$16 sps:$4 sm:$0xff]   ;;  %v9861_v1 = vld [vmem:[#allocation6 + $0x564] ss:$16 sps:$4 sm:$0xff]  }
 0x315   :  { %v4840_v26 = vshrl.u32 %v8892_v5, 16  ;;  %v4843_v41 = vshll.u32 %v8892_v5, 16  ;;  %v4825_v0 = vor.u32 %v4824_v19, %v4823_v34  ;;  %v4807_v35 = vor.u32 %v4805_v33, %v4804_v52  ;;  %v9939_v33 = vld [vmem:[#allocation6 + $0x284] ss:$16 sps:$4 sm:$0xff]   ;;  %v9835_v52 = vld [vmem:[#allocation6 + $0x460] ss:$16 sps:$4 sm:$0xff]  }
 0x316   :  { %7301 = vmatpush1.bf16.msra.mxu1 %v9931_v63  ;;  %v9943_v34 = vld [vmem:[#allocation6 + $0x260] ss:$16 sps:$4 sm:$0xff]   ;;  %v9945_v19 = vld [vmem:[#allocation6 + $0x264] ss:$16 sps:$4 sm:$0xff]  }
 0x317   :  { %v4842_v18 = vrot.slane %v4840_v26, 7  ;;  %v4861_v43 = vrot.slane %v4840_v26, 4  ;;  %v4862_v38 = vrot.slane %v4843_v41, 5  ;;  %v4826_v29 = vrot.slane %v4825_v0, 4  ;;  %7302 = vmatprep.subr.bf16.mxu1 %v9939_v33  ;;  %v9840_v5 = vld [vmem:[#allocation6 + $0x444] ss:$16 sps:$4 sm:$0xff]  }
 0x318   :  { %v4818_v46 = vsel %vm10643_vm6, %v4807_v35, %v11181_v44  ;;  %v9838_v26 = vld [vmem:[#allocation6 + $0x440] ss:$16 sps:$4 sm:$0xff]   ;;  %v9951_v0 = vld [vmem:[#allocation6 + $0x244] ss:$16 sps:$4 sm:$0xff]  }
 0x319   :  { %v4845_v40 = vor.u32 %v4843_v41, %v4842_v18  ;;  %v4863_v55 = vor.u32 %v4862_v38, %v4861_v43  ;;  %v4834_v17 = vsel %vm10701_vm11, %v4826_v29, %v11272_v59  ;;  %v9826_v59 = vld [vmem:[#allocation6 + $0x4c0] ss:$16 sps:$4 sm:$0xff]   ;;  %v9843_v18 = vld [vmem:[#allocation6 + $0x424] ss:$16 sps:$4 sm:$0xff]  }
 0x31a   :  { %7303 = vmatpush1.bf16.msra.mxu1 %v9937_v2  ;;  %v9949_v41 = vld [vmem:[#allocation6 + $0x240] ss:$16 sps:$4 sm:$0xff]   ;;  %v9957_v35 = vld [vmem:[#allocation6 + $0x224] ss:$16 sps:$4 sm:$0xff]  }
 0x31b   :  { %v4856_v56 = vsel %vm10643_vm6, %v4845_v40, %v11185_v45  ;;  %v4864_v58 = vrot.slane %v4863_v55, 4  ;;  %v11384_v45 = vpack.c.bf16 %v4770_v27, %v4766_v14  ;;  %v9829_v14 = vld [vmem:[#allocation6 + $0x4a0] ss:$16 sps:$4 sm:$0xff]   ;;  %v9837_v27 = vld [vmem:[#allocation6 + $0x464] ss:$16 sps:$4 sm:$0xff]   ;;  %7304 = vmatprep.subr.bf16.mxu1 %v9945_v19 }
 0x31c   :  { %v11373_v4 = vcombine.low %v4818_v46, %v4856_v56  ;;  %v11375_v10 = vcombine.high %v4818_v46, %v4856_v56  ;;  %v9841_v43 = vld [vmem:[#allocation6 + $0x420] ss:$16 sps:$4 sm:$0xff]   ;;  %v9846_v40 = vld [vmem:[#allocation6 + $0x404] ss:$16 sps:$4 sm:$0xff]  }
 0x31d   :  { %v4872_v44 = vsel %vm10701_vm11, %v4864_v58, %v11262_v53  ;;  %v9831_v53 = vld [vmem:[#allocation6 + $0x4a4] ss:$16 sps:$4 sm:$0xff]   ;;  %v9955_v38 = vld [vmem:[#allocation6 + $0x220] ss:$16 sps:$4 sm:$0xff]  }
 0x31e   :  { %7285 = vmatprep.mubr.bf16.mxu0 %v11375_v10  ;;  %v11386_v3 = vcombine.low %v4834_v17, %v4872_v44  ;;  %v11388_v57 = vcombine.high %v4834_v17, %v4872_v44  ;;  %7305 = vmatpush1.bf16.msra.mxu1 %v9943_v34  ;;  %v9844_v29 = vld [vmem:[#allocation6 + $0x400] ss:$16 sps:$4 sm:$0xff]   ;;  %v9963_v46 = vld [vmem:[#allocation6 + $0x204] ss:$16 sps:$4 sm:$0xff]  }
 0x31f   :  { %7286 = vmatmul.mubr.bf16.vlgmr.msra.gmra.mxu0 %v11373_v4  ;;  %7306 = vmatprep.subr.bf16.mxu1 %v9951_v0  ;;  %v9961_v55 = vld [vmem:[#allocation6 + $0x200] ss:$16 sps:$4 sm:$0xff]   ;;  %v9849_v56 = vld [vmem:[#allocation6 + $0x5e4] ss:$16 sps:$4 sm:$0xff]  }
 0x320   :  { %7340 = vmatpush1.bf16.msra.mxu0 %v9823_v15  ;;  %7371 = vmatprep.mubr.bf16.mxu0 %v11384_v45  ;;  %v9847_v58 = vld [vmem:[#allocation6 + $0x5e0] ss:$16 sps:$4 sm:$0xff]   ;;  %v9975_v44 = vld [vmem:[#allocation6 + $0x3c4] ss:$16 sps:$4 sm:$0xff]  }
 0x321   :  { %7341 = vmatprep.subr.bf16.mxu0 %v9828_v16  ;;  %v9967_v15 = vld [vmem:[#allocation6 + $0x3e0] ss:$16 sps:$4 sm:$0xff]   ;;  %v9864_v33 = vld [vmem:[#allocation6 + $0x544] ss:$16 sps:$4 sm:$0xff]  }
 0x322   :  { %7307 = vmatpush1.bf16.msra.mxu1 %v9949_v41  ;;  %v9850_v16 = vld [vmem:[#allocation6 + $0x5c0] ss:$16 sps:$4 sm:$0xff]   ;;  %v9867_v19 = vld [vmem:[#allocation6 + $0x524] ss:$16 sps:$4 sm:$0xff]  }
 0x323   :  { %7308 = vmatprep.subr.bf16.mxu1 %v9957_v35  ;;  %v9973_v17 = vld [vmem:[#allocation6 + $0x3c0] ss:$16 sps:$4 sm:$0xff]   ;;  %v9870_v0 = vld [vmem:[#allocation6 + $0x504] ss:$16 sps:$4 sm:$0xff]  }
 0x324   :  { %7342 = vmatpush1.bf16.msra.mxu0 %v9826_v59  ;;  %v9855_v59 = vld [vmem:[#allocation6 + $0x5a4] ss:$16 sps:$4 sm:$0xff]   ;;  %v9853_v42 = vld [vmem:[#allocation6 + $0x5a0] ss:$16 sps:$4 sm:$0xff]  }
 0x325   :  { %7343 = vmatprep.subr.bf16.mxu0 %v9831_v53  ;;  %v9981_v53 = vld [vmem:[#allocation6 + $0x3a4] ss:$16 sps:$4 sm:$0xff]   ;;  %v9856_v63 = vld [vmem:[#allocation6 + $0x580] ss:$16 sps:$4 sm:$0xff]  }
 0x326   :  { %7309 = vmatpush1.bf16.msra.mxu1 %v9955_v38  ;;  %v9859_v2 = vld [vmem:[#allocation6 + $0x560] ss:$16 sps:$4 sm:$0xff]  }
 0x327   :  { %7310 = vmatprep.subr.bf16.mxu1 %v9963_v46  ;;  %v9862_v34 = vld [vmem:[#allocation6 + $0x540] ss:$16 sps:$4 sm:$0xff]   ;;  %v9876_v46 = vld [vmem:[#allocation6 + $0x8c4] ss:$16 sps:$4 sm:$0xff]  }
 0x328   :  { %7344 = vmatpush1.bf16.msra.mxu0 %v9829_v14  ;;  %v9979_v14 = vld [vmem:[#allocation6 + $0x3a0] ss:$16 sps:$4 sm:$0xff]  }
 0x329   :  { %7345 = vmatprep.subr.bf16.mxu0 %v9834_v32  ;;  %v9987_v32 = vld [vmem:[#allocation6 + $0x384] ss:$16 sps:$4 sm:$0xff]   ;;  %v9865_v41 = vld [vmem:[#allocation6 + $0x520] ss:$16 sps:$4 sm:$0xff]  }
 0x32a   :  { %7311 = vmatpush1.bf16.msra.mxu1 %v9961_v55  ;;  %v9868_v38 = vld [vmem:[#allocation6 + $0x500] ss:$16 sps:$4 sm:$0xff]  }
 0x32b   :  { %7312 = vmatprep.subr.bf16.mxu1 %v9969_v48  ;;  %v10009_v35 = vld [vmem:[#allocation6 + $0x300] ss:$16 sps:$4 sm:$0xff]  }
 0x32c   :  { %7346 = vmatpush1.bf16.msra.mxu0 %v9832_v39  ;;  %v9985_v39 = vld [vmem:[#allocation6 + $0x380] ss:$16 sps:$4 sm:$0xff]  }
 0x32d   :  { %7347 = vmatprep.subr.bf16.mxu0 %v9837_v27  ;;  %v9993_v27 = vld [vmem:[#allocation6 + $0x364] ss:$16 sps:$4 sm:$0xff]   ;;  %v9871_v55 = vld [vmem:[#allocation6 + $0x8e0] ss:$16 sps:$4 sm:$0xff]  }
 0x32e   :  { %7313 = vmatpush2.bf16.msra.mxu1 %v9967_v15  ;;  %v9879_v15 = vld [vmem:[#allocation6 + $0x8a4] ss:$16 sps:$4 sm:$0xff]   ;;  %v9877_v48 = vld [vmem:[#allocation6 + $0x8a0] ss:$16 sps:$4 sm:$0xff]  }
 0x32f   :  { %7314 = vmatprep.subr.bf16.mxu1 %v9975_v44  ;;  %v9883_v44 = vld [vmem:[#allocation6 + $0x860] ss:$16 sps:$4 sm:$0xff]  }
 0x330   :  { %7348 = vmatpush1.bf16.msra.mxu0 %v9835_v52  ;;  %v9991_v52 = vld [vmem:[#allocation6 + $0x360] ss:$16 sps:$4 sm:$0xff]  }
 0x331   :  { %7349 = vmatprep.subr.bf16.mxu0 %v9840_v5  ;;  %v9999_v5 = vld [vmem:[#allocation6 + $0x344] ss:$16 sps:$4 sm:$0xff]  }
 0x332   :  { %7315 = vmatpush2.bf16.msra.mxu1 %v9973_v17  ;;  %v9885_v17 = vld [vmem:[#allocation6 + $0x864] ss:$16 sps:$4 sm:$0xff]  }
 0x333   :  { %7316 = vmatprep.subr.bf16.mxu1 %v9981_v53  ;;  %v9889_v53 = vld [vmem:[#allocation6 + $0x820] ss:$16 sps:$4 sm:$0xff]  }
 0x334   :  { %7350 = vmatpush1.bf16.msra.mxu0 %v9838_v26  ;;  %v9997_v26 = vld [vmem:[#allocation6 + $0x340] ss:$16 sps:$4 sm:$0xff]  }
 0x335   :  { %7351 = vmatprep.subr.bf16.mxu0 %v9843_v18  ;;  %v10005_v18 = vld [vmem:[#allocation6 + $0x324] ss:$16 sps:$4 sm:$0xff]  }
 0x336   :  { %7317 = vmatpush2.bf16.msra.mxu1 %v9979_v14  ;;  %v9894_v14 = vld [vmem:[#allocation6 + $0x804] ss:$16 sps:$4 sm:$0xff]  }
 0x337   :  { %7318 = vmatprep.subr.bf16.mxu1 %v9987_v32  ;;  %v9895_v32 = vld [vmem:[#allocation6 + $0x9e0] ss:$16 sps:$4 sm:$0xff]  }
 0x338   :  { %7352 = vmatpush1.bf16.msra.mxu0 %v9841_v43  ;;  %v10003_v43 = vld [vmem:[#allocation6 + $0x320] ss:$16 sps:$4 sm:$0xff]  }
 0x339   :  { %7353 = vmatprep.subr.bf16.mxu0 %v9846_v40  ;;  %v10011_v40 = vld [vmem:[#allocation6 + $0x304] ss:$16 sps:$4 sm:$0xff]  }
 0x33a   :  { %7319 = vmatpush2.bf16.msra.mxu1 %v9985_v39  ;;  %v9900_v39 = vld [vmem:[#allocation6 + $0x9c4] ss:$16 sps:$4 sm:$0xff]  }
 0x33b   :  { %7320 = vmatprep.subr.bf16.mxu1 %v9993_v27  ;;  %v9901_v27 = vld [vmem:[#allocation6 + $0x9a0] ss:$16 sps:$4 sm:$0xff]  }
 0x33c   :  { %7354 = vmatpush1.bf16.msra.mxu0 %v9844_v29  ;;  %v9873_v29 = vld [vmem:[#allocation6 + $0x8e4] ss:$16 sps:$4 sm:$0xff]  }
 0x33d   :  { %7355 = vmatprep.subr.bf16.mxu0 %v9849_v56  ;;  %v10017_v56 = vld [vmem:[#allocation6 + $0x6e4] ss:$16 sps:$4 sm:$0xff]  }
 0x33e   :  { %7321 = vmatpush2.bf16.msra.mxu1 %v9991_v52  ;;  %v9906_v52 = vld [vmem:[#allocation6 + $0x984] ss:$16 sps:$4 sm:$0xff]  }
 0x33f   :  { %7322 = vmatprep.subr.bf16.mxu1 %v9999_v5  ;;  %v9907_v5 = vld [vmem:[#allocation6 + $0x960] ss:$16 sps:$4 sm:$0xff]  }
 0x340   :  { %7356 = vmatpush2.bf16.msra.mxu0 %v9847_v58  ;;  %v9874_v58 = vld [vmem:[#allocation6 + $0x8c0] ss:$16 sps:$4 sm:$0xff]  }
 0x341   :  { %7357 = vmatprep.subr.bf16.mxu0 %v9852_v49  ;;  %v9882_v49 = vld [vmem:[#allocation6 + $0x884] ss:$16 sps:$4 sm:$0xff]  }
 0x342   :  { %7323 = vmatpush2.bf16.msra.mxu1 %v9997_v26  ;;  %v9912_v26 = vld [vmem:[#allocation6 + $0x944] ss:$16 sps:$4 sm:$0xff]  }
 0x343   :  { %7324 = vmatprep.subr.bf16.mxu1 %v10005_v18  ;;  %v9913_v18 = vld [vmem:[#allocation6 + $0x920] ss:$16 sps:$4 sm:$0xff]  }
 0x344   :  { %7358 = vmatpush2.bf16.msra.mxu0 %v9850_v16  ;;  %v9880_v16 = vld [vmem:[#allocation6 + $0x880] ss:$16 sps:$4 sm:$0xff]  }
 0x345   :  { %7359 = vmatprep.subr.bf16.mxu0 %v9855_v59  ;;  %v9888_v59 = vld [vmem:[#allocation6 + $0x844] ss:$16 sps:$4 sm:$0xff]  }
 0x346   :  { %7325 = vmatpush2.bf16.msra.mxu1 %v10003_v43  ;;  %v9918_v43 = vld [vmem:[#allocation6 + $0x904] ss:$16 sps:$4 sm:$0xff]  }
 0x347   :  { %7326 = vmatprep.subr.bf16.mxu1 %v10011_v40  ;;  %v9922_v40 = vld [vmem:[#allocation6 + $0xe8] ss:$16 sps:$4 sm:$0xff]  }
 0x348   :  { %7360 = vmatpush2.bf16.msra.mxu0 %v9853_v42  ;;  %v9886_v42 = vld [vmem:[#allocation6 + $0x840] ss:$16 sps:$4 sm:$0xff]  }
 0x349   :  { %7361 = vmatprep.subr.bf16.mxu0 %v9858_v36  ;;  %v9891_v36 = vld [vmem:[#allocation6 + $0x824] ss:$16 sps:$4 sm:$0xff]  }
 0x34a   :  { %7327 = vmatpush2.bf16.msra.mxu1 %v10009_v35  ;;  %v9924_v35 = vld [vmem:[#allocation6 + $0xec] ss:$16 sps:$4 sm:$0xff]  }
 0x34b   :  { %7382 = vmatprep.subr.bf16.mxu1 %v10017_v56  ;;  %v9936_v56 = vld [vmem:[#allocation6 + $0xac] ss:$16 sps:$4 sm:$0xff]  }
 0x34c   :  { %7362 = vmatpush2.bf16.msra.mxu0 %v9856_v63  ;;  %v9892_v63 = vld [vmem:[#allocation6 + $0x800] ss:$16 sps:$4 sm:$0xff]  }
 0x34d   :  { %7363 = vmatprep.subr.bf16.mxu0 %v9861_v1  ;;  %v9897_v1 = vld [vmem:[#allocation6 + $0x9e4] ss:$16 sps:$4 sm:$0xff]  }
 0x350   :  { %7364 = vmatpush2.bf16.msra.mxu0 %v9859_v2  ;;  %v9898_v2 = vld [vmem:[#allocation6 + $0x9c0] ss:$16 sps:$4 sm:$0xff]  }
 0x351   :  { %7365 = vmatprep.subr.bf16.mxu0 %v9864_v33  ;;  %v9903_v33 = vld [vmem:[#allocation6 + $0x9a4] ss:$16 sps:$4 sm:$0xff]  }
 0x354   :  { %7366 = vmatpush2.bf16.msra.mxu0 %v9862_v34  ;;  %v9904_v34 = vld [vmem:[#allocation6 + $0x980] ss:$16 sps:$4 sm:$0xff]  }
 0x355   :  { %7367 = vmatprep.subr.bf16.mxu0 %v9867_v19  ;;  %v9909_v19 = vld [vmem:[#allocation6 + $0x964] ss:$16 sps:$4 sm:$0xff]  }
 0x358   :  { %7368 = vmatpush2.bf16.msra.mxu0 %v9865_v41  ;;  %v9910_v41 = vld [vmem:[#allocation6 + $0x940] ss:$16 sps:$4 sm:$0xff]  }
 0x359   :  { %7369 = vmatprep.subr.bf16.mxu0 %v9870_v0  ;;  %v9915_v0 = vld [vmem:[#allocation6 + $0x924] ss:$16 sps:$4 sm:$0xff]  }
 0x35c   :  { %7370 = vmatpush2.bf16.msra.mxu0 %v9868_v38  ;;  %v9916_v38 = vld [vmem:[#allocation6 + $0x900] ss:$16 sps:$4 sm:$0xff]  }
 0x35d   :  { %7425 = vmatprep.subr.bf16.mxu0 %v9873_v29  ;;  %v9930_v29 = vld [vmem:[#allocation6 + $0xcc] ss:$16 sps:$4 sm:$0xff]  }
 0x35f   :  { %7372 = vmatmul.mubr.bf16.vlgmr.msra.gmra.mxu0 %v11365_v50 }
 0x360   :  { %7426 = vmatpush1.bf16.msra.mxu0 %v9871_v55  ;;  %7457 = vmatprep.mubr.bf16.mxu0 %v11388_v57  ;;  %v4452_v55 = vpop.f32.mrf.mxu0 }
 0x361   :  { %7427 = vmatprep.subr.bf16.mxu0 %v9876_v46  ;;  %v9928_v46 = vld [vmem:[#allocation6 + $0xc8] ss:$16 sps:$4 sm:$0xff]  }
 0x364   :  { %7428 = vmatpush1.bf16.msra.mxu0 %v9874_v58  ;;  %v4454_v58 = vpop.f32.mrf.mxu0 }
 0x365   :  { %7429 = vmatprep.subr.bf16.mxu0 %v9879_v15  ;;  %v9934_v15 = vld [vmem:[#allocation6 + $0xa8] ss:$16 sps:$4 sm:$0xff]  }
 0x368   :  { %7430 = vmatpush1.bf16.msra.mxu0 %v9877_v48  ;;  %v9942_v48 = vld [vmem:[#allocation6 + $0x8c] ss:$16 sps:$4 sm:$0xff]  }
 0x369   :  { %7431 = vmatprep.subr.bf16.mxu0 %v9882_v49  ;;  %v4456_v49 = vpop.f32.mrf.mxu0 }
 0x36c   :  { %7432 = vmatpush1.bf16.msra.mxu0 %v9880_v16  ;;  %v4495_v16 = vpop.f32.mrf.mxu1 }
 0x36d   :  { %7433 = vmatprep.subr.bf16.mxu0 %v9885_v17  ;;  %v9940_v17 = vld [vmem:[#allocation6 + $0x88] ss:$16 sps:$4 sm:$0xff]  }
 0x370   :  { %7434 = vmatpush1.bf16.msra.mxu0 %v9883_v44  ;;  %v9948_v44 = vld [vmem:[#allocation6 + $0x6c] ss:$16 sps:$4 sm:$0xff]  }
 0x371   :  { %7435 = vmatprep.subr.bf16.mxu0 %v9888_v59  ;;  %v4458_v59 = vpop.f32.mrf.mxu0 }
 0x374   :  { %7436 = vmatpush1.bf16.msra.mxu0 %v9886_v42  ;;  %v4497_v42 = vpop.f32.mrf.mxu1 }
 0x375   :  { %7437 = vmatprep.subr.bf16.mxu0 %v9891_v36  ;;  %v9946_v36 = vld [vmem:[#allocation6 + $0x68] ss:$16 sps:$4 sm:$0xff]  }
 0x378   :  { %7438 = vmatpush1.bf16.msra.mxu0 %v9889_v53  ;;  %v4538_v53 = vpop.f32.mrf.mxu0 }
 0x379   :  { %7439 = vmatprep.subr.bf16.mxu0 %v9894_v14  ;;  %v4499_v14 = vpop.f32.mrf.mxu1 }
 0x37c   :  { %7440 = vmatpush1.bf16.msra.mxu0 %v9892_v63  ;;  %v9952_v63 = vld [vmem:[#allocation6 + $0x48] ss:$16 sps:$4 sm:$0xff]  }
 0x37d   :  { %7441 = vmatprep.subr.bf16.mxu0 %v9897_v1  ;;  %v9960_v1 = vld [vmem:[#allocation6 + $0x2c] ss:$16 sps:$4 sm:$0xff]  }
 0x380   :  { %7442 = vmatpush2.bf16.msra.mxu0 %v9895_v32  ;;  %v4540_v32 = vpop.f32.mrf.mxu0 }
 0x381   :  { %7443 = vmatprep.subr.bf16.mxu0 %v9900_v39  ;;  %v4501_v39 = vpop.f32.mrf.mxu1 }
 0x384   :  { %7444 = vmatpush2.bf16.msra.mxu0 %v9898_v2  ;;  %v9958_v2 = vld [vmem:[#allocation6 + $0x28] ss:$16 sps:$4 sm:$0xff]  }
 0x385   :  { %7445 = vmatprep.subr.bf16.mxu0 %v9903_v33  ;;  %v9966_v33 = vld [vmem:[#allocation6 + $0xc] ss:$16 sps:$4 sm:$0xff]  }
 0x388   :  { %7446 = vmatpush2.bf16.msra.mxu0 %v9901_v27  ;;  %v4542_v27 = vpop.f32.mrf.mxu0 }
 0x389   :  { %7447 = vmatprep.subr.bf16.mxu0 %v9906_v52  ;;  %v4581_v52 = vpop.f32.mrf.mxu1 }
 0x38c   :  { %7448 = vmatpush2.bf16.msra.mxu0 %v9904_v34  ;;  %v9964_v34 = vld [vmem:[#allocation6 + $0x8] ss:$16 sps:$4 sm:$0xff]  }
 0x38d   :  { %7449 = vmatprep.subr.bf16.mxu0 %v9909_v19  ;;  %v4496_v19 = vadd.f32 %v4495_v16, %v4452_v55  ;;  %v9976_v16 = vld [vmem:[#allocation6 + $0x1c8] ss:$16 sps:$4 sm:$0xff]  }
 0x390   :  { %7450 = vmatpush2.bf16.msra.mxu0 %v9907_v5  ;;  %v9972_v5 = vld [vmem:[#allocation6 + $0x1ec] ss:$16 sps:$4 sm:$0xff]  }
 0x391   :  { %7451 = vmatprep.subr.bf16.mxu0 %v9912_v26  ;;  %v4544_v26 = vpop.f32.mrf.mxu0 }
 0x394   :  { %7452 = vmatpush2.bf16.msra.mxu0 %v9910_v41  ;;  %v4583_v41 = vpop.f32.mrf.mxu1 }
 0x395   :  { %7453 = vmatprep.subr.bf16.mxu0 %v9915_v0  ;;  %v4498_v0 = vadd.f32 %v4497_v42, %v4454_v58  ;;  %v4732_v58 = vrot.slane %v11350_v7, %v11206_v8  ;;  %v9984_v42 = vld [vmem:[#allocation6 + $0x1ac] ss:$16 sps:$4 sm:$0xff]  }
 0x398   :  { %7454 = vmatpush2.bf16.msra.mxu0 %v9913_v18  ;;  %v4624_v18 = vpop.f32.mrf.mxu0 }
 0x399   :  { %7455 = vmatprep.subr.bf16.mxu0 %v9918_v43  ;;  %v9970_v43 = vld [vmem:[#allocation6 + $0x1e8] ss:$16 sps:$4 sm:$0xff]  }
 0x39a   :  { %v4626_v55 = vpop.f32.mrf.mxu0 }
 0x39c   :  { %7456 = vmatpush2.bf16.msra.mxu0 %v9916_v38  ;;  %v4500_v38 = vadd.f32 %v4499_v14, %v4456_v49  ;;  %v4692_v49 = vrot.slane %v11350_v7, %v11209_v9 }
 0x39d   :  { %7511 = vmatprep.subr.bf16.mxu0 %v9924_v35  ;;  %v4539_v35 = vadd.f32 %v4538_v53, %v4496_v19  ;;  %v9990_v19 = vld [vmem:[#allocation6 + $0x18c] ss:$16 sps:$4 sm:$0xff]  }
 0x39f   :  { %7458 = vmatmul.mubr.bf16.vlgmr.msra.gmra.mxu0 %v11386_v3 }
 0x3a0   :  { %7512 = vmatpush1.bf16.msra.mxu0 %v9922_v40  ;;  %7543 = vmatprep.mubr.bf16.mxu0 %v11375_v10  ;;  %v9954_v10 = vld [vmem:[#allocation6 + $0x4c] ss:$16 sps:$4 sm:$0xff]  }
 0x3a1   :  { %7513 = vmatprep.subr.bf16.mxu0 %v9930_v29  ;;  %v9978_v40 = vld [vmem:[#allocation6 + $0x1cc] ss:$16 sps:$4 sm:$0xff]   ;;  %v4585_v29 = vpop.f32.mrf.mxu1 }
 0x3a4   :  { %7514 = vmatpush1.bf16.msra.mxu0 %v9928_v46  ;;  %v4688_v46 = vrot.slane %v11350_v7, %v11203_v6 }
 0x3a5   :  { %7515 = vmatprep.subr.bf16.mxu0 %v9936_v56  ;;  %v4502_v56 = vadd.f32 %v4501_v39, %v4458_v59  ;;  %v4752_v39 = vrot.slane %v4732_v58, %v11131_v30  ;;  %v9994_v58 = vld [vmem:[#allocation6 + $0x168] ss:$16 sps:$4 sm:$0xff]  }
 0x3a7   :  { %v4545_v59 = vadd.f32 %v4544_v26, %v4502_v56  ;;  %v9996_v56 = vld [vmem:[#allocation6 + $0x16c] ss:$16 sps:$4 sm:$0xff]  }
 0x3a8   :  { %7516 = vmatpush1.bf16.msra.mxu0 %v9934_v15  ;;  %v4582_v15 = vadd.f32 %v4581_v52, %v4539_v35 }
 0x3a9   :  { %7517 = vmatprep.subr.bf16.mxu0 %v9942_v48  ;;  %v4541_v48 = vadd.f32 %v4540_v32, %v4498_v0 }
 0x3aa   :  { %v4625_v14 = vadd.f32 %v4624_v18, %v4582_v15 }
 0x3ac   :  { %7518 = vmatpush1.bf16.msra.mxu0 %v9940_v17  ;;  %v4584_v17 = vadd.f32 %v4583_v41, %v4541_v48 }
 0x3ad   :  { %7519 = vmatprep.subr.bf16.mxu0 %v9948_v44  ;;  %v4543_v44 = vadd.f32 %v4542_v27, %v4500_v38  ;;  %v9988_v38 = vld [vmem:[#allocation6 + $0x188] ss:$16 sps:$4 sm:$0xff]  }
 0x3ae   :  { %v4627_v52 = vadd.f32 %v4626_v55, %v4584_v17 }
 0x3af   :  { %v4586_v53 = vadd.f32 %v4585_v29, %v4543_v44 }
 0x3b0   :  { %7520 = vmatpush1.bf16.msra.mxu0 %v9946_v36  ;;  %v4587_v36 = vpop.f32.mrf.mxu1 }
 0x3b1   :  { %7521 = vmatprep.subr.bf16.mxu0 %v9954_v10  ;;  %v4708_v10 = vrot.slane %v4688_v46, %v11126_v51 }
 0x3b4   :  { %7522 = vmatpush1.bf16.msra.mxu0 %v9952_v63  ;;  %v4736_v63 = vrot.slane %v11350_v7, %v11214_v13 }
 0x3b5   :  { %7523 = vmatprep.subr.bf16.mxu0 %v9960_v1  ;;  %v4628_v1 = vpop.f32.mrf.mxu0 }
 0x3b6   :  { %v4756_v0 = vrot.slane %v4736_v63, %v11131_v30  ;;  %v4629_v18 = vadd.f32 %v4628_v1, %v4586_v53  ;;  %v10000_v63 = vld [vmem:[#allocation6 + $0x148] ss:$16 sps:$4 sm:$0xff]  }
 0x3b7   :  { %v4630_v7 = vpop.f32.mrf.mxu0 }
 0x3b8   :  { %7524 = vmatpush1.bf16.msra.mxu0 %v9958_v2  ;;  %v9982_v2 = vld [vmem:[#allocation6 + $0x1a8] ss:$16 sps:$4 sm:$0xff]  }
 0x3b9   :  { %7525 = vmatprep.subr.bf16.mxu0 %v9966_v33  ;;  %v4588_v33 = vadd.f32 %v4587_v36, %v4545_v59  ;;  %v10002_v36 = vld [vmem:[#allocation6 + $0x14c] ss:$16 sps:$4 sm:$0xff]  }
 0x3bb   :  { %v4631_v46 = vadd.f32 %v4630_v7, %v4588_v33  ;;  %v10008_v33 = vld [vmem:[#allocation6 + $0x12c] ss:$16 sps:$4 sm:$0xff]  }
 0x3bc   :  { %7526 = vmatpush1.bf16.msra.mxu0 %v9964_v34  ;;  %v4712_v34 = vrot.slane %v4692_v49, %v11126_v51 }
 0x3bd   :  { %7527 = vmatprep.subr.bf16.mxu0 %v9972_v5 }
 0x3c0   :  { %7528 = vmatpush2.bf16.msra.mxu0 %v9970_v43 }
 0x3c1   :  { %7529 = vmatprep.subr.bf16.mxu0 %v9978_v40 }
 0x3c4   :  { %7530 = vmatpush2.bf16.msra.mxu0 %v9976_v16  ;;  %v4667_v32 = vpop.f32.mrf.mxu1 }
 0x3c5   :  { %v4668_v27 = vadd.f32 %v4667_v32, %v4625_v14  ;;  %7531 = vmatprep.subr.bf16.mxu0 %v9984_v42 }
 0x3c6   :  { %v4669_v5 = vpop.f32.mrf.mxu1 }
 0x3c7   :  { %v4715_v41 = vmul.f32 %v4708_v10, %v4668_v27  ;;  %v4670_v26 = vadd.f32 %v4669_v5, %v4627_v52 }
 0x3c8   :  { %7532 = vmatpush2.bf16.msra.mxu0 %v9982_v2  ;;  %v4671_v43 = vpop.f32.mrf.mxu1 }
 0x3c9   :  { %v4759_v35 = vadd.f32 %v4752_v39, %v4715_v41  ;;  %v4716_v40 = vmul.f32 %v4712_v34, %v4670_v26  ;;  %v4672_v29 = vadd.f32 %v4671_v43, %v4629_v18  ;;  %7533 = vmatprep.subr.bf16.mxu0 %v9990_v19  ;;  %v10014_v26 = vld [vmem:[#allocation6 + $0x10c] ss:$16 sps:$4 sm:$0xff]  }
 0x3ca   :  { %v4673_v15 = vpop.f32.mrf.mxu1 }
 0x3cb   :  { %v11408_v48 = vadd.f32 %v4756_v0, %v4716_v40  ;;  %v4719_v55 = vmul.f32 %v4708_v10, %v4672_v29  ;;  %v4674_v16 = vadd.f32 %v4673_v15, %v4631_v46  ;;  %v4767_v17 = vmax.f32 %v4759_v35, 0.0  ;;  %v10012_v35 = vld [vmem:[#allocation6 + $0x108] ss:$16 sps:$4 sm:$0xff]   ;;  %v10020_v29 = vld [vmem:[#allocation6 + $0x4ec] ss:$16 sps:$4 sm:$0xff]  }
 0x3cc   :  { %7534 = vmatpush2.bf16.msra.mxu0 %v9988_v38 }
 0x3cd   :  { %v4768_v44 = vmax.f32 %v11408_v48, 0.0  ;;  %v4763_v49 = vadd.f32 %v4752_v39, %v4719_v55  ;;  %v4720_v42 = vmul.f32 %v4712_v34, %v4674_v16  ;;  %7535 = vmatprep.subr.bf16.mxu0 %v9996_v56  ;;  %v10006_v39 = vld [vmem:[#allocation6 + $0x128] ss:$16 sps:$4 sm:$0xff]  }
 0x3cf   :  { %v8891_v53 = vpack.c.bf16 %v4768_v44, %v4767_v17  ;;  %v4771_v59 = vmax.f32 %v4763_v49, 0.0  ;;  %v4764_v14 = vadd.f32 %v4756_v0, %v4720_v42  ;;  %v10018_v49 = vld [vmem:[#allocation6 + $0x4e8] ss:$16 sps:$4 sm:$0xff]  }
 0x3d0   :  { %7536 = vmatpush2.bf16.msra.mxu0 %v9994_v58 }
 0x3d1   :  { %v4809_v1 = vshrl.u32 %v8891_v53, 16  ;;  %v4812_v32 = vshll.u32 %v8891_v53, 16  ;;  %v11411_v2 = vpack.c.bf16 %v4771_v59, %v4767_v17  ;;  %v4772_v10 = vmax.f32 %v4764_v14, 0.0  ;;  %7537 = vmatprep.subr.bf16.mxu0 %v10002_v36  ;;  %v10015_v17 = vld [vmem:[#allocation6 + $0x6e0] ss:$16 sps:$4 sm:$0xff]  }
 0x3d2   :  { %v10024_v14 = vld [vmem:[#allocation6 + $0x4c8] ss:$16 sps:$4 sm:$0xff]  }
 0x3d3   :  { %v4811_v27 = vrot.slane %v4809_v1, 7  ;;  %v4827_v52 = vrot.slane %v4809_v1, 4  ;;  %v4828_v19 = vrot.slane %v4812_v32, 5  ;;  %v8893_v5 = vpack.c.bf16 %v4772_v10, %v4771_v59  ;;  %v10038_v1 = vld [vmem:[#allocation6 + $0x48c] ss:$16 sps:$4 sm:$0xff]  }
 0x3d4   :  { %7538 = vmatpush2.bf16.msra.mxu0 %v10000_v63  ;;  %v11436_v59 = vpack.c.bf16 %v4772_v10, %v4768_v44  ;;  %v10027_v63 = vld [vmem:[#allocation6 + $0x6a0] ss:$16 sps:$4 sm:$0xff]   ;;  %v10035_v44 = vld [vmem:[#allocation6 + $0x684] ss:$16 sps:$4 sm:$0xff]   ;;  %v10036_v10 = vld [vmem:[#allocation6 + $0x488] ss:$16 sps:$4 sm:$0xff]  }
 0x3d5   :  { %v4847_v34 = vshrl.u32 %v8893_v5, 16  ;;  %v4850_v41 = vshll.u32 %v8893_v5, 16  ;;  %7539 = vmatprep.subr.bf16.mxu0 %v10008_v33  ;;  %v4829_v0 = vor.u32 %v4828_v19, %v4827_v52  ;;  %v4814_v38 = vor.u32 %v4812_v32, %v4811_v27  ;;  %v10033_v32 = vld [vmem:[#allocation6 + $0x680] ss:$16 sps:$4 sm:$0xff]   ;;  %v10044_v33 = vld [vmem:[#allocation6 + $0x46c] ss:$16 sps:$4 sm:$0xff]  }
 0x3d6   :  { %v10039_v27 = vld [vmem:[#allocation6 + $0x660] ss:$16 sps:$4 sm:$0xff]   ;;  %v10042_v52 = vld [vmem:[#allocation6 + $0x468] ss:$16 sps:$4 sm:$0xff]   ;;  %v10047_v19 = vld [vmem:[#allocation6 + $0x644] ss:$16 sps:$4 sm:$0xff]  }
 0x3d7   :  { %v4849_v18 = vrot.slane %v4847_v34, 7  ;;  %v4865_v7 = vrot.slane %v4847_v34, 4  ;;  %v4866_v43 = vrot.slane %v4850_v41, 5  ;;  %v4830_v46 = vrot.slane %v4829_v0, 4  ;;  %v10050_v5 = vld [vmem:[#allocation6 + $0x44c] ss:$16 sps:$4 sm:$0xff]  }
 0x3d8   :  { %7540 = vmatpush2.bf16.msra.mxu0 %v10006_v39  ;;  %v4821_v15 = vsel %vm10643_vm6, %v4814_v38, %v11276_v61  ;;  %v10045_v39 = vld [vmem:[#allocation6 + $0x640] ss:$16 sps:$4 sm:$0xff]   ;;  %v10048_v34 = vld [vmem:[#allocation6 + $0x448] ss:$16 sps:$4 sm:$0xff]  }
 0x3d9   :  { %7541 = vmatprep.subr.bf16.mxu0 %v10014_v26  ;;  %v4852_v40 = vor.u32 %v4850_v41, %v4849_v18  ;;  %v4867_v56 = vor.u32 %v4866_v43, %v4865_v7  ;;  %v4837_v42 = vsel %vm10701_vm11, %v4830_v46, %v11327_v47  ;;  %v10021_v47 = vld [vmem:[#allocation6 + $0x6c0] ss:$16 sps:$4 sm:$0xff]   ;;  %v10053_v41 = vld [vmem:[#allocation6 + $0x624] ss:$16 sps:$4 sm:$0xff]   ;;  %v10056_v26 = vld [vmem:[#allocation6 + $0x42c] ss:$16 sps:$4 sm:$0xff]  }
 0x3da   :  { %v10051_v0 = vld [vmem:[#allocation6 + $0x620] ss:$16 sps:$4 sm:$0xff]   ;;  %v10054_v18 = vld [vmem:[#allocation6 + $0x428] ss:$16 sps:$4 sm:$0xff]   ;;  %v10059_v7 = vld [vmem:[#allocation6 + $0x604] ss:$16 sps:$4 sm:$0xff]  }
 0x3db   :  { %v4859_v48 = vsel %vm10643_vm6, %v4852_v40, %v11280_v62  ;;  %v4868_v55 = vrot.slane %v4867_v56, 4  ;;  %v10026_v62 = vld [vmem:[#allocation6 + $0x4cc] ss:$16 sps:$4 sm:$0xff]   ;;  %v10057_v38 = vld [vmem:[#allocation6 + $0x600] ss:$16 sps:$4 sm:$0xff]  }
 0x3dc   :  { %7542 = vmatpush2.bf16.msra.mxu0 %v10012_v35  ;;  %v11419_v16 = vcombine.low %v4821_v15, %v4859_v48  ;;  %v11421_v58 = vcombine.high %v4821_v15, %v4859_v48  ;;  %v10062_v43 = vld [vmem:[#allocation6 + $0x40c] ss:$16 sps:$4 sm:$0xff]   ;;  %v10060_v35 = vld [vmem:[#allocation6 + $0x408] ss:$16 sps:$4 sm:$0xff]   ;;  %v10065_v40 = vld [vmem:[#allocation6 + $0x7e4] ss:$16 sps:$4 sm:$0xff]  }
 0x3dd   :  { %7597 = vmatprep.subr.bf16.mxu0 %v10020_v29  ;;  %v4875_v61 = vsel %vm10701_vm11, %v4868_v55, %v11317_v25  ;;  %v10032_v25 = vld [vmem:[#allocation6 + $0x4ac] ss:$16 sps:$4 sm:$0xff]   ;;  %v10063_v46 = vld [vmem:[#allocation6 + $0x7e0] ss:$16 sps:$4 sm:$0xff]   ;;  %v10066_v56 = vld [vmem:[#allocation6 + $0x5e8] ss:$16 sps:$4 sm:$0xff]  }
 0x3de   :  { %7328 = vmatprep.mubr.bf16.mxu1 %v11421_v58  ;;  %v11430_v36 = vcombine.low %v4837_v42, %v4875_v61  ;;  %v11432_v53 = vcombine.high %v4837_v42, %v4875_v61  ;;  %v10068_v29 = vld [vmem:[#allocation6 + $0x5ec] ss:$16 sps:$4 sm:$0xff]   ;;  %v10071_v15 = vld [vmem:[#allocation6 + $0x7c4] ss:$16 sps:$4 sm:$0xff]   ;;  %v10069_v55 = vld [vmem:[#allocation6 + $0x7c0] ss:$16 sps:$4 sm:$0xff]  }
 0x3df   :  { %7544 = vmatmul.mubr.bf16.vlgmr.msra.gmra.mxu0 %v11373_v4  ;;  %7329 = vmatmul.mubr.bf16.vlgmr.msra.gmra.mxu1 %v11419_v16  ;;  %v10030_v4 = vld [vmem:[#allocation6 + $0x4a8] ss:$16 sps:$4 sm:$0xff]   ;;  %v10074_v48 = vld [vmem:[#allocation6 + $0x5cc] ss:$16 sps:$4 sm:$0xff]   ;;  %v10075_v61 = vld [vmem:[#allocation6 + $0x7a0] ss:$16 sps:$4 sm:$0xff]  }
 0x3e0   :  { %7383 = vmatpush1.bf16.msra.mxu1 %v10015_v17  ;;  %7598 = vmatpush1.bf16.msra.mxu0 %v10018_v49  ;;  %v10072_v17 = vld [vmem:[#allocation6 + $0x5c8] ss:$16 sps:$4 sm:$0xff]   ;;  %v10077_v49 = vld [vmem:[#allocation6 + $0x7a4] ss:$16 sps:$4 sm:$0xff]   ;;  %v10080_v42 = vld [vmem:[#allocation6 + $0x5ac] ss:$16 sps:$4 sm:$0xff]  }
 0x3e1   :  { %7629 = vmatprep.mubr.bf16.mxu0 %v11384_v45  ;;  %7414 = vmatprep.mubr.bf16.mxu1 %v11436_v59  ;;  %v10041_v45 = vld [vmem:[#allocation6 + $0x664] ss:$16 sps:$4 sm:$0xff]  }
 0x3e2   :  { %7384 = vmatprep.subr.bf16.mxu1 %v10023_v60  ;;  %7599 = vmatprep.subr.bf16.mxu0 %v10026_v62  ;;  %v10078_v60 = vld [vmem:[#allocation6 + $0x5a8] ss:$16 sps:$4 sm:$0xff]   ;;  %v10083_v62 = vld [vmem:[#allocation6 + $0x784] ss:$16 sps:$4 sm:$0xff]  }
 0x3e4   :  { %7385 = vmatpush1.bf16.msra.mxu1 %v10021_v47  ;;  %7600 = vmatpush1.bf16.msra.mxu0 %v10024_v14  ;;  %v10086_v47 = vld [vmem:[#allocation6 + $0x58c] ss:$16 sps:$4 sm:$0xff]   ;;  %v10081_v14 = vld [vmem:[#allocation6 + $0x780] ss:$16 sps:$4 sm:$0xff]  }
 0x3e5   :  { %7386 = vmatprep.subr.bf16.mxu1 %v10029_v24  ;;  %7601 = vmatprep.subr.bf16.mxu0 %v10032_v25  ;;  %v10084_v24 = vld [vmem:[#allocation6 + $0x588] ss:$16 sps:$4 sm:$0xff]   ;;  %v10089_v25 = vld [vmem:[#allocation6 + $0x764] ss:$16 sps:$4 sm:$0xff]  }
 0x3e8   :  { %7387 = vmatpush1.bf16.msra.mxu1 %v10027_v63  ;;  %7602 = vmatpush1.bf16.msra.mxu0 %v10030_v4  ;;  %v10092_v63 = vld [vmem:[#allocation6 + $0x56c] ss:$16 sps:$4 sm:$0xff]   ;;  %v10087_v4 = vld [vmem:[#allocation6 + $0x760] ss:$16 sps:$4 sm:$0xff]  }
 0x3e9   :  { %7388 = vmatprep.subr.bf16.mxu1 %v10035_v44  ;;  %7603 = vmatprep.subr.bf16.mxu0 %v10038_v1  ;;  %v10090_v44 = vld [vmem:[#allocation6 + $0x568] ss:$16 sps:$4 sm:$0xff]   ;;  %v10095_v1 = vld [vmem:[#allocation6 + $0x744] ss:$16 sps:$4 sm:$0xff]  }
 0x3ec   :  { %7389 = vmatpush1.bf16.msra.mxu1 %v10033_v32  ;;  %7604 = vmatpush1.bf16.msra.mxu0 %v10036_v10  ;;  %v10098_v32 = vld [vmem:[#allocation6 + $0x54c] ss:$16 sps:$4 sm:$0xff]   ;;  %v10093_v10 = vld [vmem:[#allocation6 + $0x740] ss:$16 sps:$4 sm:$0xff]  }
 0x3ed   :  { %7390 = vmatprep.subr.bf16.mxu1 %v10041_v45  ;;  %7605 = vmatprep.subr.bf16.mxu0 %v10044_v33  ;;  %v10096_v45 = vld [vmem:[#allocation6 + $0x548] ss:$16 sps:$4 sm:$0xff]   ;;  %v10101_v33 = vld [vmem:[#allocation6 + $0x724] ss:$16 sps:$4 sm:$0xff]  }
 0x3f0   :  { %7391 = vmatpush1.bf16.msra.mxu1 %v10039_v27  ;;  %7606 = vmatpush1.bf16.msra.mxu0 %v10042_v52  ;;  %v10104_v27 = vld [vmem:[#allocation6 + $0x52c] ss:$16 sps:$4 sm:$0xff]   ;;  %v10099_v52 = vld [vmem:[#allocation6 + $0x720] ss:$16 sps:$4 sm:$0xff]  }
 0x3f1   :  { %7392 = vmatprep.subr.bf16.mxu1 %v10047_v19  ;;  %7607 = vmatprep.subr.bf16.mxu0 %v10050_v5  ;;  %v10102_v19 = vld [vmem:[#allocation6 + $0x528] ss:$16 sps:$4 sm:$0xff]   ;;  %v10107_v5 = vld [vmem:[#allocation6 + $0x704] ss:$16 sps:$4 sm:$0xff]  }
 0x3f4   :  { %7393 = vmatpush1.bf16.msra.mxu1 %v10045_v39  ;;  %7608 = vmatpush1.bf16.msra.mxu0 %v10048_v34  ;;  %v10110_v39 = vld [vmem:[#allocation6 + $0x50c] ss:$16 sps:$4 sm:$0xff]   ;;  %v10105_v34 = vld [vmem:[#allocation6 + $0x700] ss:$16 sps:$4 sm:$0xff]  }
 0x3f5   :  { %7394 = vmatprep.subr.bf16.mxu1 %v10053_v41  ;;  %7609 = vmatprep.subr.bf16.mxu0 %v10056_v26  ;;  %v10108_v41 = vld [vmem:[#allocation6 + $0x508] ss:$16 sps:$4 sm:$0xff]   ;;  %v10113_v26 = vld [vmem:[#allocation6 + $0xae4] ss:$16 sps:$4 sm:$0xff]  }
 0x3f8   :  { %7395 = vmatpush1.bf16.msra.mxu1 %v10051_v0  ;;  %7610 = vmatpush1.bf16.msra.mxu0 %v10054_v18  ;;  %v10116_v0 = vld [vmem:[#allocation6 + $0x8ec] ss:$16 sps:$4 sm:$0xff]   ;;  %v10111_v18 = vld [vmem:[#allocation6 + $0xae0] ss:$16 sps:$4 sm:$0xff]  }
 0x3f9   :  { %7396 = vmatprep.subr.bf16.mxu1 %v10059_v7  ;;  %7611 = vmatprep.subr.bf16.mxu0 %v10062_v43  ;;  %v10114_v7 = vld [vmem:[#allocation6 + $0x8e8] ss:$16 sps:$4 sm:$0xff]   ;;  %v10119_v43 = vld [vmem:[#allocation6 + $0xac4] ss:$16 sps:$4 sm:$0xff]  }
 0x3fc   :  { %7397 = vmatpush1.bf16.msra.mxu1 %v10057_v38  ;;  %7612 = vmatpush1.bf16.msra.mxu0 %v10060_v35  ;;  %v10122_v38 = vld [vmem:[#allocation6 + $0x8cc] ss:$16 sps:$4 sm:$0xff]   ;;  %v10117_v35 = vld [vmem:[#allocation6 + $0xac0] ss:$16 sps:$4 sm:$0xff]  }
 0x3fd   :  { %7398 = vmatprep.subr.bf16.mxu1 %v10065_v40  ;;  %7613 = vmatprep.subr.bf16.mxu0 %v10068_v29  ;;  %v10120_v40 = vld [vmem:[#allocation6 + $0x8c8] ss:$16 sps:$4 sm:$0xff]   ;;  %v10125_v29 = vld [vmem:[#allocation6 + $0xaa4] ss:$16 sps:$4 sm:$0xff]  }
 0x400   :  { %7399 = vmatpush2.bf16.msra.mxu1 %v10063_v46  ;;  %7614 = vmatpush2.bf16.msra.mxu0 %v10066_v56  ;;  %v10128_v46 = vld [vmem:[#allocation6 + $0x8ac] ss:$16 sps:$4 sm:$0xff]   ;;  %v10123_v56 = vld [vmem:[#allocation6 + $0xaa0] ss:$16 sps:$4 sm:$0xff]  }
 0x401   :  { %7400 = vmatprep.subr.bf16.mxu1 %v10071_v15  ;;  %7615 = vmatprep.subr.bf16.mxu0 %v10074_v48  ;;  %v10126_v15 = vld [vmem:[#allocation6 + $0x8a8] ss:$16 sps:$4 sm:$0xff]   ;;  %v10131_v48 = vld [vmem:[#allocation6 + $0xa84] ss:$16 sps:$4 sm:$0xff]  }
 0x404   :  { %7401 = vmatpush2.bf16.msra.mxu1 %v10069_v55  ;;  %7616 = vmatpush2.bf16.msra.mxu0 %v10072_v17  ;;  %v10129_v55 = vld [vmem:[#allocation6 + $0xa80] ss:$16 sps:$4 sm:$0xff]   ;;  %v10132_v17 = vld [vmem:[#allocation6 + $0x888] ss:$16 sps:$4 sm:$0xff]  }
 0x405   :  { %7402 = vmatprep.subr.bf16.mxu1 %v10077_v49  ;;  %7617 = vmatprep.subr.bf16.mxu0 %v10080_v42  ;;  %v10137_v49 = vld [vmem:[#allocation6 + $0xa64] ss:$16 sps:$4 sm:$0xff]   ;;  %v10135_v42 = vld [vmem:[#allocation6 + $0xa60] ss:$16 sps:$4 sm:$0xff]  }
 0x408   :  { %7403 = vmatpush2.bf16.msra.mxu1 %v10075_v61  ;;  %7618 = vmatpush2.bf16.msra.mxu0 %v10078_v60  ;;  %v10138_v61 = vld [vmem:[#allocation6 + $0x868] ss:$16 sps:$4 sm:$0xff]   ;;  %v10143_v60 = vld [vmem:[#allocation6 + $0xa44] ss:$16 sps:$4 sm:$0xff]  }
 0x409   :  { %7404 = vmatprep.subr.bf16.mxu1 %v10083_v62  ;;  %7619 = vmatprep.subr.bf16.mxu0 %v10086_v47  ;;  %v10146_v62 = vld [vmem:[#allocation6 + $0x84c] ss:$16 sps:$4 sm:$0xff]   ;;  %v10141_v47 = vld [vmem:[#allocation6 + $0xa40] ss:$16 sps:$4 sm:$0xff]  }
 0x40c   :  { %7405 = vmatpush2.bf16.msra.mxu1 %v10081_v14  ;;  %7620 = vmatpush2.bf16.msra.mxu0 %v10084_v24  ;;  %v10144_v14 = vld [vmem:[#allocation6 + $0x848] ss:$16 sps:$4 sm:$0xff]   ;;  %v10149_v24 = vld [vmem:[#allocation6 + $0xa24] ss:$16 sps:$4 sm:$0xff]  }
 0x40d   :  { %7406 = vmatprep.subr.bf16.mxu1 %v10089_v25  ;;  %7621 = vmatprep.subr.bf16.mxu0 %v10092_v63  ;;  %v10152_v25 = vld [vmem:[#allocation6 + $0x82c] ss:$16 sps:$4 sm:$0xff]   ;;  %v10147_v63 = vld [vmem:[#allocation6 + $0xa20] ss:$16 sps:$4 sm:$0xff]  }
 0x410   :  { %7407 = vmatpush2.bf16.msra.mxu1 %v10087_v4  ;;  %7622 = vmatpush2.bf16.msra.mxu0 %v10090_v44  ;;  %v10150_v4 = vld [vmem:[#allocation6 + $0x828] ss:$16 sps:$4 sm:$0xff]   ;;  %v10155_v44 = vld [vmem:[#allocation6 + $0xa04] ss:$16 sps:$4 sm:$0xff]  }
 0x411   :  { %7408 = vmatprep.subr.bf16.mxu1 %v10095_v1  ;;  %7623 = vmatprep.subr.bf16.mxu0 %v10098_v32  ;;  %v10158_v1 = vld [vmem:[#allocation6 + $0x80c] ss:$16 sps:$4 sm:$0xff]   ;;  %v10153_v32 = vld [vmem:[#allocation6 + $0xa00] ss:$16 sps:$4 sm:$0xff]  }
 0x414   :  { %7409 = vmatpush2.bf16.msra.mxu1 %v10093_v10  ;;  %7624 = vmatpush2.bf16.msra.mxu0 %v10096_v45  ;;  %v10156_v10 = vld [vmem:[#allocation6 + $0x808] ss:$16 sps:$4 sm:$0xff]   ;;  %v10161_v45 = vld [vmem:[#allocation6 + $0xbe4] ss:$16 sps:$4 sm:$0xff]  }
 0x415   :  { %7410 = vmatprep.subr.bf16.mxu1 %v10101_v33  ;;  %7625 = vmatprep.subr.bf16.mxu0 %v10104_v27  ;;  %v10164_v33 = vld [vmem:[#allocation6 + $0x9ec] ss:$16 sps:$4 sm:$0xff]   ;;  %v10159_v27 = vld [vmem:[#allocation6 + $0xbe0] ss:$16 sps:$4 sm:$0xff]  }
 0x418   :  { %7411 = vmatpush2.bf16.msra.mxu1 %v10099_v52  ;;  %7626 = vmatpush2.bf16.msra.mxu0 %v10102_v19  ;;  %v10162_v52 = vld [vmem:[#allocation6 + $0x9e8] ss:$16 sps:$4 sm:$0xff]   ;;  %v10167_v19 = vld [vmem:[#allocation6 + $0xbc4] ss:$16 sps:$4 sm:$0xff]  }
 0x419   :  { %7412 = vmatprep.subr.bf16.mxu1 %v10107_v5  ;;  %7627 = vmatprep.subr.bf16.mxu0 %v10110_v39  ;;  %v10170_v5 = vld [vmem:[#allocation6 + $0x9cc] ss:$16 sps:$4 sm:$0xff]   ;;  %v10165_v39 = vld [vmem:[#allocation6 + $0xbc0] ss:$16 sps:$4 sm:$0xff]  }
 0x41c   :  { %7413 = vmatpush2.bf16.msra.mxu1 %v10105_v34  ;;  %7628 = vmatpush2.bf16.msra.mxu0 %v10108_v41  ;;  %v10168_v34 = vld [vmem:[#allocation6 + $0x9c8] ss:$16 sps:$4 sm:$0xff]   ;;  %v10173_v41 = vld [vmem:[#allocation6 + $0xba4] ss:$16 sps:$4 sm:$0xff]  }
 0x41d   :  { %7468 = vmatprep.subr.bf16.mxu1 %v10113_v26  ;;  %7683 = vmatprep.subr.bf16.mxu0 %v10116_v0  ;;  %v10176_v26 = vld [vmem:[#allocation6 + $0x9ac] ss:$16 sps:$4 sm:$0xff]   ;;  %v10171_v0 = vld [vmem:[#allocation6 + $0xba0] ss:$16 sps:$4 sm:$0xff]  }
 0x41f   :  { %7415 = vmatmul.mubr.bf16.vlgmr.msra.gmra.mxu1 %v11411_v2  ;;  %7630 = vmatmul.mubr.bf16.vlgmr.msra.gmra.mxu0 %v11365_v50  ;;  %v10134_v50 = vld [vmem:[#allocation6 + $0x88c] ss:$16 sps:$4 sm:$0xff]  }
 0x420   :  { %7469 = vmatpush1.bf16.msra.mxu1 %v10111_v18  ;;  %7500 = vmatprep.mubr.bf16.mxu1 %v11432_v53  ;;  %v10174_v18 = vld [vmem:[#allocation6 + $0x9a8] ss:$16 sps:$4 sm:$0xff]  }
 0x421   :  { %7684 = vmatpush1.bf16.msra.mxu0 %v10114_v7  ;;  %7715 = vmatprep.mubr.bf16.mxu0 %v11388_v57  ;;  %v10140_v57 = vld [vmem:[#allocation6 + $0x86c] ss:$16 sps:$4 sm:$0xff]   ;;  %v10179_v7 = vld [vmem:[#allocation6 + $0xb84] ss:$16 sps:$4 sm:$0xff]  }
 0x422   :  { %7470 = vmatprep.subr.bf16.mxu1 %v10119_v43  ;;  %7685 = vmatprep.subr.bf16.mxu0 %v10122_v38  ;;  %v10182_v43 = vld [vmem:[#allocation6 + $0x98c] ss:$16 sps:$4 sm:$0xff]   ;;  %v10177_v38 = vld [vmem:[#allocation6 + $0xb80] ss:$16 sps:$4 sm:$0xff]  }
 0x424   :  { %7471 = vmatpush1.bf16.msra.mxu1 %v10117_v35  ;;  %v10180_v35 = vld [vmem:[#allocation6 + $0x988] ss:$16 sps:$4 sm:$0xff]  }
 0x425   :  { %7686 = vmatpush1.bf16.msra.mxu0 %v10120_v40  ;;  %7472 = vmatprep.subr.bf16.mxu1 %v10125_v29  ;;  %v10185_v40 = vld [vmem:[#allocation6 + $0xb64] ss:$16 sps:$4 sm:$0xff]   ;;  %v10188_v29 = vld [vmem:[#allocation6 + $0x96c] ss:$16 sps:$4 sm:$0xff]  }
 0x426   :  { %7687 = vmatprep.subr.bf16.mxu0 %v10128_v46  ;;  %v10183_v46 = vld [vmem:[#allocation6 + $0xb60] ss:$16 sps:$4 sm:$0xff]  }
 0x428   :  { %7473 = vmatpush1.bf16.msra.mxu1 %v10123_v56  ;;  %v10186_v56 = vld [vmem:[#allocation6 + $0x968] ss:$16 sps:$4 sm:$0xff]  }
 0x429   :  { %7688 = vmatpush1.bf16.msra.mxu0 %v10126_v15  ;;  %7474 = vmatprep.subr.bf16.mxu1 %v10131_v48  ;;  %v10191_v15 = vld [vmem:[#allocation6 + $0xb44] ss:$16 sps:$4 sm:$0xff]   ;;  %v10194_v48 = vld [vmem:[#allocation6 + $0x94c] ss:$16 sps:$4 sm:$0xff]  }
 0x42a   :  { %7689 = vmatprep.subr.bf16.mxu0 %v10134_v50  ;;  %v10189_v50 = vld [vmem:[#allocation6 + $0xb40] ss:$16 sps:$4 sm:$0xff]  }
 0x42c   :  { %7475 = vmatpush1.bf16.msra.mxu1 %v10129_v55  ;;  %v10192_v55 = vld [vmem:[#allocation6 + $0x948] ss:$16 sps:$4 sm:$0xff]  }
 0x42d   :  { %7690 = vmatpush1.bf16.msra.mxu0 %v10132_v17  ;;  %7476 = vmatprep.subr.bf16.mxu1 %v10137_v49  ;;  %v10197_v17 = vld [vmem:[#allocation6 + $0xb24] ss:$16 sps:$4 sm:$0xff]   ;;  %v10200_v49 = vld [vmem:[#allocation6 + $0x92c] ss:$16 sps:$4 sm:$0xff]  }
 0x42e   :  { %7691 = vmatprep.subr.bf16.mxu0 %v10140_v57  ;;  %v10195_v57 = vld [vmem:[#allocation6 + $0xb20] ss:$16 sps:$4 sm:$0xff]  }
 0x430   :  { %7477 = vmatpush1.bf16.msra.mxu1 %v10135_v42  ;;  %v10198_v42 = vld [vmem:[#allocation6 + $0x928] ss:$16 sps:$4 sm:$0xff]  }
 0x431   :  { %7692 = vmatpush1.bf16.msra.mxu0 %v10138_v61  ;;  %7478 = vmatprep.subr.bf16.mxu1 %v10143_v60  ;;  %v10203_v61 = vld [vmem:[#allocation6 + $0xb04] ss:$16 sps:$4 sm:$0xff]   ;;  %v10206_v60 = vld [vmem:[#allocation6 + $0x90c] ss:$16 sps:$4 sm:$0xff]  }
 0x432   :  { %7693 = vmatprep.subr.bf16.mxu0 %v10146_v62  ;;  %v10201_v62 = vld [vmem:[#allocation6 + $0xb00] ss:$16 sps:$4 sm:$0xff]  }
 0x434   :  { %7479 = vmatpush1.bf16.msra.mxu1 %v10141_v47  ;;  %v10204_v47 = vld [vmem:[#allocation6 + $0x908] ss:$16 sps:$4 sm:$0xff]  }
 0x435   :  { %7694 = vmatpush1.bf16.msra.mxu0 %v10144_v14  ;;  %7480 = vmatprep.subr.bf16.mxu1 %v10149_v24  ;;  %v10209_v14 = vld [vmem:[#allocation6 + $0x2ec] ss:$16 sps:$4 sm:$0xff]   ;;  %v10207_v24 = vld [vmem:[#allocation6 + $0x2e8] ss:$16 sps:$4 sm:$0xff]  }
 0x436   :  { %7695 = vmatprep.subr.bf16.mxu0 %v10152_v25  ;;  %v10212_v25 = vld [vmem:[#allocation6 + $0x2cc] ss:$16 sps:$4 sm:$0xff]  }
 0x438   :  { %7481 = vmatpush1.bf16.msra.mxu1 %v10147_v63  ;;  %v10210_v63 = vld [vmem:[#allocation6 + $0x2c8] ss:$16 sps:$4 sm:$0xff]  }
 0x439   :  { %7696 = vmatpush1.bf16.msra.mxu0 %v10150_v4  ;;  %7482 = vmatprep.subr.bf16.mxu1 %v10155_v44  ;;  %v10215_v4 = vld [vmem:[#allocation6 + $0x2ac] ss:$16 sps:$4 sm:$0xff]   ;;  %v10213_v44 = vld [vmem:[#allocation6 + $0x2a8] ss:$16 sps:$4 sm:$0xff]  }
 0x43a   :  { %7697 = vmatprep.subr.bf16.mxu0 %v10158_v1  ;;  %v10218_v1 = vld [vmem:[#allocation6 + $0x28c] ss:$16 sps:$4 sm:$0xff]  }
 0x43c   :  { %7483 = vmatpush1.bf16.msra.mxu1 %v10153_v32  ;;  %v10216_v32 = vld [vmem:[#allocation6 + $0x288] ss:$16 sps:$4 sm:$0xff]  }
 0x43d   :  { %7698 = vmatpush1.bf16.msra.mxu0 %v10156_v10  ;;  %7484 = vmatprep.subr.bf16.mxu1 %v10161_v45  ;;  %v10221_v10 = vld [vmem:[#allocation6 + $0x26c] ss:$16 sps:$4 sm:$0xff]   ;;  %v10219_v45 = vld [vmem:[#allocation6 + $0x268] ss:$16 sps:$4 sm:$0xff]  }
 0x43e   :  { %7699 = vmatprep.subr.bf16.mxu0 %v10164_v33  ;;  %v10224_v33 = vld [vmem:[#allocation6 + $0x24c] ss:$16 sps:$4 sm:$0xff]  }
 0x440   :  { %7485 = vmatpush2.bf16.msra.mxu1 %v10159_v27  ;;  %v10227_v27 = vld [vmem:[#allocation6 + $0x22c] ss:$16 sps:$4 sm:$0xff]  }
 0x441   :  { %7700 = vmatpush2.bf16.msra.mxu0 %v10162_v52  ;;  %7486 = vmatprep.subr.bf16.mxu1 %v10167_v19  ;;  %v10230_v52 = vld [vmem:[#allocation6 + $0x20c] ss:$16 sps:$4 sm:$0xff]   ;;  %v10228_v19 = vld [vmem:[#allocation6 + $0x208] ss:$16 sps:$4 sm:$0xff]  }
 0x442   :  { %7701 = vmatprep.subr.bf16.mxu0 %v10170_v5  ;;  %v10233_v5 = vld [vmem:[#allocation6 + $0x3ec] ss:$16 sps:$4 sm:$0xff]  }
 0x444   :  { %7487 = vmatpush2.bf16.msra.mxu1 %v10165_v39  ;;  %v10231_v39 = vld [vmem:[#allocation6 + $0x3e8] ss:$16 sps:$4 sm:$0xff]  }
 0x445   :  { %7702 = vmatpush2.bf16.msra.mxu0 %v10168_v34  ;;  %7488 = vmatprep.subr.bf16.mxu1 %v10173_v41  ;;  %v10236_v34 = vld [vmem:[#allocation6 + $0x3cc] ss:$16 sps:$4 sm:$0xff]   ;;  %v10234_v41 = vld [vmem:[#allocation6 + $0x3c8] ss:$16 sps:$4 sm:$0xff]  }
 0x446   :  { %7703 = vmatprep.subr.bf16.mxu0 %v10176_v26  ;;  %v10239_v26 = vld [vmem:[#allocation6 + $0x3ac] ss:$16 sps:$4 sm:$0xff]  }
 0x448   :  { %7489 = vmatpush2.bf16.msra.mxu1 %v10171_v0  ;;  %v10237_v0 = vld [vmem:[#allocation6 + $0x3a8] ss:$16 sps:$4 sm:$0xff]  }
 0x449   :  { %7704 = vmatpush2.bf16.msra.mxu0 %v10174_v18  ;;  %7490 = vmatprep.subr.bf16.mxu1 %v10179_v7  ;;  %v10242_v18 = vld [vmem:[#allocation6 + $0x38c] ss:$16 sps:$4 sm:$0xff]   ;;  %v10240_v7 = vld [vmem:[#allocation6 + $0x388] ss:$16 sps:$4 sm:$0xff]  }
 0x44a   :  { %7705 = vmatprep.subr.bf16.mxu0 %v10182_v43  ;;  %v10245_v43 = vld [vmem:[#allocation6 + $0x36c] ss:$16 sps:$4 sm:$0xff]  }
 0x44c   :  { %7491 = vmatpush2.bf16.msra.mxu1 %v10177_v38  ;;  %v10243_v38 = vld [vmem:[#allocation6 + $0x368] ss:$16 sps:$4 sm:$0xff]  }
 0x44d   :  { %7706 = vmatpush2.bf16.msra.mxu0 %v10180_v35  ;;  %7492 = vmatprep.subr.bf16.mxu1 %v10185_v40  ;;  %v10248_v35 = vld [vmem:[#allocation6 + $0x34c] ss:$16 sps:$4 sm:$0xff]   ;;  %v10246_v40 = vld [vmem:[#allocation6 + $0x348] ss:$16 sps:$4 sm:$0xff]  }
 0x44e   :  { %7707 = vmatprep.subr.bf16.mxu0 %v10188_v29  ;;  %v10251_v29 = vld [vmem:[#allocation6 + $0x32c] ss:$16 sps:$4 sm:$0xff]  }
 0x450   :  { %7493 = vmatpush2.bf16.msra.mxu1 %v10183_v46  ;;  %v10249_v46 = vld [vmem:[#allocation6 + $0x328] ss:$16 sps:$4 sm:$0xff]  }
 0x451   :  { %7708 = vmatpush2.bf16.msra.mxu0 %v10186_v56  ;;  %7494 = vmatprep.subr.bf16.mxu1 %v10191_v15  ;;  %v10254_v56 = vld [vmem:[#allocation6 + $0x30c] ss:$16 sps:$4 sm:$0xff]   ;;  %v10252_v15 = vld [vmem:[#allocation6 + $0x308] ss:$16 sps:$4 sm:$0xff]  }
 0x452   :  { %7709 = vmatprep.subr.bf16.mxu0 %v10194_v48  ;;  %v10257_v48 = vld [vmem:[#allocation6 + $0x6ec] ss:$16 sps:$4 sm:$0xff]  }
 0x454   :  { %7495 = vmatpush2.bf16.msra.mxu1 %v10189_v50  ;;  %v10255_v50 = vld [vmem:[#allocation6 + $0x6e8] ss:$16 sps:$4 sm:$0xff]  }
 0x455   :  { %7710 = vmatpush2.bf16.msra.mxu0 %v10192_v55  ;;  %7496 = vmatprep.subr.bf16.mxu1 %v10197_v17  ;;  %v10260_v55 = vld [vmem:[#allocation6 + $0x6cc] ss:$16 sps:$4 sm:$0xff]   ;;  %v10258_v17 = vld [vmem:[#allocation6 + $0x6c8] ss:$16 sps:$4 sm:$0xff]  }
 0x456   :  { %7711 = vmatprep.subr.bf16.mxu0 %v10200_v49  ;;  %v10263_v49 = vld [vmem:[#allocation6 + $0x6ac] ss:$16 sps:$4 sm:$0xff]  }
 0x458   :  { %7497 = vmatpush2.bf16.msra.mxu1 %v10195_v57  ;;  %v10261_v57 = vld [vmem:[#allocation6 + $0x6a8] ss:$16 sps:$4 sm:$0xff]  }
 0x459   :  { %7712 = vmatpush2.bf16.msra.mxu0 %v10198_v42  ;;  %7498 = vmatprep.subr.bf16.mxu1 %v10203_v61  ;;  %v10266_v42 = vld [vmem:[#allocation6 + $0x68c] ss:$16 sps:$4 sm:$0xff]   ;;  %v10264_v61 = vld [vmem:[#allocation6 + $0x688] ss:$16 sps:$4 sm:$0xff]  }
 0x45a   :  { %7713 = vmatprep.subr.bf16.mxu0 %v10206_v60  ;;  %v10269_v60 = vld [vmem:[#allocation6 + $0x66c] ss:$16 sps:$4 sm:$0xff]  }
 0x45c   :  { %7499 = vmatpush2.bf16.msra.mxu1 %v10201_v62  ;;  %v10267_v62 = vld [vmem:[#allocation6 + $0x668] ss:$16 sps:$4 sm:$0xff]  }
 0x45d   :  { %7714 = vmatpush2.bf16.msra.mxu0 %v10204_v47  ;;  %7554 = vmatprep.subr.bf16.mxu1 %v10209_v14  ;;  %v10272_v47 = vld [vmem:[#allocation6 + $0x64c] ss:$16 sps:$4 sm:$0xff]  }
 0x45e   :  { %v10275_v14 = vld [vmem:[#allocation6 + $0x62c] ss:$16 sps:$4 sm:$0xff]  }
 0x45f   :  { %7501 = vmatmul.mubr.bf16.vlgmr.msra.gmra.mxu1 %v11430_v36 }
 0x460   :  { %7716 = vmatmul.mubr.bf16.vlgmr.msra.gmra.mxu0 %v11386_v3  ;;  %7555 = vmatpush1.bf16.msra.mxu1 %v10207_v24  ;;  %v10222_v3 = vld [vmem:[#allocation6 + $0x248] ss:$16 sps:$4 sm:$0xff]   ;;  %v10278_v24 = vld [vmem:[#allocation6 + $0x60c] ss:$16 sps:$4 sm:$0xff]  }
 0x461   :  { %7586 = vmatprep.mubr.bf16.mxu1 %v11421_v58  ;;  %7556 = vmatprep.subr.bf16.mxu1 %v10212_v25  ;;  %v10225_v58 = vld [vmem:[#allocation6 + $0x228] ss:$16 sps:$4 sm:$0xff]  }
 0x462   :  { %v10276_v25 = vld [vmem:[#allocation6 + $0x608] ss:$16 sps:$4 sm:$0xff]  }
 0x464   :  { %7557 = vmatpush1.bf16.msra.mxu1 %v10210_v63  ;;  %v10281_v63 = vld [vmem:[#allocation6 + $0x7ec] ss:$16 sps:$4 sm:$0xff]  }
 0x465   :  { %7558 = vmatprep.subr.bf16.mxu1 %v10215_v4  ;;  %v10279_v4 = vld [vmem:[#allocation6 + $0x7e8] ss:$16 sps:$4 sm:$0xff]  }
 0x468   :  { %7559 = vmatpush1.bf16.msra.mxu1 %v10213_v44  ;;  %v10284_v44 = vld [vmem:[#allocation6 + $0x7cc] ss:$16 sps:$4 sm:$0xff]  }
 0x469   :  { %7560 = vmatprep.subr.bf16.mxu1 %v10218_v1  ;;  %v10282_v1 = vld [vmem:[#allocation6 + $0x7c8] ss:$16 sps:$4 sm:$0xff]  }
 0x46c   :  { %7561 = vmatpush1.bf16.msra.mxu1 %v10216_v32  ;;  %v10287_v32 = vld [vmem:[#allocation6 + $0x7ac] ss:$16 sps:$4 sm:$0xff]  }
 0x46d   :  { %7562 = vmatprep.subr.bf16.mxu1 %v10221_v10  ;;  %v10285_v10 = vld [vmem:[#allocation6 + $0x7a8] ss:$16 sps:$4 sm:$0xff]  }
 0x470   :  { %7563 = vmatpush1.bf16.msra.mxu1 %v10219_v45  ;;  %v10290_v45 = vld [vmem:[#allocation6 + $0x78c] ss:$16 sps:$4 sm:$0xff]  }
 0x471   :  { %7564 = vmatprep.subr.bf16.mxu1 %v10224_v33  ;;  %v10288_v33 = vld [vmem:[#allocation6 + $0x788] ss:$16 sps:$4 sm:$0xff]  }
 0x474   :  { %7565 = vmatpush1.bf16.msra.mxu1 %v10222_v3  ;;  %v10293_v3 = vld [vmem:[#allocation6 + $0x76c] ss:$16 sps:$4 sm:$0xff]  }
 0x475   :  { %7566 = vmatprep.subr.bf16.mxu1 %v10227_v27  ;;  %v10291_v27 = vld [vmem:[#allocation6 + $0x768] ss:$16 sps:$4 sm:$0xff]  }
 0x478   :  { %7567 = vmatpush1.bf16.msra.mxu1 %v10225_v58  ;;  %v10296_v58 = vld [vmem:[#allocation6 + $0x74c] ss:$16 sps:$4 sm:$0xff]  }
 0x479   :  { %7568 = vmatprep.subr.bf16.mxu1 %v10230_v52  ;;  %v10294_v52 = vld [vmem:[#allocation6 + $0x748] ss:$16 sps:$4 sm:$0xff]  }
 0x47c   :  { %7569 = vmatpush1.bf16.msra.mxu1 %v10228_v19  ;;  %v10299_v19 = vld [vmem:[#allocation6 + $0x72c] ss:$16 sps:$4 sm:$0xff]  }
 0x47d   :  { %7570 = vmatprep.subr.bf16.mxu1 %v10233_v5  ;;  %v10297_v5 = vld [vmem:[#allocation6 + $0x728] ss:$16 sps:$4 sm:$0xff]  }
 0x480   :  { %7571 = vmatpush2.bf16.msra.mxu1 %v10231_v39  ;;  %v10302_v39 = vld [vmem:[#allocation6 + $0x70c] ss:$16 sps:$4 sm:$0xff]  }
 0x481   :  { %7572 = vmatprep.subr.bf16.mxu1 %v10236_v34  ;;  %v10300_v34 = vld [vmem:[#allocation6 + $0x708] ss:$16 sps:$4 sm:$0xff]  }
 0x484   :  { %7573 = vmatpush2.bf16.msra.mxu1 %v10234_v41  ;;  %v10305_v41 = vld [vmem:[#allocation6 + $0xaec] ss:$16 sps:$4 sm:$0xff]  }
 0x485   :  { %7574 = vmatprep.subr.bf16.mxu1 %v10239_v26  ;;  %v10303_v26 = vld [vmem:[#allocation6 + $0xae8] ss:$16 sps:$4 sm:$0xff]  }
 0x488   :  { %7575 = vmatpush2.bf16.msra.mxu1 %v10237_v0  ;;  %v10308_v0 = vld [vmem:[#allocation6 + $0xacc] ss:$16 sps:$4 sm:$0xff]  }
 0x489   :  { %7576 = vmatprep.subr.bf16.mxu1 %v10242_v18  ;;  %v10306_v18 = vld [vmem:[#allocation6 + $0xac8] ss:$16 sps:$4 sm:$0xff]  }
 0x48c   :  { %7577 = vmatpush2.bf16.msra.mxu1 %v10240_v7  ;;  %v10311_v7 = vld [vmem:[#allocation6 + $0xaac] ss:$16 sps:$4 sm:$0xff]  }
 0x48d   :  { %7578 = vmatprep.subr.bf16.mxu1 %v10245_v43  ;;  %v10309_v43 = vld [vmem:[#allocation6 + $0xaa8] ss:$16 sps:$4 sm:$0xff]  }
 0x490   :  { %7579 = vmatpush2.bf16.msra.mxu1 %v10243_v38  ;;  %v10314_v38 = vld [vmem:[#allocation6 + $0xa8c] ss:$16 sps:$4 sm:$0xff]  }
 0x491   :  { %7580 = vmatprep.subr.bf16.mxu1 %v10248_v35  ;;  %v10312_v35 = vld [vmem:[#allocation6 + $0xa88] ss:$16 sps:$4 sm:$0xff]  }
 0x494   :  { %7581 = vmatpush2.bf16.msra.mxu1 %v10246_v40  ;;  %v10317_v40 = vld [vmem:[#allocation6 + $0xa6c] ss:$16 sps:$4 sm:$0xff]  }
 0x495   :  { %7582 = vmatprep.subr.bf16.mxu1 %v10251_v29  ;;  %v10315_v29 = vld [vmem:[#allocation6 + $0xa68] ss:$16 sps:$4 sm:$0xff]  }
 0x498   :  { %7583 = vmatpush2.bf16.msra.mxu1 %v10249_v46  ;;  %v10320_v46 = vld [vmem:[#allocation6 + $0xa4c] ss:$16 sps:$4 sm:$0xff]  }
 0x499   :  { %7584 = vmatprep.subr.bf16.mxu1 %v10254_v56  ;;  %v10323_v56 = vld [vmem:[#allocation6 + $0xa2c] ss:$16 sps:$4 sm:$0xff]  }
 0x49c   :  { %7585 = vmatpush2.bf16.msra.mxu1 %v10252_v15  ;;  %v10326_v15 = vld [vmem:[#allocation6 + $0xa0c] ss:$16 sps:$4 sm:$0xff]  }
 0x49d   :  { %7640 = vmatprep.subr.bf16.mxu1 %v10257_v48  ;;  %v10324_v48 = vld [vmem:[#allocation6 + $0xa08] ss:$16 sps:$4 sm:$0xff]  }
 0x49f   :  { %7587 = vmatmul.mubr.bf16.vlgmr.msra.gmra.mxu1 %v11419_v16  ;;  %v10270_v16 = vld [vmem:[#allocation6 + $0x648] ss:$16 sps:$4 sm:$0xff]  }
 0x4a0   :  { %7641 = vmatpush1.bf16.msra.mxu1 %v10255_v50  ;;  %7672 = vmatprep.mubr.bf16.mxu1 %v11436_v59  ;;  %v10273_v59 = vld [vmem:[#allocation6 + $0x628] ss:$16 sps:$4 sm:$0xff]   ;;  %v10329_v50 = vld [vmem:[#allocation6 + $0xbec] ss:$16 sps:$4 sm:$0xff]  }
 0x4a1   :  { %7642 = vmatprep.subr.bf16.mxu1 %v10260_v55  ;;  %v7287_v55 = vpop.f32.mrf.mxu0 }
 0x4a4   :  { %7643 = vmatpush1.bf16.msra.mxu1 %v10258_v17  ;;  %v10327_v17 = vld [vmem:[#allocation6 + $0xbe8] ss:$16 sps:$4 sm:$0xff]  }
 0x4a5   :  { %7644 = vmatprep.subr.bf16.mxu1 %v10263_v49  ;;  %v10332_v49 = vld [vmem:[#allocation6 + $0xbcc] ss:$16 sps:$4 sm:$0xff]  }
 0x4a8   :  { %7645 = vmatpush1.bf16.msra.mxu1 %v10261_v57  ;;  %v7289_v57 = vpop.f32.mrf.mxu0 }
 0x4a9   :  { %7646 = vmatprep.subr.bf16.mxu1 %v10266_v42  ;;  %v10330_v42 = vld [vmem:[#allocation6 + $0xbc8] ss:$16 sps:$4 sm:$0xff]  }
 0x4ac   :  { %7647 = vmatpush1.bf16.msra.mxu1 %v10264_v61  ;;  %v10335_v61 = vld [vmem:[#allocation6 + $0xbac] ss:$16 sps:$4 sm:$0xff]  }
 0x4ad   :  { %7648 = vmatprep.subr.bf16.mxu1 %v10269_v60  ;;  %v7291_v60 = vpop.f32.mrf.mxu0 }
 0x4b0   :  { %7649 = vmatpush1.bf16.msra.mxu1 %v10267_v62  ;;  %v7330_v62 = vpop.f32.mrf.mxu1 }
 0x4b1   :  { %7650 = vmatprep.subr.bf16.mxu1 %v10272_v47  ;;  %v10333_v47 = vld [vmem:[#allocation6 + $0xba8] ss:$16 sps:$4 sm:$0xff]  }
 0x4b4   :  { %7651 = vmatpush1.bf16.msra.mxu1 %v10270_v16  ;;  %v10338_v16 = vld [vmem:[#allocation6 + $0xb8c] ss:$16 sps:$4 sm:$0xff]  }
 0x4b5   :  { %7652 = vmatprep.subr.bf16.mxu1 %v10275_v14  ;;  %v7293_v14 = vpop.f32.mrf.mxu0 }
 0x4b8   :  { %7653 = vmatpush1.bf16.msra.mxu1 %v10273_v59  ;;  %v7332_v59 = vpop.f32.mrf.mxu1 }
 0x4b9   :  { %7654 = vmatprep.subr.bf16.mxu1 %v10278_v24  ;;  %v10336_v24 = vld [vmem:[#allocation6 + $0xb88] ss:$16 sps:$4 sm:$0xff]  }
 0x4bc   :  { %7655 = vmatpush1.bf16.msra.mxu1 %v10276_v25  ;;  %v7373_v25 = vpop.f32.mrf.mxu0 }
 0x4bd   :  { %7656 = vmatprep.subr.bf16.mxu1 %v10281_v63  ;;  %v10341_v63 = vld [vmem:[#allocation6 + $0xb6c] ss:$16 sps:$4 sm:$0xff]  }
 0x4c0   :  { %7657 = vmatpush2.bf16.msra.mxu1 %v10279_v4  ;;  %v7334_v4 = vpop.f32.mrf.mxu1 }
 0x4c1   :  { %7658 = vmatprep.subr.bf16.mxu1 %v10284_v44  ;;  %v10339_v44 = vld [vmem:[#allocation6 + $0xb68] ss:$16 sps:$4 sm:$0xff]  }
 0x4c4   :  { %7659 = vmatpush2.bf16.msra.mxu1 %v10282_v1  ;;  %v7375_v1 = vpop.f32.mrf.mxu0 }
 0x4c5   :  { %7660 = vmatprep.subr.bf16.mxu1 %v10287_v32  ;;  %v10344_v32 = vld [vmem:[#allocation6 + $0xb4c] ss:$16 sps:$4 sm:$0xff]  }
 0x4c8   :  { %7661 = vmatpush2.bf16.msra.mxu1 %v10285_v10  ;;  %v7336_v10 = vpop.f32.mrf.mxu1 }
 0x4c9   :  { %7662 = vmatprep.subr.bf16.mxu1 %v10290_v45  ;;  %v10342_v45 = vld [vmem:[#allocation6 + $0xb48] ss:$16 sps:$4 sm:$0xff]  }
 0x4cc   :  { %7663 = vmatpush2.bf16.msra.mxu1 %v10288_v33  ;;  %v7377_v33 = vpop.f32.mrf.mxu0 }
 0x4cd   :  { %7664 = vmatprep.subr.bf16.mxu1 %v10293_v3 }
 0x4d0   :  { %7665 = vmatpush2.bf16.msra.mxu1 %v10291_v27  ;;  %v10347_v27 = vld [vmem:[#allocation6 + $0xb2c] ss:$16 sps:$4 sm:$0xff]  }
 0x4d1   :  { %7666 = vmatprep.subr.bf16.mxu1 %v10296_v58  ;;  %v7331_v58 = vadd.f32 %v7330_v62, %v7287_v55 }
 0x4d4   :  { %7667 = vmatpush2.bf16.msra.mxu1 %v10294_v52  ;;  %v10345_v52 = vld [vmem:[#allocation6 + $0xb28] ss:$16 sps:$4 sm:$0xff]  }
 0x4d5   :  { %7668 = vmatprep.subr.bf16.mxu1 %v10299_v19  ;;  %v7379_v19 = vpop.f32.mrf.mxu0 }
 0x4d8   :  { %7669 = vmatpush2.bf16.msra.mxu1 %v10297_v5 }
 0x4d9   :  { %7670 = vmatprep.subr.bf16.mxu1 %v10302_v39  ;;  %v10350_v39 = vld [vmem:[#allocation6 + $0xb0c] ss:$16 sps:$4 sm:$0xff]  }
 0x4dc   :  { %7671 = vmatpush2.bf16.msra.mxu1 %v10300_v34  ;;  %v7333_v34 = vadd.f32 %v7332_v59, %v7289_v57 }
 0x4dd   :  { %7726 = vmatprep.subr.bf16.mxu1 %v10305_v41  ;;  %v11451_v41 = vld [vmem:[#allocation8 + $0x10] sm:$0xff] }
 0x4de   :  { %v7821_v57 = vrot.slane %v11451_v41, %v11139_v54 }
 0x4df   :  { %7673 = vmatmul.mubr.bf16.vlgmr.msra.gmra.mxu1 %v11411_v2  ;;  %v10318_v2 = vld [vmem:[#allocation6 + $0xa48] ss:$16 sps:$4 sm:$0xff]   ;;  %v7416_v3 = vpop.f32.mrf.mxu1 }
 0x4e0   :  { %7727 = vmatpush1.bf16.msra.mxu1 %v10303_v26  ;;  %7758 = vmatprep.mubr.bf16.mxu1 %v11432_v53  ;;  %v10321_v53 = vld [vmem:[#allocation6 + $0xa28] ss:$16 sps:$4 sm:$0xff]   ;;  %v7459_v26 = vpop.f32.mrf.mxu0 }
 0x4e1   :  { %7728 = vmatprep.subr.bf16.mxu1 %v10308_v0  ;;  %v7418_v5 = vpop.f32.mrf.mxu1  ;;  %v7335_v0 = vadd.f32 %v7334_v4, %v7291_v60 }
 0x4e4   :  { %7729 = vmatpush1.bf16.msra.mxu1 %v10306_v18  ;;  %v7374_v18 = vadd.f32 %v7373_v25, %v7331_v58  ;;  %v7841_v25 = vrot.slane %v7821_v57, %v11131_v30 }
 0x4e5   :  { %7730 = vmatprep.subr.bf16.mxu1 %v10311_v7  ;;  %v10348_v7 = vld [vmem:[#allocation6 + $0xb08] ss:$16 sps:$4 sm:$0xff]  }
 0x4e8   :  { %7731 = vmatpush1.bf16.msra.mxu1 %v10309_v43  ;;  %v7420_v43 = vpop.f32.mrf.mxu1 }
 0x4e9   :  { %7732 = vmatprep.subr.bf16.mxu1 %v10314_v38  ;;  %v7773_v38 = vrot.slane %v11451_v41, %v11126_v51 }
 0x4ec   :  { %7733 = vmatpush1.bf16.msra.mxu1 %v10312_v35  ;;  %v7337_v35 = vadd.f32 %v7336_v10, %v7293_v14 }
 0x4ed   :  { %7734 = vmatprep.subr.bf16.mxu1 %v10317_v40  ;;  %v7417_v40 = vadd.f32 %v7416_v3, %v7374_v18 }
 0x4f0   :  { %7735 = vmatpush1.bf16.msra.mxu1 %v10315_v29  ;;  %v7376_v29 = vadd.f32 %v7375_v1, %v7333_v34 }
 0x4f1   :  { %7736 = vmatprep.subr.bf16.mxu1 %v10320_v46  ;;  %v7461_v46 = vpop.f32.mrf.mxu0 }
 0x4f4   :  { %7737 = vmatpush1.bf16.msra.mxu1 %v10318_v2  ;;  %v7817_v2 = vrot.slane %v11451_v41, %v11131_v30 }
 0x4f5   :  { %7738 = vmatprep.subr.bf16.mxu1 %v10323_v56  ;;  %v7419_v56 = vadd.f32 %v7418_v5, %v7376_v29 }
 0x4f6   :  { %v7837_v60 = vrot.slane %v7817_v2, %v11131_v30 }
 0x4f8   :  { %7739 = vmatpush1.bf16.msra.mxu1 %v10321_v53  ;;  %v7378_v53 = vadd.f32 %v7377_v33, %v7335_v0 }
 0x4f9   :  { %7740 = vmatprep.subr.bf16.mxu1 %v10326_v15  ;;  %v7777_v15 = vrot.slane %v11451_v41, %v11134_v37 }
 0x4fa   :  { %v7421_v55 = vadd.f32 %v7420_v43, %v7378_v53 }
 0x4fb   :  { %v7797_v37 = vrot.slane %v7777_v15, %v11126_v51 }
 0x4fc   :  { %7741 = vmatpush1.bf16.msra.mxu1 %v10324_v48  ;;  %v7422_v48 = vpop.f32.mrf.mxu1 }
 0x4fd   :  { %7742 = vmatprep.subr.bf16.mxu1 %v10329_v50  ;;  %v7793_v50 = vrot.slane %v7773_v38, %v11126_v51 }
 0x500   :  { %7743 = vmatpush2.bf16.msra.mxu1 %v10327_v17  ;;  %v7380_v17 = vadd.f32 %v7379_v19, %v7337_v35 }
 0x501   :  { %7744 = vmatprep.subr.bf16.mxu1 %v10332_v49  ;;  %v7460_v49 = vadd.f32 %v7459_v26, %v7417_v40 }
 0x502   :  { %v7423_v62 = vadd.f32 %v7422_v48, %v7380_v17 }
 0x504   :  { %7745 = vmatpush2.bf16.msra.mxu1 %v10330_v42  ;;  %v7463_v42 = vpop.f32.mrf.mxu0 }
 0x505   :  { %7746 = vmatprep.subr.bf16.mxu1 %v10335_v61 }
 0x506   :  { %v7465_v4 = vpop.f32.mrf.mxu0 }
 0x507   :  { %v7466_v10 = vadd.f32 %v7465_v4, %v7423_v62 }
 0x508   :  { %7747 = vmatpush2.bf16.msra.mxu1 %v10333_v47  ;;  %v7545_v18 = vpop.f32.mrf.mxu0 }
 0x509   :  { %7748 = vmatprep.subr.bf16.mxu1 %v10338_v16  ;;  %v7462_v16 = vadd.f32 %v7461_v46, %v7419_v56 }
 0x50c   :  { %7749 = vmatpush2.bf16.msra.mxu1 %v10336_v24 }
 0x50d   :  { %7750 = vmatprep.subr.bf16.mxu1 %v10341_v63  ;;  %v7464_v63 = vadd.f32 %v7463_v42, %v7421_v55  ;;  %v7781_v42 = vrot.slane %v11451_v41, %v11203_v6  ;;  %v7829_v6 = vrot.slane %v11451_v41, %v11214_v13 }
 0x510   :  { %7751 = vmatpush2.bf16.msra.mxu1 %v10339_v44 }
 0x511   :  { %7752 = vmatprep.subr.bf16.mxu1 %v10344_v32 }
 0x514   :  { %7753 = vmatpush2.bf16.msra.mxu1 %v10342_v45 }
 0x515   :  { %7754 = vmatprep.subr.bf16.mxu1 %v10347_v27 }
 0x518   :  { %7755 = vmatpush2.bf16.msra.mxu1 %v10345_v52 }
 0x519   :  { %7756 = vmatprep.subr.bf16.mxu1 %v10350_v39 }
 0x51c   :  { %7757 = vmatpush2.bf16.msra.mxu1 %v10348_v7  ;;  %v7547_v7 = vpop.f32.mrf.mxu0 }
 0x51f   :  { %v7502_v61 = vpop.f32.mrf.mxu1  ;;  %7759 = vmatmul.mubr.bf16.vlgmr.msra.gmra.mxu1 %v11430_v36 }
 0x520   :  { %v7503_v47 = vadd.f32 %v7502_v61, %v7460_v49 }
 0x521   :  { %v7504_v14 = vpop.f32.mrf.mxu1 }
 0x522   :  { %v7806_v59 = vmul.f32 %v7793_v50, %v7503_v47  ;;  %v7505_v24 = vadd.f32 %v7504_v14, %v7462_v16  ;;  %v7825_v16 = vrot.slane %v11451_v41, %v11206_v8 }
 0x523   :  { %v7506_v44 = vpop.f32.mrf.mxu1 }
 0x524   :  { %v7850_v54 = vadd.f32 %v7837_v60, %v7806_v59  ;;  %v7807_v1 = vmul.f32 %v7797_v37, %v7505_v24  ;;  %v7507_v32 = vadd.f32 %v7506_v44, %v7464_v63  ;;  %v7785_v59 = vrot.slane %v11451_v41, %v11209_v9 }
 0x525   :  { %v7508_v45 = vpop.f32.mrf.mxu1 }
 0x526   :  { %v7858_v36 = vadd.f32 %v7850_v54, %v11151_v20  ;;  %v7851_v33 = vadd.f32 %v7841_v25, %v7807_v1  ;;  %v7810_v3 = vmul.f32 %v7793_v50, %v7507_v32  ;;  %v7509_v27 = vadd.f32 %v7508_v45, %v7466_v10 }
 0x527   :  { %v7845_v32 = vrot.slane %v7825_v16, %v11131_v30 }
 0x528   :  { %v7866_v58 = vmax.f32 %v7858_v36, 0.0  ;;  %v7859_v52 = vadd.f32 %v7851_v33, %v11153_v21  ;;  %v7854_v19 = vadd.f32 %v7837_v60, %v7810_v3  ;;  %v7811_v5 = vmul.f32 %v7797_v37, %v7509_v27 }
 0x529   :  { %v7805_v36 = vrot.slane %v7785_v59, %v11126_v51  ;;  %v7849_v27 = vrot.slane %v7829_v6, %v11131_v30 }
 0x52a   :  { %7874 = vst [vmem:[%s11515_s5] sm:$0xff] %v7866_v58  ;;  %v7867_v39 = vmax.f32 %v7859_v52, 0.0  ;;  %v7862_v34 = vadd.f32 %v7854_v19, %v11160_v28  ;;  %v7855_v26 = vadd.f32 %v7841_v25, %v7811_v5  ;;  %v7549_v28 = vpop.f32.mrf.mxu0  ;;  %v7801_v25 = vrot.slane %v7781_v42, %v11126_v51 }
 0x52c   :  { %7875 = vst [vmem:[%s11515_s5 + $0x8] sm:$0xff] %v7867_v39  ;;  %v7870_v20 = vmax.f32 %v7862_v34, 0.0  ;;  %v7863_v0 = vadd.f32 %v7855_v26, %v11162_v31  ;;  %v7551_v38 = vpop.f32.mrf.mxu0 }
 0x52e   :  { %7878 = vst [vmem:[%s11515_s5 + $0x20] sm:$0xff] %v7870_v20  ;;  %v7871_v21 = vmax.f32 %v7863_v0, 0.0  ;;  %v7631_v40 = vpop.f32.mrf.mxu0 }
 0x530   :  { %7879 = vst [vmem:[%s11515_s5 + $0x28] sm:$0xff] %v7871_v21  ;;  %v7633_v46 = vpop.f32.mrf.mxu0 }
 0x532   :  { %v7635_v31 = vpop.f32.mrf.mxu0 }
 0x534   :  { %v7637_v15 = vpop.f32.mrf.mxu0 }
 0x536   :  { %v7717_v55 = vpop.f32.mrf.mxu0 }
 0x538   :  { %v7719_v47 = vpop.f32.mrf.mxu0 }
 0x53a   :  { %v7721_v54 = vpop.f32.mrf.mxu0 }
 0x53c   :  { %v7723_v52 = vpop.f32.mrf.mxu0 }
 0x55f   :  { %v7588_v43 = vpop.f32.mrf.mxu1 }
 0x560   :  { %v7589_v53 = vadd.f32 %v7588_v43, %v7545_v18 }
 0x561   :  { %v7590_v35 = vpop.f32.mrf.mxu1 }
 0x562   :  { %v7591_v50 = vadd.f32 %v7590_v35, %v7547_v7  ;;  %v7632_v49 = vadd.f32 %v7631_v40, %v7589_v53 }
 0x563   :  { %v7592_v29 = vpop.f32.mrf.mxu1 }
 0x564   :  { %v7593_v17 = vadd.f32 %v7592_v29, %v7549_v28  ;;  %v7634_v62 = vadd.f32 %v7633_v46, %v7591_v50 }
 0x565   :  { %v7594_v2 = vpop.f32.mrf.mxu1 }
 0x566   :  { %v7595_v61 = vadd.f32 %v7594_v2, %v7551_v38  ;;  %v7636_v14 = vadd.f32 %v7635_v31, %v7593_v17 }
 0x568   :  { %v7638_v4 = vadd.f32 %v7637_v15, %v7595_v61 }
 0x59f   :  { %v7674_v56 = vpop.f32.mrf.mxu1 }
 0x5a0   :  { %v7675_v60 = vadd.f32 %v7674_v56, %v7632_v49 }
 0x5a1   :  { %v7676_v48 = vpop.f32.mrf.mxu1 }
 0x5a2   :  { %v7677_v37 = vadd.f32 %v7676_v48, %v7634_v62  ;;  %v7718_v44 = vadd.f32 %v7717_v55, %v7675_v60 }
 0x5a3   :  { %v7678_v57 = vpop.f32.mrf.mxu1 }
 0x5a4   :  { %v7679_v63 = vadd.f32 %v7678_v57, %v7636_v14  ;;  %v7720_v45 = vadd.f32 %v7719_v47, %v7677_v37 }
 0x5a5   :  { %v7680_v24 = vpop.f32.mrf.mxu1 }
 0x5a6   :  { %v7681_v10 = vadd.f32 %v7680_v24, %v7638_v4  ;;  %v7722_v58 = vadd.f32 %v7721_v54, %v7679_v63 }
 0x5a8   :  { %v7724_v41 = vadd.f32 %v7723_v52, %v7681_v10 }
 0x5df   :  { %v7760_v1 = vpop.f32.mrf.mxu1 }
 0x5e0   :  { %v7761_v8 = vadd.f32 %v7760_v1, %v7718_v44 }
 0x5e1   :  { %v7762_v33 = vpop.f32.mrf.mxu1 }
 0x5e2   :  { %v7808_v9 = vmul.f32 %v7801_v25, %v7761_v8  ;;  %v7763_v3 = vadd.f32 %v7762_v33, %v7720_v45 }
 0x5e3   :  { %v7764_v19 = vpop.f32.mrf.mxu1 }
 0x5e4   :  { %v7852_v5 = vadd.f32 %v7845_v32, %v7808_v9  ;;  %v7809_v39 = vmul.f32 %v7805_v36, %v7763_v3  ;;  %v7765_v13 = vadd.f32 %v7764_v19, %v7722_v58 }
 0x5e5   :  { %v7766_v34 = vpop.f32.mrf.mxu1 }
 0x5e6   :  { %v7860_v26 = vadd.f32 %v7852_v5, %v11230_v11  ;;  %v7853_v20 = vadd.f32 %v7849_v27, %v7809_v39  ;;  %v7812_v0 = vmul.f32 %v7801_v25, %v7765_v13  ;;  %v7767_v21 = vadd.f32 %v7766_v34, %v7724_v41 }
 0x5e8   :  { %v7868_v18 = vmax.f32 %v7860_v26, 0.0  ;;  %v7861_v51 = vadd.f32 %v7853_v20, %v11232_v12  ;;  %v7856_v7 = vadd.f32 %v7845_v32, %v7812_v0  ;;  %v7813_v28 = vmul.f32 %v7805_v36, %v7767_v21 }
 0x5ea   :  { %7876 = vst [vmem:[%s11515_s5 + $0x10] sm:$0xff] %v7868_v18  ;;  %v7869_v30 = vmax.f32 %v7861_v51, 0.0  ;;  %v7864_v43 = vadd.f32 %v7856_v7, %v11243_v22  ;;  %v7857_v38 = vadd.f32 %v7849_v27, %v7813_v28 }
 0x5ec   :  { %7877 = vst [vmem:[%s11515_s5 + $0x18] sm:$0xff] %v7869_v30  ;;  %v7872_v11 = vmax.f32 %v7864_v43, 0.0  ;;  %v7865_v35 = vadd.f32 %v7857_v38, %v11245_v23 }
 0x5ee   :  { %7880 = vst [vmem:[%s11515_s5 + $0x30] sm:$0xff] %v7872_v11  ;;  %v7873_v12 = vmax.f32 %v7865_v35, 0.0 }
 0x5f0   :  { %7881 = vst [vmem:[%s11515_s5 + $0x38] sm:$0xff] %v7873_v12 }
 0x5f1   :  { %7886 = vsyncpa [#allocation5], 1 }
 0x5f2   :  { %7887 = vsyncpa [#allocation7], 1 }

</bundles_post_ra>
